<compile_context>
chip_gen: v5e
topology: v5e:2x2
jax: 0.10.0
libtpu: 0.0.40
codegen_flags: <defaults>
</compile_context>

<pallas_src>
import functools

import numpy as np

import jax
import jax.numpy as jnp
from jax.experimental import pallas as pl
from jax.experimental.pallas import tpu as pltpu


# ----------------------------------------------------------------------------
# Fused kernel: one grid step == `bblk` batch elements, stacked along rows.
# refs: x_ref (bblk*T, cm), packed_ref (R, 128), upsel_ref,
#       dec_ref (bblk*T, cm), idx_ref (bblk*tenc, 1), q_ref (bblk*tenc, D),
#       pad_ref VMEM scratch (staging for the strided down-convs only).
# ----------------------------------------------------------------------------
def _vqvae2_fused_kernel(x_ref, packed_ref, upsel_ref, dec_ref, idx_ref, q_ref,
                         pad_ref, *, entries, vq_meta, net, bblk):
    down_t, stride_t, depth, dgr = net
    cb_off, cbt_off, cbsq_off, n_code, code_dim = vq_meta
    f32 = jnp.float32
    consumed = [0]

    def slab(off, rows, cols):
        # Static-offset view into the packed constant slab (8-row aligned).
        return packed_ref[off:off + rows, 0:cols]

    def conv(h, t_in, *, stride=1, pad=0, dil=1, pre_relu=False, post_relu=False):
        """PyTorch-style Conv1d on a row-stacked (bblk*t_in, Cin) slab."""
        w_off, K, cin, cout, b_off = entries[consumed[0]]
        consumed[0] += 1
        assert h.shape == (bblk * t_in, cin)
        if pre_relu:
            # ReLU commutes with zero padding (relu(0)==0), so apply on values.
            h = jnp.maximum(h, 0.0)
        w = slab(w_off, K * cin, cout)                  # (K*Cin, Cout) im2col weight
        b = slab(b_off, 1, cout)                        # (1, Cout) bias

        if K == 1 and pad == 0 and stride == 1:
            out = jnp.dot(h, w, preferred_element_type=f32) + b
        elif stride == 1:
            # 'same'-style conv: build the im2col slab purely in vregs.
            t_out = t_in + 2 * pad - dil * (K - 1)
            blocks = []
            for bi in range(bblk):
                hb = h[bi * t_in:(bi + 1) * t_in]
                taps = []
                for k in range(K):
                    lo = k * dil - pad                  # source row of output row 0
                    z_top = max(0, -lo)
                    src_lo = max(0, lo)
                    src_hi = min(t_in, lo + t_out)
                    nsrc = max(0, src_hi - src_lo)
                    z_bot = t_out - z_top - nsrc
                    parts = []
                    if z_top:
                        parts.append(jnp.zeros((z_top, cin), f32))
                    if nsrc:
                        parts.append(hb[src_lo:src_lo + nsrc])
                    if z_bot:
                        parts.append(jnp.zeros((z_bot, cin), f32))
                    taps.append(parts[0] if len(parts) == 1
                                else jnp.concatenate(parts, axis=0))
                blocks.append(taps[0] if K == 1 else jnp.concatenate(taps, axis=1))
            cols = blocks[0] if bblk == 1 else jnp.concatenate(blocks, axis=0)
            out = jnp.dot(cols, w, preferred_element_type=f32) + b
        else:
            # Strided down-conv: zero-padded VMEM staging + strided reads of
            # only the needed output rows (no selection matmul).
            assert cin == pad_ref.shape[1]
            seg = t_in + 2 * pad
            t_out = (t_in + 2 * pad - dil * (K - 1) - 1) // stride + 1
            for bi in range(bblk):
                base = bi * seg
                if pad:
                    z = jnp.zeros((pad, cin), f32)
                    pad_ref[base:base + pad, :] = z
                    pad_ref[base + pad + t_in:base + seg, :] = z
                pad_ref[base + pad:base + pad + t_in, :] = h[bi * t_in:(bi + 1) * t_in]
            blocks = []
            for bi in range(bblk):
                base = bi * seg
                taps = [pad_ref[pl.ds(base + k * dil, t_out, stride), :]
                        for k in range(K)]
                blocks.append(jnp.concatenate(taps, axis=1))
            cols = blocks[0] if bblk == 1 else jnp.concatenate(blocks, axis=0)
            out = jnp.dot(cols, w, preferred_element_type=f32) + b

        if post_relu:
            out = jnp.maximum(out, 0.0)
        return out

    def res_block(h, t, dil):
        # ResConv1DBlock: relu -> conv(3, dil, pad=dil) -> relu -> conv(1) -> +res
        r = conv(h, t, pad=dil, dil=dil, pre_relu=True)
        r = conv(r, t, pre_relu=True)
        return h + r

    def upsample2(h, t_in):
        # nn.Upsample(scale_factor=2, mode='nearest') via a precomputed 0/1
        # selection constant (stacking is transparent: out[i] = in[i // 2]).
        rows_in = bblk * t_in
        sel = upsel_ref[0:2 * rows_in, 0:rows_in]
        return jnp.dot(sel, h, preferred_element_type=f32)

    def vector_quantize(h):
        # Distance up to a per-row constant: ||e||^2 - 2 x.e (||x||^2 dropped;
        # fine for argmin, do NOT reuse d as a true distance).
        cbt = slab(cbt_off, code_dim, n_code)
        cbsq = slab(cbsq_off, 1, n_code)
        cb = slab(cb_off, n_code, code_dim)
        scores = jnp.dot(h, cbt, preferred_element_type=f32)
        d = cbsq - 2.0 * scores                              # (rows, n_code)
        lane = jax.lax.broadcasted_iota(jnp.int32, d.shape, 1)
        min_d = jnp.min(d, axis=1, keepdims=True)
        idx = jnp.min(jnp.where(d == min_d, lane, n_code), axis=1, keepdims=True)
        onehot = (lane == idx).astype(f32)
        q = jnp.dot(onehot, cb, preferred_element_type=f32)
        return q, idx

    T = x_ref.shape[0] // bblk
    x = x_ref[...].astype(f32)                               # (bblk*T, motion_dim)

    # ---------------- encoder ----------------
    t = T
    h = conv(x, t, pad=1, post_relu=True)                    # K=3
    for _ in range(down_t):
        h = conv(h, t, stride=stride_t, pad=stride_t // 2)   # K=2*stride_t down conv
        t //= stride_t
        for d in range(depth):
            h = res_block(h, t, dgr ** d)
    h = conv(h, t, pad=1)                                    # -> (rows, code_dim)

    # ---------------- quantizer (eval: deterministic nearest code) ----------
    q, idx = vector_quantize(h)
    q_ref[...] = q.astype(q_ref.dtype)
    idx_ref[...] = idx.astype(jnp.int32)

    # ---------------- decoder ----------------
    h = conv(q, t, pad=1, post_relu=True)
    for _ in range(down_t):
        for d in reversed(range(depth)):                     # reverse_dilation=True
            h = res_block(h, t, dgr ** d)
        h = upsample2(h, t)                                  # scale_factor=2 (PyTorch)
        t *= 2
        h = conv(h, t, pad=1)
    h = conv(h, t, pad=1, post_relu=True)
    h = conv(h, t, pad=1)                                    # -> (rows, motion_dim)
    dec_ref[...] = h.astype(dec_ref.dtype)

    assert consumed[0] == len(entries)                       # trace-time sanity


# ----------------------------------------------------------------------------
# One-time parameter preparation: pack ALL weights/biases + codebook tensors
# into a single (rows, 128) f32 slab with static, 8-row-aligned offsets.
# ----------------------------------------------------------------------------
def _align8(n):
    return ((n + 7) // 8) * 8


def prepare_params(params, cfg):
    down_t, depth = cfg["down_t"], cfg["depth"]
    placed = []                                              # (row_offset, np blob)
    entries = []
    cursor = [0]

    def put(arr):
        arr = np.asarray(arr, np.float32)
        off = cursor[0]
        placed.append((off, arr))
        cursor[0] += _align8(arr.shape[0])
        return off

    def add_conv(c):
        w = np.asarray(c["w"], np.float32)                   # (Cout, Cin, K)
        cout, cin, k = w.shape
        wf = np.transpose(w, (2, 1, 0)).reshape(k * cin, cout)   # row = tap*Cin + c
        bf = np.asarray(c["b"], np.float32).reshape(1, cout)
        entries.append((put(wf), k, cin, cout, put(bf)))

    enc, dec = params["encoder"], params["decoder"]
    add_conv(enc["in"])
    for i in range(down_t):
        blk = enc["down"][i]
        add_conv(blk["conv"])
        for d in range(depth):
            add_conv(blk["res"][d]["conv1"])
            add_conv(blk["res"][d]["conv2"])
    add_conv(enc["out"])
    add_conv(dec["in"])
    for i in range(down_t):
        blk = dec["up"][i]
        for d in reversed(range(depth)):
            add_conv(blk["res"][d]["conv1"])
            add_conv(blk["res"][d]["conv2"])
        add_conv(blk["conv"])
    add_conv(dec["out1"])
    add_conv(dec["out2"])

    cb = np.asarray(params["codebook"], np.float32)          # (n_code, D)
    n_code, code_dim = cb.shape
    cb_off = put(cb)
    cbt_off = put(cb.T)                                      # (D, n_code)
    cbsq_off = put(np.sum(cb * cb, axis=1, keepdims=True).T)  # (1, n_code)

    max_cols = max(a.shape[1] for _, a in placed)
    lanes = max(128, ((max_cols + 127) // 128) * 128)
    rows = max(8, _align8(cursor[0]))
    packed = np.zeros((rows, lanes), np.float32)
    for off, a in placed:
        packed[off:off + a.shape[0], :a.shape[1]] = a

    return {
        "packed": jnp.asarray(packed),
        "entries": tuple(entries),
        "vq": (cb_off, cbt_off, cbsq_off, n_code, code_dim),
        "nconv": len(entries),
    }


# ----------------------------------------------------------------------------
# Forward wrapper
# ----------------------------------------------------------------------------
def _pick_batch_block(B, T, tenc, max_block=8):
    # Prefer >=2 grid steps (so v7x's two TensorCores each take a block) while
    # keeping block row counts (8,128)-legal; otherwise one full-batch block.
    for d in range(min(B, max_block), 0, -1):
        if B % d == 0 and B // d >= 2 and (d * T) % 8 == 0 and (d * tenc) % 8 == 0:
            return d
    return B


def human_vqvae2_forward(prepared, motion, cfg, mask=None, temperature=0.0,
                         batch_block=None):
    """motion: (N, T, motion_dim).  Eval-mode path (mask=None, temperature=0)."""
    # TODO(synk): mask path (max_pool1d-downsampled mask multiply) not exercised.
    del mask, temperature
    down_t, stride_t = cfg["down_t"], cfg["stride_t"]
    depth, dgr = cfg["depth"], cfg["dgr"]
    # The PyTorch decoder hardcodes nn.Upsample(scale_factor=2); keep that.
    assert stride_t == 2, "decoder upsample is hardcoded to scale_factor=2"
    B, T, cm = motion.shape
    ratio = stride_t ** down_t
    assert T % ratio == 0
    tenc = T // ratio

    if batch_block is None:
        batch_block = _pick_batch_block(B, T, tenc)
    assert B % batch_block == 0
    num_blocks = B // batch_block

    _, _, _, _, code_dim = prepared["vq"]
    packed = prepared["packed"]
    width = prepared["entries"][0][3]                        # encoder width

    # Precomputed nearest x2 upsample selection; all decoder levels slice its
    # top-left block (out[i] = in[i // 2] holds on the batch-stacked rows too).
    rows_out = max(8, batch_block * T)
    rows_in = max(1, rows_out // 2)
    upsel = (np.arange(rows_in)[None, :] ==
             (np.arange(rows_out)[:, None] // 2)).astype(np.float32)

    x2d = motion.astype(jnp.float32).reshape(B * T, cm)

    kernel = functools.partial(
        _vqvae2_fused_kernel,
        entries=prepared["entries"],
        vq_meta=prepared["vq"],
        net=(down_t, stride_t, depth, dgr),
        bblk=batch_block)

    pad_rows = max(8, batch_block * (T + 2 * (stride_t // 2)))

    dec2d, idx2d, q2d = pl.pallas_call(
        kernel,
        grid=(num_blocks,),
        in_specs=[
            pl.BlockSpec((batch_block * T, cm), lambda g: (g, 0)),     # motion
            pl.BlockSpec(packed.shape, lambda g: (0, 0)),              # all params
            pl.BlockSpec(upsel.shape, lambda g: (0, 0)),               # upsample sel
        ],
        out_specs=(
            pl.BlockSpec((batch_block * T, cm), lambda g: (g, 0)),
            pl.BlockSpec((batch_block * tenc, 1), lambda g: (g, 0)),
            pl.BlockSpec((batch_block * tenc, code_dim), lambda g: (g, 0)),
        ),
        out_shape=(
            jax.ShapeDtypeStruct((B * T, cm), jnp.float32),            # decoded
            jax.ShapeDtypeStruct((B * tenc, 1), jnp.int32),            # indices
            jax.ShapeDtypeStruct((B * tenc, code_dim), jnp.float32),   # quantized
        ),
        scratch_shapes=[pltpu.VMEM((pad_rows, width), jnp.float32)],
        compiler_params=pltpu.CompilerParams(
            dimension_semantics=("parallel",)),
    )(x2d, packed, jnp.asarray(upsel))

    # TODO(synk): training-only VQ machinery (EMA/kmeans init, affine reparam,
    # stochastic sampling, commitment loss) has no eval-time effect; loss == 0.
    return {
        "decoded_motion": dec2d.reshape(B, T, cm),           # (N, T, motion_dim)
        "indices": idx2d.reshape(B, tenc),                   # (N, T_enc)
        "commit_loss": jnp.float32(0.0),                     # scalar
        "quantized_motion": q2d.reshape(B, tenc, code_dim),  # (N, T_enc, code_dim)
    }


# ----------------------------------------------------------------------------
# Deterministic parameter init (shapes follow the PyTorch module __init__)
# ----------------------------------------------------------------------------
def _init_conv(key, cout, cin, k):
    kw, kb = jax.random.split(key)
    scale = 1.0 / jnp.sqrt(jnp.float32(cin * k))
    return {
        "w": jax.random.normal(kw, (cout, cin, k), jnp.float32) * scale,
        "b": jax.random.normal(kb, (cout,), jnp.float32) * 0.01,
    }


def init_params(key, *, motion_dim, width, code_dim, nb_code, down_t, stride_t, depth):
    keys = iter(jax.random.split(key, 256))

    def resnet_params():
        return [{"conv1": _init_conv(next(keys), width, width, 3),
                 "conv2": _init_conv(next(keys), width, width, 1)} for _ in range(depth)]

    enc = {
        "in": _init_conv(next(keys), width, motion_dim, 3),
        "down": [{"conv": _init_conv(next(keys), width, width, stride_t * 2),
                  "res": resnet_params()} for _ in range(down_t)],
        "out": _init_conv(next(keys), code_dim, width, 3),
    }
    dec = {
        "in": _init_conv(next(keys), width, code_dim, 3),
        "up": [{"res": resnet_params(),
                "conv": _init_conv(next(keys), width, width, 3)} for _ in range(down_t)],
        "out1": _init_conv(next(keys), width, width, 3),
        "out2": _init_conv(next(keys), motion_dim, width, 3),
    }
    codebook = jax.random.normal(next(keys), (nb_code, code_dim), jnp.float32)
    return {"encoder": enc, "decoder": dec, "codebook": codebook}


# ----------------------------------------------------------------------------
# Demo
# ----------------------------------------------------------------------------
if __name__ == "__main__":
    # HumanVQVAE2 args: motion_dim=8, codebook_size=32, codebook_dim=16,
    # down_sampling_ratio=4 (-> down_t=2, stride_t=2), dim=16, depth=2.
    cfg = {"down_t": 2, "stride_t": 2, "depth": 2, "dgr": 3}
    motion_dim, width, code_dim, nb_code = 8, 16, 16, 32

    key = jax.random.PRNGKey(0)
    kp, kx = jax.random.split(key)
    params = init_params(kp, motion_dim=motion_dim, width=width, code_dim=code_dim,
                         nb_code=nb_code, down_t=cfg["down_t"],
                         stride_t=cfg["stride_t"], depth=cfg["depth"])
    prepared = prepare_params(params, cfg)        # one-time weight packing

    B, T = 4, 16
    motion = jax.random.normal(kx, (B, T, motion_dim), jnp.float32)   # (N, T, C)

    out = human_vqvae2_forward(prepared, motion, cfg)   # batch_block=2, grid=(2,)
    out = jax.block_until_ready(out)

    assert out["decoded_motion"].shape == (B, T, motion_dim)
    assert out["indices"].shape == (B, T // 4)           # T downsampled by 4
    assert out["quantized_motion"].shape == (B, T // 4, code_dim)
    assert out["commit_loss"].shape == ()
    assert bool(jnp.all(jnp.isfinite(out["decoded_motion"])))
    assert bool(jnp.all((out["indices"] >= 0) & (out["indices"] < nb_code)))

    print("KERNEL_OK")
</pallas_src>

<mosaic_0001>
module attributes {stable_mosaic.version = 11 : i64} {
  func.func @_vqvae2_fused_kernel(%arg0: i32, %arg1: memref<32x8xf32, #tpu.memory_space<vmem>>, %arg2: memref<1208x128xf32, #tpu.memory_space<vmem>>, %arg3: memref<32x16xf32, #tpu.memory_space<vmem>>, %arg4: memref<32x8xf32, #tpu.memory_space<vmem>>, %arg5: memref<8x1xi32, #tpu.memory_space<vmem>>, %arg6: memref<8x16xf32, #tpu.memory_space<vmem>>, %arg7: memref<36x16xf32, #tpu.memory_space<vmem>>) attributes {dimension_semantics = [#tpu.dimension_semantics<parallel>], iteration_bounds = array<i64: 2>, scalar_prefetch = 0 : i64, scratch_operands = 1 : i64, tpu.core_type = #tpu.core_type<tc>, window_params = [{transform_indices = @transform_0, window_bounds = array<i64: 32, 8>}, {pipeline_mode = #tpu.pipeline_mode<synchronous>, transform_indices = @transform_1, window_bounds = array<i64: 1208, 128>}, {pipeline_mode = #tpu.pipeline_mode<synchronous>, transform_indices = @transform_2, window_bounds = array<i64: 32, 16>}, {transform_indices = @transform_3, window_bounds = array<i64: 32, 8>}, {transform_indices = @transform_4, window_bounds = array<i64: 8, 1>}, {transform_indices = @transform_5, window_bounds = array<i64: 8, 16>}]} {
    %c0 = arith.constant 0 : index
    %c0_0 = arith.constant 0 : index
    %0 = vector.load %arg1[%c0, %c0_0] : memref<32x8xf32, #tpu.memory_space<vmem>>, vector<32x8xf32>
    %c0_1 = arith.constant 0 : index
    %c0_2 = arith.constant 0 : index
    %1 = vector.load %arg2[%c0_1, %c0_2] : memref<1208x128xf32, #tpu.memory_space<vmem>>, vector<24x16xf32>
    %c24 = arith.constant 24 : index
    %c0_3 = arith.constant 0 : index
    %2 = vector.load %arg2[%c24, %c0_3] : memref<1208x128xf32, #tpu.memory_space<vmem>>, vector<1x16xf32>
    %3 = vector.extract_strided_slice %0 {offsets = [0, 0], sizes = [16, 8], strides = [1, 1]} : vector<32x8xf32> to vector<16x8xf32>
    %cst = arith.constant 0.000000e+00 : f32
    %4 = vector.broadcast %cst : f32 to vector<1x8xf32>
    %5 = vector.extract_strided_slice %3 {offsets = [0, 0], sizes = [15, 8], strides = [1, 1]} : vector<16x8xf32> to vector<15x8xf32>
    %6 = tpu.concatenate %4, %5 in 0 : vector<1x8xf32>, vector<15x8xf32> -> vector<16x8xf32>
    %7 = vector.extract_strided_slice %3 {offsets = [1, 0], sizes = [15, 8], strides = [1, 1]} : vector<16x8xf32> to vector<15x8xf32>
    %cst_4 = arith.constant 0.000000e+00 : f32
    %8 = vector.broadcast %cst_4 : f32 to vector<1x8xf32>
    %9 = tpu.concatenate %7, %8 in 0 : vector<15x8xf32>, vector<1x8xf32> -> vector<16x8xf32>
    %10 = tpu.concatenate %6, %3, %9 in 1 : vector<16x8xf32>, vector<16x8xf32>, vector<16x8xf32> -> vector<16x24xf32>
    %11 = vector.extract_strided_slice %0 {offsets = [16, 0], sizes = [16, 8], strides = [1, 1]} : vector<32x8xf32> to vector<16x8xf32>
    %cst_5 = arith.constant 0.000000e+00 : f32
    %12 = vector.broadcast %cst_5 : f32 to vector<1x8xf32>
    %13 = vector.extract_strided_slice %11 {offsets = [0, 0], sizes = [15, 8], strides = [1, 1]} : vector<16x8xf32> to vector<15x8xf32>
    %14 = tpu.concatenate %12, %13 in 0 : vector<1x8xf32>, vector<15x8xf32> -> vector<16x8xf32>
    %15 = vector.extract_strided_slice %11 {offsets = [1, 0], sizes = [15, 8], strides = [1, 1]} : vector<16x8xf32> to vector<15x8xf32>
    %cst_6 = arith.constant 0.000000e+00 : f32
    %16 = vector.broadcast %cst_6 : f32 to vector<1x8xf32>
    %17 = tpu.concatenate %15, %16 in 0 : vector<15x8xf32>, vector<1x8xf32> -> vector<16x8xf32>
    %18 = tpu.concatenate %14, %11, %17 in 1 : vector<16x8xf32>, vector<16x8xf32>, vector<16x8xf32> -> vector<16x24xf32>
    %19 = tpu.concatenate %10, %18 in 0 : vector<16x24xf32>, vector<16x24xf32> -> vector<32x24xf32>
    %cst_7 = arith.constant dense<0.000000e+00> : vector<32x16xf32>
    %20 = tpu.matmul %19, %1, %cst_7 {dimension_numbers = #tpu.dot_dimension_numbers<[1], [0], [0], [1], [0, 0, 1, 1], [], []>} : vector<32x24xf32>, vector<24x16xf32>, vector<32x16xf32> -> vector<32x16xf32>
    %21 = vector.broadcast %2 : vector<1x16xf32> to vector<32x16xf32>
    %22 = arith.addf %20, %21 : vector<32x16xf32>
    %cst_8 = arith.constant 0.000000e+00 : f32
    %23 = vector.broadcast %cst_8 : f32 to vector<32x16xf32>
    %24 = arith.maximumf %22, %23 : vector<32x16xf32>
    %c32 = arith.constant 32 : index
    %c0_9 = arith.constant 0 : index
    %25 = vector.load %arg2[%c32, %c0_9] : memref<1208x128xf32, #tpu.memory_space<vmem>>, vector<64x16xf32>
    %c96 = arith.constant 96 : index
    %c0_10 = arith.constant 0 : index
    %26 = vector.load %arg2[%c96, %c0_10] : memref<1208x128xf32, #tpu.memory_space<vmem>>, vector<1x16xf32>
    %cst_11 = arith.constant 0.000000e+00 : f32
    %27 = vector.broadcast %cst_11 : f32 to vector<1x16xf32>
    %c0_12 = arith.constant 0 : index
    %c0_13 = arith.constant 0 : index
    %28 = vector.load %arg7[%c0_12, %c0_13] : memref<36x16xf32, #tpu.memory_space<vmem>>, vector<1x16xf32>
    tpu.vector_store %arg7[%c0_12, %c0_13], %27 {strides = array<i32>} : memref<36x16xf32, #tpu.memory_space<vmem>>, vector<1x16xf32>,
    %c17 = arith.constant 17 : index
    %c0_14 = arith.constant 0 : index
    %29 = vector.load %arg7[%c17, %c0_14] : memref<36x16xf32, #tpu.memory_space<vmem>>, vector<1x16xf32>
    tpu.vector_store %arg7[%c17, %c0_14], %27 {strides = array<i32>} : memref<36x16xf32, #tpu.memory_space<vmem>>, vector<1x16xf32>,
    %30 = vector.extract_strided_slice %24 {offsets = [0, 0], sizes = [16, 16], strides = [1, 1]} : vector<32x16xf32> to vector<16x16xf32>
    %c1 = arith.constant 1 : index
    %c0_15 = arith.constant 0 : index
    %31 = vector.load %arg7[%c1, %c0_15] : memref<36x16xf32, #tpu.memory_space<vmem>>, vector<16x16xf32>
    tpu.vector_store %arg7[%c1, %c0_15], %30 {strides = array<i32>} : memref<36x16xf32, #tpu.memory_space<vmem>>, vector<16x16xf32>,
    %cst_16 = arith.constant 0.000000e+00 : f32
    %32 = vector.broadcast %cst_16 : f32 to vector<1x16xf32>
    %c18 = arith.constant 18 : index
    %c0_17 = arith.constant 0 : index
    %33 = vector.load %arg7[%c18, %c0_17] : memref<36x16xf32, #tpu.memory_space<vmem>>, vector<1x16xf32>
    tpu.vector_store %arg7[%c18, %c0_17], %32 {strides = array<i32>} : memref<36x16xf32, #tpu.memory_space<vmem>>, vector<1x16xf32>,
    %c35 = arith.constant 35 : index
    %c0_18 = arith.constant 0 : index
    %34 = vector.load %arg7[%c35, %c0_18] : memref<36x16xf32, #tpu.memory_space<vmem>>, vector<1x16xf32>
    tpu.vector_store %arg7[%c35, %c0_18], %32 {strides = array<i32>} : memref<36x16xf32, #tpu.memory_space<vmem>>, vector<1x16xf32>,
    %35 = vector.extract_strided_slice %24 {offsets = [16, 0], sizes = [16, 16], strides = [1, 1]} : vector<32x16xf32> to vector<16x16xf32>
    %c19 = arith.constant 19 : index
    %c0_19 = arith.constant 0 : index
    %36 = vector.load %arg7[%c19, %c0_19] : memref<36x16xf32, #tpu.memory_space<vmem>>, vector<16x16xf32>
    tpu.vector_store %arg7[%c19, %c0_19], %35 {strides = array<i32>} : memref<36x16xf32, #tpu.memory_space<vmem>>, vector<16x16xf32>,
    %c0_20 = arith.constant 0 : index
    %c0_21 = arith.constant 0 : index
    %37 = tpu.strided_load %arg7[%c0_20, %c0_21] {strides = array<i32: 2, 1>} : memref<36x16xf32, #tpu.memory_space<vmem>>, vector<8x16xf32>
    %c1_22 = arith.constant 1 : index
    %c0_23 = arith.constant 0 : index
    %38 = tpu.strided_load %arg7[%c1_22, %c0_23] {strides = array<i32: 2, 1>} : memref<36x16xf32, #tpu.memory_space<vmem>>, vector<8x16xf32>
    %c2 = arith.constant 2 : index
    %c0_24 = arith.constant 0 : index
    %39 = tpu.strided_load %arg7[%c2, %c0_24] {strides = array<i32: 2, 1>} : memref<36x16xf32, #tpu.memory_space<vmem>>, vector<8x16xf32>
    %c3 = arith.constant 3 : index
    %c0_25 = arith.constant 0 : index
    %40 = tpu.strided_load %arg7[%c3, %c0_25] {strides = array<i32: 2, 1>} : memref<36x16xf32, #tpu.memory_space<vmem>>, vector<8x16xf32>
    %41 = tpu.concatenate %37, %38, %39, %40 in 1 : vector<8x16xf32>, vector<8x16xf32>, vector<8x16xf32>, vector<8x16xf32> -> vector<8x64xf32>
    %c18_26 = arith.constant 18 : index
    %c0_27 = arith.constant 0 : index
    %42 = tpu.strided_load %arg7[%c18_26, %c0_27] {strides = array<i32: 2, 1>} : memref<36x16xf32, #tpu.memory_space<vmem>>, vector<8x16xf32>
    %c19_28 = arith.constant 19 : index
    %c0_29 = arith.constant 0 : index
    %43 = tpu.strided_load %arg7[%c19_28, %c0_29] {strides = array<i32: 2, 1>} : memref<36x16xf32, #tpu.memory_space<vmem>>, vector<8x16xf32>
    %c20 = arith.constant 20 : index
    %c0_30 = arith.constant 0 : index
    %44 = tpu.strided_load %arg7[%c20, %c0_30] {strides = array<i32: 2, 1>} : memref<36x16xf32, #tpu.memory_space<vmem>>, vector<8x16xf32>
    %c21 = arith.constant 21 : index
    %c0_31 = arith.constant 0 : index
    %45 = tpu.strided_load %arg7[%c21, %c0_31] {strides = array<i32: 2, 1>} : memref<36x16xf32, #tpu.memory_space<vmem>>, vector<8x16xf32>
    %46 = tpu.concatenate %42, %43, %44, %45 in 1 : vector<8x16xf32>, vector<8x16xf32>, vector<8x16xf32>, vector<8x16xf32> -> vector<8x64xf32>
    %47 = tpu.concatenate %41, %46 in 0 : vector<8x64xf32>, vector<8x64xf32> -> vector<16x64xf32>
    %cst_32 = arith.constant dense<0.000000e+00> : vector<16x16xf32>
    %48 = tpu.matmul %47, %25, %cst_32 {dimension_numbers = #tpu.dot_dimension_numbers<[1], [0], [0], [1], [0, 0, 1, 1], [], []>} : vector<16x64xf32>, vector<64x16xf32>, vector<16x16xf32> -> vector<16x16xf32>
    %49 = vector.broadcast %26 : vector<1x16xf32> to vector<16x16xf32>
    %50 = arith.addf %48, %49 : vector<16x16xf32>
    %cst_33 = arith.constant 0.000000e+00 : f32
    %51 = vector.broadcast %cst_33 : f32 to vector<16x16xf32>
    %52 = arith.maximumf %50, %51 : vector<16x16xf32>
    %c104 = arith.constant 104 : index
    %c0_34 = arith.constant 0 : index
    %53 = vector.load %arg2[%c104, %c0_34] : memref<1208x128xf32, #tpu.memory_space<vmem>>, vector<48x16xf32>
    %c152 = arith.constant 152 : index
    %c0_35 = arith.constant 0 : index
    %54 = vector.load %arg2[%c152, %c0_35] : memref<1208x128xf32, #tpu.memory_space<vmem>>, vector<1x16xf32>
    %55 = vector.extract_strided_slice %52 {offsets = [0, 0], sizes = [8, 16], strides = [1, 1]} : vector<16x16xf32> to vector<8x16xf32>
    %cst_36 = arith.constant 0.000000e+00 : f32
    %56 = vector.broadcast %cst_36 : f32 to vector<1x16xf32>
    %57 = vector.extract_strided_slice %55 {offsets = [0, 0], sizes = [7, 16], strides = [1, 1]} : vector<8x16xf32> to vector<7x16xf32>
    %58 = tpu.concatenate %56, %57 in 0 : vector<1x16xf32>, vector<7x16xf32> -> vector<8x16xf32>
    %59 = vector.extract_strided_slice %55 {offsets = [1, 0], sizes = [7, 16], strides = [1, 1]} : vector<8x16xf32> to vector<7x16xf32>
    %cst_37 = arith.constant 0.000000e+00 : f32
    %60 = vector.broadcast %cst_37 : f32 to vector<1x16xf32>
    %61 = tpu.concatenate %59, %60 in 0 : vector<7x16xf32>, vector<1x16xf32> -> vector<8x16xf32>
    %62 = tpu.concatenate %58, %55, %61 in 1 : vector<8x16xf32>, vector<8x16xf32>, vector<8x16xf32> -> vector<8x48xf32>
    %63 = vector.extract_strided_slice %52 {offsets = [8, 0], sizes = [8, 16], strides = [1, 1]} : vector<16x16xf32> to vector<8x16xf32>
    %cst_38 = arith.constant 0.000000e+00 : f32
    %64 = vector.broadcast %cst_38 : f32 to vector<1x16xf32>
    %65 = vector.extract_strided_slice %63 {offsets = [0, 0], sizes = [7, 16], strides = [1, 1]} : vector<8x16xf32> to vector<7x16xf32>
    %66 = tpu.concatenate %64, %65 in 0 : vector<1x16xf32>, vector<7x16xf32> -> vector<8x16xf32>
    %67 = vector.extract_strided_slice %63 {offsets = [1, 0], sizes = [7, 16], strides = [1, 1]} : vector<8x16xf32> to vector<7x16xf32>
    %cst_39 = arith.constant 0.000000e+00 : f32
    %68 = vector.broadcast %cst_39 : f32 to vector<1x16xf32>
    %69 = tpu.concatenate %67, %68 in 0 : vector<7x16xf32>, vector<1x16xf32> -> vector<8x16xf32>
    %70 = tpu.concatenate %66, %63, %69 in 1 : vector<8x16xf32>, vector<8x16xf32>, vector<8x16xf32> -> vector<8x48xf32>
    %71 = tpu.concatenate %62, %70 in 0 : vector<8x48xf32>, vector<8x48xf32> -> vector<16x48xf32>
    %cst_40 = arith.constant dense<0.000000e+00> : vector<16x16xf32>
    %72 = tpu.matmul %71, %53, %cst_40 {dimension_numbers = #tpu.dot_dimension_numbers<[1], [0], [0], [1], [0, 0, 1, 1], [], []>} : vector<16x48xf32>, vector<48x16xf32>, vector<16x16xf32> -> vector<16x16xf32>
    %73 = vector.broadcast %54 : vector<1x16xf32> to vector<16x16xf32>
    %74 = arith.addf %72, %73 : vector<16x16xf32>
    %cst_41 = arith.constant 0.000000e+00 : f32
    %75 = vector.broadcast %cst_41 : f32 to vector<16x16xf32>
    %76 = arith.maximumf %74, %75 : vector<16x16xf32>
    %c160 = arith.constant 160 : index
    %c0_42 = arith.constant 0 : index
    %77 = vector.load %arg2[%c160, %c0_42] : memref<1208x128xf32, #tpu.memory_space<vmem>>, vector<16x16xf32>
    %c176 = arith.constant 176 : index
    %c0_43 = arith.constant 0 : index
    %78 = vector.load %arg2[%c176, %c0_43] : memref<1208x128xf32, #tpu.memory_space<vmem>>, vector<1x16xf32>
    %cst_44 = arith.constant dense<0.000000e+00> : vector<16x16xf32>
    %79 = tpu.matmul %76, %77, %cst_44 {dimension_numbers = #tpu.dot_dimension_numbers<[1], [0], [0], [1], [0, 0, 1, 1], [], []>} : vector<16x16xf32>, vector<16x16xf32>, vector<16x16xf32> -> vector<16x16xf32>
    %80 = vector.broadcast %78 : vector<1x16xf32> to vector<16x16xf32>
    %81 = arith.addf %79, %80 : vector<16x16xf32>
    %82 = arith.addf %50, %81 : vector<16x16xf32>
    %cst_45 = arith.constant 0.000000e+00 : f32
    %83 = vector.broadcast %cst_45 : f32 to vector<16x16xf32>
    %84 = arith.maximumf %82, %83 : vector<16x16xf32>
    %c184 = arith.constant 184 : index
    %c0_46 = arith.constant 0 : index
    %85 = vector.load %arg2[%c184, %c0_46] : memref<1208x128xf32, #tpu.memory_space<vmem>>, vector<48x16xf32>
    %c232 = arith.constant 232 : index
    %c0_47 = arith.constant 0 : index
    %86 = vector.load %arg2[%c232, %c0_47] : memref<1208x128xf32, #tpu.memory_space<vmem>>, vector<1x16xf32>
    %87 = vector.extract_strided_slice %84 {offsets = [0, 0], sizes = [8, 16], strides = [1, 1]} : vector<16x16xf32> to vector<8x16xf32>
    %cst_48 = arith.constant 0.000000e+00 : f32
    %88 = vector.broadcast %cst_48 : f32 to vector<3x16xf32>
    %89 = vector.extract_strided_slice %87 {offsets = [0, 0], sizes = [5, 16], strides = [1, 1]} : vector<8x16xf32> to vector<5x16xf32>
    %90 = tpu.concatenate %88, %89 in 0 : vector<3x16xf32>, vector<5x16xf32> -> vector<8x16xf32>
    %91 = vector.extract_strided_slice %87 {offsets = [3, 0], sizes = [5, 16], strides = [1, 1]} : vector<8x16xf32> to vector<5x16xf32>
    %cst_49 = arith.constant 0.000000e+00 : f32
    %92 = vector.broadcast %cst_49 : f32 to vector<3x16xf32>
    %93 = tpu.concatenate %91, %92 in 0 : vector<5x16xf32>, vector<3x16xf32> -> vector<8x16xf32>
    %94 = tpu.concatenate %90, %87, %93 in 1 : vector<8x16xf32>, vector<8x16xf32>, vector<8x16xf32> -> vector<8x48xf32>
    %95 = vector.extract_strided_slice %84 {offsets = [8, 0], sizes = [8, 16], strides = [1, 1]} : vector<16x16xf32> to vector<8x16xf32>
    %cst_50 = arith.constant 0.000000e+00 : f32
    %96 = vector.broadcast %cst_50 : f32 to vector<3x16xf32>
    %97 = vector.extract_strided_slice %95 {offsets = [0, 0], sizes = [5, 16], strides = [1, 1]} : vector<8x16xf32> to vector<5x16xf32>
    %98 = tpu.concatenate %96, %97 in 0 : vector<3x16xf32>, vector<5x16xf32> -> vector<8x16xf32>
    %99 = vector.extract_strided_slice %95 {offsets = [3, 0], sizes = [5, 16], strides = [1, 1]} : vector<8x16xf32> to vector<5x16xf32>
    %cst_51 = arith.constant 0.000000e+00 : f32
    %100 = vector.broadcast %cst_51 : f32 to vector<3x16xf32>
    %101 = tpu.concatenate %99, %100 in 0 : vector<5x16xf32>, vector<3x16xf32> -> vector<8x16xf32>
    %102 = tpu.concatenate %98, %95, %101 in 1 : vector<8x16xf32>, vector<8x16xf32>, vector<8x16xf32> -> vector<8x48xf32>
    %103 = tpu.concatenate %94, %102 in 0 : vector<8x48xf32>, vector<8x48xf32> -> vector<16x48xf32>
    %cst_52 = arith.constant dense<0.000000e+00> : vector<16x16xf32>
    %104 = tpu.matmul %103, %85, %cst_52 {dimension_numbers = #tpu.dot_dimension_numbers<[1], [0], [0], [1], [0, 0, 1, 1], [], []>} : vector<16x48xf32>, vector<48x16xf32>, vector<16x16xf32> -> vector<16x16xf32>
    %105 = vector.broadcast %86 : vector<1x16xf32> to vector<16x16xf32>
    %106 = arith.addf %104, %105 : vector<16x16xf32>
    %cst_53 = arith.constant 0.000000e+00 : f32
    %107 = vector.broadcast %cst_53 : f32 to vector<16x16xf32>
    %108 = arith.maximumf %106, %107 : vector<16x16xf32>
    %c240 = arith.constant 240 : index
    %c0_54 = arith.constant 0 : index
    %109 = vector.load %arg2[%c240, %c0_54] : memref<1208x128xf32, #tpu.memory_space<vmem>>, vector<16x16xf32>
    %c256 = arith.constant 256 : index
    %c0_55 = arith.constant 0 : index
    %110 = vector.load %arg2[%c256, %c0_55] : memref<1208x128xf32, #tpu.memory_space<vmem>>, vector<1x16xf32>
    %cst_56 = arith.constant dense<0.000000e+00> : vector<16x16xf32>
    %111 = tpu.matmul %108, %109, %cst_56 {dimension_numbers = #tpu.dot_dimension_numbers<[1], [0], [0], [1], [0, 0, 1, 1], [], []>} : vector<16x16xf32>, vector<16x16xf32>, vector<16x16xf32> -> vector<16x16xf32>
    %112 = vector.broadcast %110 : vector<1x16xf32> to vector<16x16xf32>
    %113 = arith.addf %111, %112 : vector<16x16xf32>
    %114 = arith.addf %82, %113 : vector<16x16xf32>
    %c264 = arith.constant 264 : index
    %c0_57 = arith.constant 0 : index
    %115 = vector.load %arg2[%c264, %c0_57] : memref<1208x128xf32, #tpu.memory_space<vmem>>, vector<64x16xf32>
    %c328 = arith.constant 328 : index
    %c0_58 = arith.constant 0 : index
    %116 = vector.load %arg2[%c328, %c0_58] : memref<1208x128xf32, #tpu.memory_space<vmem>>, vector<1x16xf32>
    %cst_59 = arith.constant 0.000000e+00 : f32
    %117 = vector.broadcast %cst_59 : f32 to vector<1x16xf32>
    %c0_60 = arith.constant 0 : index
    %c0_61 = arith.constant 0 : index
    %118 = vector.load %arg7[%c0_60, %c0_61] : memref<36x16xf32, #tpu.memory_space<vmem>>, vector<1x16xf32>
    tpu.vector_store %arg7[%c0_60, %c0_61], %117 {strides = array<i32>} : memref<36x16xf32, #tpu.memory_space<vmem>>, vector<1x16xf32>,
    %c9 = arith.constant 9 : index
    %c0_62 = arith.constant 0 : index
    %119 = vector.load %arg7[%c9, %c0_62] : memref<36x16xf32, #tpu.memory_space<vmem>>, vector<1x16xf32>
    tpu.vector_store %arg7[%c9, %c0_62], %117 {strides = array<i32>} : memref<36x16xf32, #tpu.memory_space<vmem>>, vector<1x16xf32>,
    %120 = vector.extract_strided_slice %114 {offsets = [0, 0], sizes = [8, 16], strides = [1, 1]} : vector<16x16xf32> to vector<8x16xf32>
    %c1_63 = arith.constant 1 : index
    %c0_64 = arith.constant 0 : index
    %121 = vector.load %arg7[%c1_63, %c0_64] : memref<36x16xf32, #tpu.memory_space<vmem>>, vector<8x16xf32>
    tpu.vector_store %arg7[%c1_63, %c0_64], %120 {strides = array<i32>} : memref<36x16xf32, #tpu.memory_space<vmem>>, vector<8x16xf32>,
    %cst_65 = arith.constant 0.000000e+00 : f32
    %122 = vector.broadcast %cst_65 : f32 to vector<1x16xf32>
    %c10 = arith.constant 10 : index
    %c0_66 = arith.constant 0 : index
    %123 = vector.load %arg7[%c10, %c0_66] : memref<36x16xf32, #tpu.memory_space<vmem>>, vector<1x16xf32>
    tpu.vector_store %arg7[%c10, %c0_66], %122 {strides = array<i32>} : memref<36x16xf32, #tpu.memory_space<vmem>>, vector<1x16xf32>,
    %c19_67 = arith.constant 19 : index
    %c0_68 = arith.constant 0 : index
    %124 = vector.load %arg7[%c19_67, %c0_68] : memref<36x16xf32, #tpu.memory_space<vmem>>, vector<1x16xf32>
    tpu.vector_store %arg7[%c19_67, %c0_68], %122 {strides = array<i32>} : memref<36x16xf32, #tpu.memory_space<vmem>>, vector<1x16xf32>,
    %125 = vector.extract_strided_slice %114 {offsets = [8, 0], sizes = [8, 16], strides = [1, 1]} : vector<16x16xf32> to vector<8x16xf32>
    %c11 = arith.constant 11 : index
    %c0_69 = arith.constant 0 : index
    %126 = vector.load %arg7[%c11, %c0_69] : memref<36x16xf32, #tpu.memory_space<vmem>>, vector<8x16xf32>
    tpu.vector_store %arg7[%c11, %c0_69], %125 {strides = array<i32>} : memref<36x16xf32, #tpu.memory_space<vmem>>, vector<8x16xf32>,
    %c0_70 = arith.constant 0 : index
    %c0_71 = arith.constant 0 : index
    %127 = tpu.strided_load %arg7[%c0_70, %c0_71] {strides = array<i32: 2, 1>} : memref<36x16xf32, #tpu.memory_space<vmem>>, vector<4x16xf32>
    %c1_72 = arith.constant 1 : index
    %c0_73 = arith.constant 0 : index
    %128 = tpu.strided_load %arg7[%c1_72, %c0_73] {strides = array<i32: 2, 1>} : memref<36x16xf32, #tpu.memory_space<vmem>>, vector<4x16xf32>
    %c2_74 = arith.constant 2 : index
    %c0_75 = arith.constant 0 : index
    %129 = tpu.strided_load %arg7[%c2_74, %c0_75] {strides = array<i32: 2, 1>} : memref<36x16xf32, #tpu.memory_space<vmem>>, vector<4x16xf32>
    %c3_76 = arith.constant 3 : index
    %c0_77 = arith.constant 0 : index
    %130 = tpu.strided_load %arg7[%c3_76, %c0_77] {strides = array<i32: 2, 1>} : memref<36x16xf32, #tpu.memory_space<vmem>>, vector<4x16xf32>
    %131 = tpu.concatenate %127, %128, %129, %130 in 1 : vector<4x16xf32>, vector<4x16xf32>, vector<4x16xf32>, vector<4x16xf32> -> vector<4x64xf32>
    %c10_78 = arith.constant 10 : index
    %c0_79 = arith.constant 0 : index
    %132 = tpu.strided_load %arg7[%c10_78, %c0_79] {strides = array<i32: 2, 1>} : memref<36x16xf32, #tpu.memory_space<vmem>>, vector<4x16xf32>
    %c11_80 = arith.constant 11 : index
    %c0_81 = arith.constant 0 : index
    %133 = tpu.strided_load %arg7[%c11_80, %c0_81] {strides = array<i32: 2, 1>} : memref<36x16xf32, #tpu.memory_space<vmem>>, vector<4x16xf32>
    %c12 = arith.constant 12 : index
    %c0_82 = arith.constant 0 : index
    %134 = tpu.strided_load %arg7[%c12, %c0_82] {strides = array<i32: 2, 1>} : memref<36x16xf32, #tpu.memory_space<vmem>>, vector<4x16xf32>
    %c13 = arith.constant 13 : index
    %c0_83 = arith.constant 0 : index
    %135 = tpu.strided_load %arg7[%c13, %c0_83] {strides = array<i32: 2, 1>} : memref<36x16xf32, #tpu.memory_space<vmem>>, vector<4x16xf32>
    %136 = tpu.concatenate %132, %133, %134, %135 in 1 : vector<4x16xf32>, vector<4x16xf32>, vector<4x16xf32>, vector<4x16xf32> -> vector<4x64xf32>
    %137 = tpu.concatenate %131, %136 in 0 : vector<4x64xf32>, vector<4x64xf32> -> vector<8x64xf32>
    %cst_84 = arith.constant dense<0.000000e+00> : vector<8x16xf32>
    %138 = tpu.matmul %137, %115, %cst_84 {dimension_numbers = #tpu.dot_dimension_numbers<[1], [0], [0], [1], [0, 0, 1, 1], [], []>} : vector<8x64xf32>, vector<64x16xf32>, vector<8x16xf32> -> vector<8x16xf32>
    %139 = vector.broadcast %116 : vector<1x16xf32> to vector<8x16xf32>
    %140 = arith.addf %138, %139 : vector<8x16xf32>
    %cst_85 = arith.constant 0.000000e+00 : f32
    %141 = vector.broadcast %cst_85 : f32 to vector<8x16xf32>
    %142 = arith.maximumf %140, %141 : vector<8x16xf32>
    %c336 = arith.constant 336 : index
    %c0_86 = arith.constant 0 : index
    %143 = vector.load %arg2[%c336, %c0_86] : memref<1208x128xf32, #tpu.memory_space<vmem>>, vector<48x16xf32>
    %c384 = arith.constant 384 : index
    %c0_87 = arith.constant 0 : index
    %144 = vector.load %arg2[%c384, %c0_87] : memref<1208x128xf32, #tpu.memory_space<vmem>>, vector<1x16xf32>
    %145 = vector.extract_strided_slice %142 {offsets = [0, 0], sizes = [4, 16], strides = [1, 1]} : vector<8x16xf32> to vector<4x16xf32>
    %cst_88 = arith.constant 0.000000e+00 : f32
    %146 = vector.broadcast %cst_88 : f32 to vector<1x16xf32>
    %147 = vector.extract_strided_slice %145 {offsets = [0, 0], sizes = [3, 16], strides = [1, 1]} : vector<4x16xf32> to vector<3x16xf32>
    %148 = tpu.concatenate %146, %147 in 0 : vector<1x16xf32>, vector<3x16xf32> -> vector<4x16xf32>
    %149 = vector.extract_strided_slice %145 {offsets = [1, 0], sizes = [3, 16], strides = [1, 1]} : vector<4x16xf32> to vector<3x16xf32>
    %cst_89 = arith.constant 0.000000e+00 : f32
    %150 = vector.broadcast %cst_89 : f32 to vector<1x16xf32>
    %151 = tpu.concatenate %149, %150 in 0 : vector<3x16xf32>, vector<1x16xf32> -> vector<4x16xf32>
    %152 = tpu.concatenate %148, %145, %151 in 1 : vector<4x16xf32>, vector<4x16xf32>, vector<4x16xf32> -> vector<4x48xf32>
    %153 = vector.extract_strided_slice %142 {offsets = [4, 0], sizes = [4, 16], strides = [1, 1]} : vector<8x16xf32> to vector<4x16xf32>
    %cst_90 = arith.constant 0.000000e+00 : f32
    %154 = vector.broadcast %cst_90 : f32 to vector<1x16xf32>
    %155 = vector.extract_strided_slice %153 {offsets = [0, 0], sizes = [3, 16], strides = [1, 1]} : vector<4x16xf32> to vector<3x16xf32>
    %156 = tpu.concatenate %154, %155 in 0 : vector<1x16xf32>, vector<3x16xf32> -> vector<4x16xf32>
    %157 = vector.extract_strided_slice %153 {offsets = [1, 0], sizes = [3, 16], strides = [1, 1]} : vector<4x16xf32> to vector<3x16xf32>
    %cst_91 = arith.constant 0.000000e+00 : f32
    %158 = vector.broadcast %cst_91 : f32 to vector<1x16xf32>
    %159 = tpu.concatenate %157, %158 in 0 : vector<3x16xf32>, vector<1x16xf32> -> vector<4x16xf32>
    %160 = tpu.concatenate %156, %153, %159 in 1 : vector<4x16xf32>, vector<4x16xf32>, vector<4x16xf32> -> vector<4x48xf32>
    %161 = tpu.concatenate %152, %160 in 0 : vector<4x48xf32>, vector<4x48xf32> -> vector<8x48xf32>
    %cst_92 = arith.constant dense<0.000000e+00> : vector<8x16xf32>
    %162 = tpu.matmul %161, %143, %cst_92 {dimension_numbers = #tpu.dot_dimension_numbers<[1], [0], [0], [1], [0, 0, 1, 1], [], []>} : vector<8x48xf32>, vector<48x16xf32>, vector<8x16xf32> -> vector<8x16xf32>
    %163 = vector.broadcast %144 : vector<1x16xf32> to vector<8x16xf32>
    %164 = arith.addf %162, %163 : vector<8x16xf32>
    %cst_93 = arith.constant 0.000000e+00 : f32
    %165 = vector.broadcast %cst_93 : f32 to vector<8x16xf32>
    %166 = arith.maximumf %164, %165 : vector<8x16xf32>
    %c392 = arith.constant 392 : index
    %c0_94 = arith.constant 0 : index
    %167 = vector.load %arg2[%c392, %c0_94] : memref<1208x128xf32, #tpu.memory_space<vmem>>, vector<16x16xf32>
    %c408 = arith.constant 408 : index
    %c0_95 = arith.constant 0 : index
    %168 = vector.load %arg2[%c408, %c0_95] : memref<1208x128xf32, #tpu.memory_space<vmem>>, vector<1x16xf32>
    %cst_96 = arith.constant dense<0.000000e+00> : vector<8x16xf32>
    %169 = tpu.matmul %166, %167, %cst_96 {dimension_numbers = #tpu.dot_dimension_numbers<[1], [0], [0], [1], [0, 0, 1, 1], [], []>} : vector<8x16xf32>, vector<16x16xf32>, vector<8x16xf32> -> vector<8x16xf32>
    %170 = vector.broadcast %168 : vector<1x16xf32> to vector<8x16xf32>
    %171 = arith.addf %169, %170 : vector<8x16xf32>
    %172 = arith.addf %140, %171 : vector<8x16xf32>
    %cst_97 = arith.constant 0.000000e+00 : f32
    %173 = vector.broadcast %cst_97 : f32 to vector<8x16xf32>
    %174 = arith.maximumf %172, %173 : vector<8x16xf32>
    %c416 = arith.constant 416 : index
    %c0_98 = arith.constant 0 : index
    %175 = vector.load %arg2[%c416, %c0_98] : memref<1208x128xf32, #tpu.memory_space<vmem>>, vector<48x16xf32>
    %c464 = arith.constant 464 : index
    %c0_99 = arith.constant 0 : index
    %176 = vector.load %arg2[%c464, %c0_99] : memref<1208x128xf32, #tpu.memory_space<vmem>>, vector<1x16xf32>
    %177 = vector.extract_strided_slice %174 {offsets = [0, 0], sizes = [4, 16], strides = [1, 1]} : vector<8x16xf32> to vector<4x16xf32>
    %cst_100 = arith.constant 0.000000e+00 : f32
    %178 = vector.broadcast %cst_100 : f32 to vector<3x16xf32>
    %179 = vector.extract_strided_slice %177 {offsets = [0, 0], sizes = [1, 16], strides = [1, 1]} : vector<4x16xf32> to vector<1x16xf32>
    %180 = tpu.concatenate %178, %179 in 0 : vector<3x16xf32>, vector<1x16xf32> -> vector<4x16xf32>
    %181 = vector.extract_strided_slice %177 {offsets = [3, 0], sizes = [1, 16], strides = [1, 1]} : vector<4x16xf32> to vector<1x16xf32>
    %cst_101 = arith.constant 0.000000e+00 : f32
    %182 = vector.broadcast %cst_101 : f32 to vector<3x16xf32>
    %183 = tpu.concatenate %181, %182 in 0 : vector<1x16xf32>, vector<3x16xf32> -> vector<4x16xf32>
    %184 = tpu.concatenate %180, %177, %183 in 1 : vector<4x16xf32>, vector<4x16xf32>, vector<4x16xf32> -> vector<4x48xf32>
    %185 = vector.extract_strided_slice %174 {offsets = [4, 0], sizes = [4, 16], strides = [1, 1]} : vector<8x16xf32> to vector<4x16xf32>
    %cst_102 = arith.constant 0.000000e+00 : f32
    %186 = vector.broadcast %cst_102 : f32 to vector<3x16xf32>
    %187 = vector.extract_strided_slice %185 {offsets = [0, 0], sizes = [1, 16], strides = [1, 1]} : vector<4x16xf32> to vector<1x16xf32>
    %188 = tpu.concatenate %186, %187 in 0 : vector<3x16xf32>, vector<1x16xf32> -> vector<4x16xf32>
    %189 = vector.extract_strided_slice %185 {offsets = [3, 0], sizes = [1, 16], strides = [1, 1]} : vector<4x16xf32> to vector<1x16xf32>
    %cst_103 = arith.constant 0.000000e+00 : f32
    %190 = vector.broadcast %cst_103 : f32 to vector<3x16xf32>
    %191 = tpu.concatenate %189, %190 in 0 : vector<1x16xf32>, vector<3x16xf32> -> vector<4x16xf32>
    %192 = tpu.concatenate %188, %185, %191 in 1 : vector<4x16xf32>, vector<4x16xf32>, vector<4x16xf32> -> vector<4x48xf32>
    %193 = tpu.concatenate %184, %192 in 0 : vector<4x48xf32>, vector<4x48xf32> -> vector<8x48xf32>
    %cst_104 = arith.constant dense<0.000000e+00> : vector<8x16xf32>
    %194 = tpu.matmul %193, %175, %cst_104 {dimension_numbers = #tpu.dot_dimension_numbers<[1], [0], [0], [1], [0, 0, 1, 1], [], []>} : vector<8x48xf32>, vector<48x16xf32>, vector<8x16xf32> -> vector<8x16xf32>
    %195 = vector.broadcast %176 : vector<1x16xf32> to vector<8x16xf32>
    %196 = arith.addf %194, %195 : vector<8x16xf32>
    %cst_105 = arith.constant 0.000000e+00 : f32
    %197 = vector.broadcast %cst_105 : f32 to vector<8x16xf32>
    %198 = arith.maximumf %196, %197 : vector<8x16xf32>
    %c472 = arith.constant 472 : index
    %c0_106 = arith.constant 0 : index
    %199 = vector.load %arg2[%c472, %c0_106] : memref<1208x128xf32, #tpu.memory_space<vmem>>, vector<16x16xf32>
    %c488 = arith.constant 488 : index
    %c0_107 = arith.constant 0 : index
    %200 = vector.load %arg2[%c488, %c0_107] : memref<1208x128xf32, #tpu.memory_space<vmem>>, vector<1x16xf32>
    %cst_108 = arith.constant dense<0.000000e+00> : vector<8x16xf32>
    %201 = tpu.matmul %198, %199, %cst_108 {dimension_numbers = #tpu.dot_dimension_numbers<[1], [0], [0], [1], [0, 0, 1, 1], [], []>} : vector<8x16xf32>, vector<16x16xf32>, vector<8x16xf32> -> vector<8x16xf32>
    %202 = vector.broadcast %200 : vector<1x16xf32> to vector<8x16xf32>
    %203 = arith.addf %201, %202 : vector<8x16xf32>
    %204 = arith.addf %172, %203 : vector<8x16xf32>
    %c496 = arith.constant 496 : index
    %c0_109 = arith.constant 0 : index
    %205 = vector.load %arg2[%c496, %c0_109] : memref<1208x128xf32, #tpu.memory_space<vmem>>, vector<48x16xf32>
    %c544 = arith.constant 544 : index
    %c0_110 = arith.constant 0 : index
    %206 = vector.load %arg2[%c544, %c0_110] : memref<1208x128xf32, #tpu.memory_space<vmem>>, vector<1x16xf32>
    %207 = vector.extract_strided_slice %204 {offsets = [0, 0], sizes = [4, 16], strides = [1, 1]} : vector<8x16xf32> to vector<4x16xf32>
    %cst_111 = arith.constant 0.000000e+00 : f32
    %208 = vector.broadcast %cst_111 : f32 to vector<1x16xf32>
    %209 = vector.extract_strided_slice %207 {offsets = [0, 0], sizes = [3, 16], strides = [1, 1]} : vector<4x16xf32> to vector<3x16xf32>
    %210 = tpu.concatenate %208, %209 in 0 : vector<1x16xf32>, vector<3x16xf32> -> vector<4x16xf32>
    %211 = vector.extract_strided_slice %207 {offsets = [1, 0], sizes = [3, 16], strides = [1, 1]} : vector<4x16xf32> to vector<3x16xf32>
    %cst_112 = arith.constant 0.000000e+00 : f32
    %212 = vector.broadcast %cst_112 : f32 to vector<1x16xf32>
    %213 = tpu.concatenate %211, %212 in 0 : vector<3x16xf32>, vector<1x16xf32> -> vector<4x16xf32>
    %214 = tpu.concatenate %210, %207, %213 in 1 : vector<4x16xf32>, vector<4x16xf32>, vector<4x16xf32> -> vector<4x48xf32>
    %215 = vector.extract_strided_slice %204 {offsets = [4, 0], sizes = [4, 16], strides = [1, 1]} : vector<8x16xf32> to vector<4x16xf32>
    %cst_113 = arith.constant 0.000000e+00 : f32
    %216 = vector.broadcast %cst_113 : f32 to vector<1x16xf32>
    %217 = vector.extract_strided_slice %215 {offsets = [0, 0], sizes = [3, 16], strides = [1, 1]} : vector<4x16xf32> to vector<3x16xf32>
    %218 = tpu.concatenate %216, %217 in 0 : vector<1x16xf32>, vector<3x16xf32> -> vector<4x16xf32>
    %219 = vector.extract_strided_slice %215 {offsets = [1, 0], sizes = [3, 16], strides = [1, 1]} : vector<4x16xf32> to vector<3x16xf32>
    %cst_114 = arith.constant 0.000000e+00 : f32
    %220 = vector.broadcast %cst_114 : f32 to vector<1x16xf32>
    %221 = tpu.concatenate %219, %220 in 0 : vector<3x16xf32>, vector<1x16xf32> -> vector<4x16xf32>
    %222 = tpu.concatenate %218, %215, %221 in 1 : vector<4x16xf32>, vector<4x16xf32>, vector<4x16xf32> -> vector<4x48xf32>
    %223 = tpu.concatenate %214, %222 in 0 : vector<4x48xf32>, vector<4x48xf32> -> vector<8x48xf32>
    %cst_115 = arith.constant dense<0.000000e+00> : vector<8x16xf32>
    %224 = tpu.matmul %223, %205, %cst_115 {dimension_numbers = #tpu.dot_dimension_numbers<[1], [0], [0], [1], [0, 0, 1, 1], [], []>} : vector<8x48xf32>, vector<48x16xf32>, vector<8x16xf32> -> vector<8x16xf32>
    %225 = vector.broadcast %206 : vector<1x16xf32> to vector<8x16xf32>
    %226 = arith.addf %224, %225 : vector<8x16xf32>
    %c1184 = arith.constant 1184 : index
    %c0_116 = arith.constant 0 : index
    %227 = vector.load %arg2[%c1184, %c0_116] : memref<1208x128xf32, #tpu.memory_space<vmem>>, vector<16x32xf32>
    %c1200 = arith.constant 1200 : index
    %c0_117 = arith.constant 0 : index
    %228 = vector.load %arg2[%c1200, %c0_117] : memref<1208x128xf32, #tpu.memory_space<vmem>>, vector<1x32xf32>
    %c1152 = arith.constant 1152 : index
    %c0_118 = arith.constant 0 : index
    %229 = vector.load %arg2[%c1152, %c0_118] : memref<1208x128xf32, #tpu.memory_space<vmem>>, vector<32x16xf32>
    %cst_119 = arith.constant dense<0.000000e+00> : vector<8x32xf32>
    %230 = tpu.matmul %226, %227, %cst_119 {dimension_numbers = #tpu.dot_dimension_numbers<[1], [0], [0], [1], [0, 0, 1, 1], [], []>} : vector<8x16xf32>, vector<16x32xf32>, vector<8x32xf32> -> vector<8x32xf32>
    %cst_120 = arith.constant 2.000000e+00 : f32
    %231 = vector.broadcast %cst_120 : f32 to vector<8x32xf32>
    %232 = arith.mulf %231, %230 : vector<8x32xf32>
    %233 = vector.broadcast %228 : vector<1x32xf32> to vector<8x32xf32>
    %234 = arith.subf %233, %232 : vector<8x32xf32>
    %235 = tpu.iota {dimensions = array<i32: 1>} : vector<8x32xi32>
    %cst_121 = arith.constant dense<0x7F800000> : vector<8xf32>
    %236 = vector.multi_reduction <minimumf>, %234, %cst_121 [1] : vector<8x32xf32> to vector<8xf32>
    %237 = vector.shape_cast %236 : vector<8xf32> to vector<8x1xf32>
    %238 = vector.broadcast %237 : vector<8x1xf32> to vector<8x32xf32>
    %239 = arith.cmpf oeq, %234, %238 : vector<8x32xf32>
    %c32_i32 = arith.constant 32 : i32
    %240 = vector.broadcast %c32_i32 : i32 to vector<8x32xi32>
    %241 = arith.select %239, %235, %240 : vector<8x32xi1>, vector<8x32xi32>
    %cst_122 = arith.constant dense<2147483647> : vector<8xi32>
    %242 = vector.multi_reduction <minsi>, %241, %cst_122 [1] : vector<8x32xi32> to vector<8xi32>
    %243 = vector.shape_cast %242 : vector<8xi32> to vector<8x1xi32>
    %244 = vector.broadcast %243 : vector<8x1xi32> to vector<8x32xi32>
    %245 = arith.cmpi eq, %235, %244 : vector<8x32xi32>
    %246 = arith.extui %245 : vector<8x32xi1> to vector<8x32xi32>
    %247 = arith.sitofp %246 : vector<8x32xi32> to vector<8x32xf32>
    %cst_123 = arith.constant dense<0.000000e+00> : vector<8x16xf32>
    %248 = tpu.matmul %247, %229, %cst_123 {dimension_numbers = #tpu.dot_dimension_numbers<[1], [0], [0], [1], [0, 0, 1, 1], [], []>} : vector<8x32xf32>, vector<32x16xf32>, vector<8x16xf32> -> vector<8x16xf32>
    %c0_124 = arith.constant 0 : index
    %c0_125 = arith.constant 0 : index
    %249 = vector.load %arg6[%c0_124, %c0_125] : memref<8x16xf32, #tpu.memory_space<vmem>>, vector<8x16xf32>
    tpu.vector_store %arg6[%c0_124, %c0_125], %248 {strides = array<i32>} : memref<8x16xf32, #tpu.memory_space<vmem>>, vector<8x16xf32>,
    %c0_126 = arith.constant 0 : index
    %c0_127 = arith.constant 0 : index
    %250 = vector.load %arg5[%c0_126, %c0_127] : memref<8x1xi32, #tpu.memory_space<vmem>>, vector<8x1xi32>
    tpu.vector_store %arg5[%c0_126, %c0_127], %243 {strides = array<i32>} : memref<8x1xi32, #tpu.memory_space<vmem>>, vector<8x1xi32>,
    %c552 = arith.constant 552 : index
    %c0_128 = arith.constant 0 : index
    %251 = vector.load %arg2[%c552, %c0_128] : memref<1208x128xf32, #tpu.memory_space<vmem>>, vector<48x16xf32>
    %c600 = arith.constant 600 : index
    %c0_129 = arith.constant 0 : index
    %252 = vector.load %arg2[%c600, %c0_129] : memref<1208x128xf32, #tpu.memory_space<vmem>>, vector<1x16xf32>
    %253 = vector.extract_strided_slice %248 {offsets = [0, 0], sizes = [4, 16], strides = [1, 1]} : vector<8x16xf32> to vector<4x16xf32>
    %cst_130 = arith.constant 0.000000e+00 : f32
    %254 = vector.broadcast %cst_130 : f32 to vector<1x16xf32>
    %255 = vector.extract_strided_slice %253 {offsets = [0, 0], sizes = [3, 16], strides = [1, 1]} : vector<4x16xf32> to vector<3x16xf32>
    %256 = tpu.concatenate %254, %255 in 0 : vector<1x16xf32>, vector<3x16xf32> -> vector<4x16xf32>
    %257 = vector.extract_strided_slice %253 {offsets = [1, 0], sizes = [3, 16], strides = [1, 1]} : vector<4x16xf32> to vector<3x16xf32>
    %cst_131 = arith.constant 0.000000e+00 : f32
    %258 = vector.broadcast %cst_131 : f32 to vector<1x16xf32>
    %259 = tpu.concatenate %257, %258 in 0 : vector<3x16xf32>, vector<1x16xf32> -> vector<4x16xf32>
    %260 = tpu.concatenate %256, %253, %259 in 1 : vector<4x16xf32>, vector<4x16xf32>, vector<4x16xf32> -> vector<4x48xf32>
    %261 = vector.extract_strided_slice %248 {offsets = [4, 0], sizes = [4, 16], strides = [1, 1]} : vector<8x16xf32> to vector<4x16xf32>
    %cst_132 = arith.constant 0.000000e+00 : f32
    %262 = vector.broadcast %cst_132 : f32 to vector<1x16xf32>
    %263 = vector.extract_strided_slice %261 {offsets = [0, 0], sizes = [3, 16], strides = [1, 1]} : vector<4x16xf32> to vector<3x16xf32>
    %264 = tpu.concatenate %262, %263 in 0 : vector<1x16xf32>, vector<3x16xf32> -> vector<4x16xf32>
    %265 = vector.extract_strided_slice %261 {offsets = [1, 0], sizes = [3, 16], strides = [1, 1]} : vector<4x16xf32> to vector<3x16xf32>
    %cst_133 = arith.constant 0.000000e+00 : f32
    %266 = vector.broadcast %cst_133 : f32 to vector<1x16xf32>
    %267 = tpu.concatenate %265, %266 in 0 : vector<3x16xf32>, vector<1x16xf32> -> vector<4x16xf32>
    %268 = tpu.concatenate %264, %261, %267 in 1 : vector<4x16xf32>, vector<4x16xf32>, vector<4x16xf32> -> vector<4x48xf32>
    %269 = tpu.concatenate %260, %268 in 0 : vector<4x48xf32>, vector<4x48xf32> -> vector<8x48xf32>
    %cst_134 = arith.constant dense<0.000000e+00> : vector<8x16xf32>
    %270 = tpu.matmul %269, %251, %cst_134 {dimension_numbers = #tpu.dot_dimension_numbers<[1], [0], [0], [1], [0, 0, 1, 1], [], []>} : vector<8x48xf32>, vector<48x16xf32>, vector<8x16xf32> -> vector<8x16xf32>
    %271 = vector.broadcast %252 : vector<1x16xf32> to vector<8x16xf32>
    %272 = arith.addf %270, %271 : vector<8x16xf32>
    %cst_135 = arith.constant 0.000000e+00 : f32
    %273 = vector.broadcast %cst_135 : f32 to vector<8x16xf32>
    %274 = arith.maximumf %272, %273 : vector<8x16xf32>
    %cst_136 = arith.constant 0.000000e+00 : f32
    %275 = vector.broadcast %cst_136 : f32 to vector<8x16xf32>
    %276 = arith.maximumf %274, %275 : vector<8x16xf32>
    %c608 = arith.constant 608 : index
    %c0_137 = arith.constant 0 : index
    %277 = vector.load %arg2[%c608, %c0_137] : memref<1208x128xf32, #tpu.memory_space<vmem>>, vector<48x16xf32>
    %c656 = arith.constant 656 : index
    %c0_138 = arith.constant 0 : index
    %278 = vector.load %arg2[%c656, %c0_138] : memref<1208x128xf32, #tpu.memory_space<vmem>>, vector<1x16xf32>
    %279 = vector.extract_strided_slice %276 {offsets = [0, 0], sizes = [4, 16], strides = [1, 1]} : vector<8x16xf32> to vector<4x16xf32>
    %cst_139 = arith.constant 0.000000e+00 : f32
    %280 = vector.broadcast %cst_139 : f32 to vector<3x16xf32>
    %281 = vector.extract_strided_slice %279 {offsets = [0, 0], sizes = [1, 16], strides = [1, 1]} : vector<4x16xf32> to vector<1x16xf32>
    %282 = tpu.concatenate %280, %281 in 0 : vector<3x16xf32>, vector<1x16xf32> -> vector<4x16xf32>
    %283 = vector.extract_strided_slice %279 {offsets = [3, 0], sizes = [1, 16], strides = [1, 1]} : vector<4x16xf32> to vector<1x16xf32>
    %cst_140 = arith.constant 0.000000e+00 : f32
    %284 = vector.broadcast %cst_140 : f32 to vector<3x16xf32>
    %285 = tpu.concatenate %283, %284 in 0 : vector<1x16xf32>, vector<3x16xf32> -> vector<4x16xf32>
    %286 = tpu.concatenate %282, %279, %285 in 1 : vector<4x16xf32>, vector<4x16xf32>, vector<4x16xf32> -> vector<4x48xf32>
    %287 = vector.extract_strided_slice %276 {offsets = [4, 0], sizes = [4, 16], strides = [1, 1]} : vector<8x16xf32> to vector<4x16xf32>
    %cst_141 = arith.constant 0.000000e+00 : f32
    %288 = vector.broadcast %cst_141 : f32 to vector<3x16xf32>
    %289 = vector.extract_strided_slice %287 {offsets = [0, 0], sizes = [1, 16], strides = [1, 1]} : vector<4x16xf32> to vector<1x16xf32>
    %290 = tpu.concatenate %288, %289 in 0 : vector<3x16xf32>, vector<1x16xf32> -> vector<4x16xf32>
    %291 = vector.extract_strided_slice %287 {offsets = [3, 0], sizes = [1, 16], strides = [1, 1]} : vector<4x16xf32> to vector<1x16xf32>
    %cst_142 = arith.constant 0.000000e+00 : f32
    %292 = vector.broadcast %cst_142 : f32 to vector<3x16xf32>
    %293 = tpu.concatenate %291, %292 in 0 : vector<1x16xf32>, vector<3x16xf32> -> vector<4x16xf32>
    %294 = tpu.concatenate %290, %287, %293 in 1 : vector<4x16xf32>, vector<4x16xf32>, vector<4x16xf32> -> vector<4x48xf32>
    %295 = tpu.concatenate %286, %294 in 0 : vector<4x48xf32>, vector<4x48xf32> -> vector<8x48xf32>
    %cst_143 = arith.constant dense<0.000000e+00> : vector<8x16xf32>
    %296 = tpu.matmul %295, %277, %cst_143 {dimension_numbers = #tpu.dot_dimension_numbers<[1], [0], [0], [1], [0, 0, 1, 1], [], []>} : vector<8x48xf32>, vector<48x16xf32>, vector<8x16xf32> -> vector<8x16xf32>
    %297 = vector.broadcast %278 : vector<1x16xf32> to vector<8x16xf32>
    %298 = arith.addf %296, %297 : vector<8x16xf32>
    %cst_144 = arith.constant 0.000000e+00 : f32
    %299 = vector.broadcast %cst_144 : f32 to vector<8x16xf32>
    %300 = arith.maximumf %298, %299 : vector<8x16xf32>
    %c664 = arith.constant 664 : index
    %c0_145 = arith.constant 0 : index
    %301 = vector.load %arg2[%c664, %c0_145] : memref<1208x128xf32, #tpu.memory_space<vmem>>, vector<16x16xf32>
    %c680 = arith.constant 680 : index
    %c0_146 = arith.constant 0 : index
    %302 = vector.load %arg2[%c680, %c0_146] : memref<1208x128xf32, #tpu.memory_space<vmem>>, vector<1x16xf32>
    %cst_147 = arith.constant dense<0.000000e+00> : vector<8x16xf32>
    %303 = tpu.matmul %300, %301, %cst_147 {dimension_numbers = #tpu.dot_dimension_numbers<[1], [0], [0], [1], [0, 0, 1, 1], [], []>} : vector<8x16xf32>, vector<16x16xf32>, vector<8x16xf32> -> vector<8x16xf32>
    %304 = vector.broadcast %302 : vector<1x16xf32> to vector<8x16xf32>
    %305 = arith.addf %303, %304 : vector<8x16xf32>
    %306 = arith.addf %274, %305 : vector<8x16xf32>
    %cst_148 = arith.constant 0.000000e+00 : f32
    %307 = vector.broadcast %cst_148 : f32 to vector<8x16xf32>
    %308 = arith.maximumf %306, %307 : vector<8x16xf32>
    %c688 = arith.constant 688 : index
    %c0_149 = arith.constant 0 : index
    %309 = vector.load %arg2[%c688, %c0_149] : memref<1208x128xf32, #tpu.memory_space<vmem>>, vector<48x16xf32>
    %c736 = arith.constant 736 : index
    %c0_150 = arith.constant 0 : index
    %310 = vector.load %arg2[%c736, %c0_150] : memref<1208x128xf32, #tpu.memory_space<vmem>>, vector<1x16xf32>
    %311 = vector.extract_strided_slice %308 {offsets = [0, 0], sizes = [4, 16], strides = [1, 1]} : vector<8x16xf32> to vector<4x16xf32>
    %cst_151 = arith.constant 0.000000e+00 : f32
    %312 = vector.broadcast %cst_151 : f32 to vector<1x16xf32>
    %313 = vector.extract_strided_slice %311 {offsets = [0, 0], sizes = [3, 16], strides = [1, 1]} : vector<4x16xf32> to vector<3x16xf32>
    %314 = tpu.concatenate %312, %313 in 0 : vector<1x16xf32>, vector<3x16xf32> -> vector<4x16xf32>
    %315 = vector.extract_strided_slice %311 {offsets = [1, 0], sizes = [3, 16], strides = [1, 1]} : vector<4x16xf32> to vector<3x16xf32>
    %cst_152 = arith.constant 0.000000e+00 : f32
    %316 = vector.broadcast %cst_152 : f32 to vector<1x16xf32>
    %317 = tpu.concatenate %315, %316 in 0 : vector<3x16xf32>, vector<1x16xf32> -> vector<4x16xf32>
    %318 = tpu.concatenate %314, %311, %317 in 1 : vector<4x16xf32>, vector<4x16xf32>, vector<4x16xf32> -> vector<4x48xf32>
    %319 = vector.extract_strided_slice %308 {offsets = [4, 0], sizes = [4, 16], strides = [1, 1]} : vector<8x16xf32> to vector<4x16xf32>
    %cst_153 = arith.constant 0.000000e+00 : f32
    %320 = vector.broadcast %cst_153 : f32 to vector<1x16xf32>
    %321 = vector.extract_strided_slice %319 {offsets = [0, 0], sizes = [3, 16], strides = [1, 1]} : vector<4x16xf32> to vector<3x16xf32>
    %322 = tpu.concatenate %320, %321 in 0 : vector<1x16xf32>, vector<3x16xf32> -> vector<4x16xf32>
    %323 = vector.extract_strided_slice %319 {offsets = [1, 0], sizes = [3, 16], strides = [1, 1]} : vector<4x16xf32> to vector<3x16xf32>
    %cst_154 = arith.constant 0.000000e+00 : f32
    %324 = vector.broadcast %cst_154 : f32 to vector<1x16xf32>
    %325 = tpu.concatenate %323, %324 in 0 : vector<3x16xf32>, vector<1x16xf32> -> vector<4x16xf32>
    %326 = tpu.concatenate %322, %319, %325 in 1 : vector<4x16xf32>, vector<4x16xf32>, vector<4x16xf32> -> vector<4x48xf32>
    %327 = tpu.concatenate %318, %326 in 0 : vector<4x48xf32>, vector<4x48xf32> -> vector<8x48xf32>
    %cst_155 = arith.constant dense<0.000000e+00> : vector<8x16xf32>
    %328 = tpu.matmul %327, %309, %cst_155 {dimension_numbers = #tpu.dot_dimension_numbers<[1], [0], [0], [1], [0, 0, 1, 1], [], []>} : vector<8x48xf32>, vector<48x16xf32>, vector<8x16xf32> -> vector<8x16xf32>
    %329 = vector.broadcast %310 : vector<1x16xf32> to vector<8x16xf32>
    %330 = arith.addf %328, %329 : vector<8x16xf32>
    %cst_156 = arith.constant 0.000000e+00 : f32
    %331 = vector.broadcast %cst_156 : f32 to vector<8x16xf32>
    %332 = arith.maximumf %330, %331 : vector<8x16xf32>
    %c744 = arith.constant 744 : index
    %c0_157 = arith.constant 0 : index
    %333 = vector.load %arg2[%c744, %c0_157] : memref<1208x128xf32, #tpu.memory_space<vmem>>, vector<16x16xf32>
    %c760 = arith.constant 760 : index
    %c0_158 = arith.constant 0 : index
    %334 = vector.load %arg2[%c760, %c0_158] : memref<1208x128xf32, #tpu.memory_space<vmem>>, vector<1x16xf32>
    %cst_159 = arith.constant dense<0.000000e+00> : vector<8x16xf32>
    %335 = tpu.matmul %332, %333, %cst_159 {dimension_numbers = #tpu.dot_dimension_numbers<[1], [0], [0], [1], [0, 0, 1, 1], [], []>} : vector<8x16xf32>, vector<16x16xf32>, vector<8x16xf32> -> vector<8x16xf32>
    %336 = vector.broadcast %334 : vector<1x16xf32> to vector<8x16xf32>
    %337 = arith.addf %335, %336 : vector<8x16xf32>
    %338 = arith.addf %306, %337 : vector<8x16xf32>
    %c0_160 = arith.constant 0 : index
    %c0_161 = arith.constant 0 : index
    %339 = vector.load %arg3[%c0_160, %c0_161] : memref<32x16xf32, #tpu.memory_space<vmem>>, vector<16x8xf32>
    %cst_162 = arith.constant dense<0.000000e+00> : vector<16x16xf32>
    %340 = tpu.matmul %339, %338, %cst_162 {dimension_numbers = #tpu.dot_dimension_numbers<[1], [0], [0], [1], [0, 0, 1, 1], [], []>} : vector<16x8xf32>, vector<8x16xf32>, vector<16x16xf32> -> vector<16x16xf32>
    %c768 = arith.constant 768 : index
    %c0_163 = arith.constant 0 : index
    %341 = vector.load %arg2[%c768, %c0_163] : memref<1208x128xf32, #tpu.memory_space<vmem>>, vector<48x16xf32>
    %c816 = arith.constant 816 : index
    %c0_164 = arith.constant 0 : index
    %342 = vector.load %arg2[%c816, %c0_164] : memref<1208x128xf32, #tpu.memory_space<vmem>>, vector<1x16xf32>
    %343 = vector.extract_strided_slice %340 {offsets = [0, 0], sizes = [8, 16], strides = [1, 1]} : vector<16x16xf32> to vector<8x16xf32>
    %cst_165 = arith.constant 0.000000e+00 : f32
    %344 = vector.broadcast %cst_165 : f32 to vector<1x16xf32>
    %345 = vector.extract_strided_slice %343 {offsets = [0, 0], sizes = [7, 16], strides = [1, 1]} : vector<8x16xf32> to vector<7x16xf32>
    %346 = tpu.concatenate %344, %345 in 0 : vector<1x16xf32>, vector<7x16xf32> -> vector<8x16xf32>
    %347 = vector.extract_strided_slice %343 {offsets = [1, 0], sizes = [7, 16], strides = [1, 1]} : vector<8x16xf32> to vector<7x16xf32>
    %cst_166 = arith.constant 0.000000e+00 : f32
    %348 = vector.broadcast %cst_166 : f32 to vector<1x16xf32>
    %349 = tpu.concatenate %347, %348 in 0 : vector<7x16xf32>, vector<1x16xf32> -> vector<8x16xf32>
    %350 = tpu.concatenate %346, %343, %349 in 1 : vector<8x16xf32>, vector<8x16xf32>, vector<8x16xf32> -> vector<8x48xf32>
    %351 = vector.extract_strided_slice %340 {offsets = [8, 0], sizes = [8, 16], strides = [1, 1]} : vector<16x16xf32> to vector<8x16xf32>
    %cst_167 = arith.constant 0.000000e+00 : f32
    %352 = vector.broadcast %cst_167 : f32 to vector<1x16xf32>
    %353 = vector.extract_strided_slice %351 {offsets = [0, 0], sizes = [7, 16], strides = [1, 1]} : vector<8x16xf32> to vector<7x16xf32>
    %354 = tpu.concatenate %352, %353 in 0 : vector<1x16xf32>, vector<7x16xf32> -> vector<8x16xf32>
    %355 = vector.extract_strided_slice %351 {offsets = [1, 0], sizes = [7, 16], strides = [1, 1]} : vector<8x16xf32> to vector<7x16xf32>
    %cst_168 = arith.constant 0.000000e+00 : f32
    %356 = vector.broadcast %cst_168 : f32 to vector<1x16xf32>
    %357 = tpu.concatenate %355, %356 in 0 : vector<7x16xf32>, vector<1x16xf32> -> vector<8x16xf32>
    %358 = tpu.concatenate %354, %351, %357 in 1 : vector<8x16xf32>, vector<8x16xf32>, vector<8x16xf32> -> vector<8x48xf32>
    %359 = tpu.concatenate %350, %358 in 0 : vector<8x48xf32>, vector<8x48xf32> -> vector<16x48xf32>
    %cst_169 = arith.constant dense<0.000000e+00> : vector<16x16xf32>
    %360 = tpu.matmul %359, %341, %cst_169 {dimension_numbers = #tpu.dot_dimension_numbers<[1], [0], [0], [1], [0, 0, 1, 1], [], []>} : vector<16x48xf32>, vector<48x16xf32>, vector<16x16xf32> -> vector<16x16xf32>
    %361 = vector.broadcast %342 : vector<1x16xf32> to vector<16x16xf32>
    %362 = arith.addf %360, %361 : vector<16x16xf32>
    %cst_170 = arith.constant 0.000000e+00 : f32
    %363 = vector.broadcast %cst_170 : f32 to vector<16x16xf32>
    %364 = arith.maximumf %362, %363 : vector<16x16xf32>
    %c824 = arith.constant 824 : index
    %c0_171 = arith.constant 0 : index
    %365 = vector.load %arg2[%c824, %c0_171] : memref<1208x128xf32, #tpu.memory_space<vmem>>, vector<48x16xf32>
    %c872 = arith.constant 872 : index
    %c0_172 = arith.constant 0 : index
    %366 = vector.load %arg2[%c872, %c0_172] : memref<1208x128xf32, #tpu.memory_space<vmem>>, vector<1x16xf32>
    %367 = vector.extract_strided_slice %364 {offsets = [0, 0], sizes = [8, 16], strides = [1, 1]} : vector<16x16xf32> to vector<8x16xf32>
    %cst_173 = arith.constant 0.000000e+00 : f32
    %368 = vector.broadcast %cst_173 : f32 to vector<3x16xf32>
    %369 = vector.extract_strided_slice %367 {offsets = [0, 0], sizes = [5, 16], strides = [1, 1]} : vector<8x16xf32> to vector<5x16xf32>
    %370 = tpu.concatenate %368, %369 in 0 : vector<3x16xf32>, vector<5x16xf32> -> vector<8x16xf32>
    %371 = vector.extract_strided_slice %367 {offsets = [3, 0], sizes = [5, 16], strides = [1, 1]} : vector<8x16xf32> to vector<5x16xf32>
    %cst_174 = arith.constant 0.000000e+00 : f32
    %372 = vector.broadcast %cst_174 : f32 to vector<3x16xf32>
    %373 = tpu.concatenate %371, %372 in 0 : vector<5x16xf32>, vector<3x16xf32> -> vector<8x16xf32>
    %374 = tpu.concatenate %370, %367, %373 in 1 : vector<8x16xf32>, vector<8x16xf32>, vector<8x16xf32> -> vector<8x48xf32>
    %375 = vector.extract_strided_slice %364 {offsets = [8, 0], sizes = [8, 16], strides = [1, 1]} : vector<16x16xf32> to vector<8x16xf32>
    %cst_175 = arith.constant 0.000000e+00 : f32
    %376 = vector.broadcast %cst_175 : f32 to vector<3x16xf32>
    %377 = vector.extract_strided_slice %375 {offsets = [0, 0], sizes = [5, 16], strides = [1, 1]} : vector<8x16xf32> to vector<5x16xf32>
    %378 = tpu.concatenate %376, %377 in 0 : vector<3x16xf32>, vector<5x16xf32> -> vector<8x16xf32>
    %379 = vector.extract_strided_slice %375 {offsets = [3, 0], sizes = [5, 16], strides = [1, 1]} : vector<8x16xf32> to vector<5x16xf32>
    %cst_176 = arith.constant 0.000000e+00 : f32
    %380 = vector.broadcast %cst_176 : f32 to vector<3x16xf32>
    %381 = tpu.concatenate %379, %380 in 0 : vector<5x16xf32>, vector<3x16xf32> -> vector<8x16xf32>
    %382 = tpu.concatenate %378, %375, %381 in 1 : vector<8x16xf32>, vector<8x16xf32>, vector<8x16xf32> -> vector<8x48xf32>
    %383 = tpu.concatenate %374, %382 in 0 : vector<8x48xf32>, vector<8x48xf32> -> vector<16x48xf32>
    %cst_177 = arith.constant dense<0.000000e+00> : vector<16x16xf32>
    %384 = tpu.matmul %383, %365, %cst_177 {dimension_numbers = #tpu.dot_dimension_numbers<[1], [0], [0], [1], [0, 0, 1, 1], [], []>} : vector<16x48xf32>, vector<48x16xf32>, vector<16x16xf32> -> vector<16x16xf32>
    %385 = vector.broadcast %366 : vector<1x16xf32> to vector<16x16xf32>
    %386 = arith.addf %384, %385 : vector<16x16xf32>
    %cst_178 = arith.constant 0.000000e+00 : f32
    %387 = vector.broadcast %cst_178 : f32 to vector<16x16xf32>
    %388 = arith.maximumf %386, %387 : vector<16x16xf32>
    %c880 = arith.constant 880 : index
    %c0_179 = arith.constant 0 : index
    %389 = vector.load %arg2[%c880, %c0_179] : memref<1208x128xf32, #tpu.memory_space<vmem>>, vector<16x16xf32>
    %c896 = arith.constant 896 : index
    %c0_180 = arith.constant 0 : index
    %390 = vector.load %arg2[%c896, %c0_180] : memref<1208x128xf32, #tpu.memory_space<vmem>>, vector<1x16xf32>
    %cst_181 = arith.constant dense<0.000000e+00> : vector<16x16xf32>
    %391 = tpu.matmul %388, %389, %cst_181 {dimension_numbers = #tpu.dot_dimension_numbers<[1], [0], [0], [1], [0, 0, 1, 1], [], []>} : vector<16x16xf32>, vector<16x16xf32>, vector<16x16xf32> -> vector<16x16xf32>
    %392 = vector.broadcast %390 : vector<1x16xf32> to vector<16x16xf32>
    %393 = arith.addf %391, %392 : vector<16x16xf32>
    %394 = arith.addf %362, %393 : vector<16x16xf32>
    %cst_182 = arith.constant 0.000000e+00 : f32
    %395 = vector.broadcast %cst_182 : f32 to vector<16x16xf32>
    %396 = arith.maximumf %394, %395 : vector<16x16xf32>
    %c904 = arith.constant 904 : index
    %c0_183 = arith.constant 0 : index
    %397 = vector.load %arg2[%c904, %c0_183] : memref<1208x128xf32, #tpu.memory_space<vmem>>, vector<48x16xf32>
    %c952 = arith.constant 952 : index
    %c0_184 = arith.constant 0 : index
    %398 = vector.load %arg2[%c952, %c0_184] : memref<1208x128xf32, #tpu.memory_space<vmem>>, vector<1x16xf32>
    %399 = vector.extract_strided_slice %396 {offsets = [0, 0], sizes = [8, 16], strides = [1, 1]} : vector<16x16xf32> to vector<8x16xf32>
    %cst_185 = arith.constant 0.000000e+00 : f32
    %400 = vector.broadcast %cst_185 : f32 to vector<1x16xf32>
    %401 = vector.extract_strided_slice %399 {offsets = [0, 0], sizes = [7, 16], strides = [1, 1]} : vector<8x16xf32> to vector<7x16xf32>
    %402 = tpu.concatenate %400, %401 in 0 : vector<1x16xf32>, vector<7x16xf32> -> vector<8x16xf32>
    %403 = vector.extract_strided_slice %399 {offsets = [1, 0], sizes = [7, 16], strides = [1, 1]} : vector<8x16xf32> to vector<7x16xf32>
    %cst_186 = arith.constant 0.000000e+00 : f32
    %404 = vector.broadcast %cst_186 : f32 to vector<1x16xf32>
    %405 = tpu.concatenate %403, %404 in 0 : vector<7x16xf32>, vector<1x16xf32> -> vector<8x16xf32>
    %406 = tpu.concatenate %402, %399, %405 in 1 : vector<8x16xf32>, vector<8x16xf32>, vector<8x16xf32> -> vector<8x48xf32>
    %407 = vector.extract_strided_slice %396 {offsets = [8, 0], sizes = [8, 16], strides = [1, 1]} : vector<16x16xf32> to vector<8x16xf32>
    %cst_187 = arith.constant 0.000000e+00 : f32
    %408 = vector.broadcast %cst_187 : f32 to vector<1x16xf32>
    %409 = vector.extract_strided_slice %407 {offsets = [0, 0], sizes = [7, 16], strides = [1, 1]} : vector<8x16xf32> to vector<7x16xf32>
    %410 = tpu.concatenate %408, %409 in 0 : vector<1x16xf32>, vector<7x16xf32> -> vector<8x16xf32>
    %411 = vector.extract_strided_slice %407 {offsets = [1, 0], sizes = [7, 16], strides = [1, 1]} : vector<8x16xf32> to vector<7x16xf32>
    %cst_188 = arith.constant 0.000000e+00 : f32
    %412 = vector.broadcast %cst_188 : f32 to vector<1x16xf32>
    %413 = tpu.concatenate %411, %412 in 0 : vector<7x16xf32>, vector<1x16xf32> -> vector<8x16xf32>
    %414 = tpu.concatenate %410, %407, %413 in 1 : vector<8x16xf32>, vector<8x16xf32>, vector<8x16xf32> -> vector<8x48xf32>
    %415 = tpu.concatenate %406, %414 in 0 : vector<8x48xf32>, vector<8x48xf32> -> vector<16x48xf32>
    %cst_189 = arith.constant dense<0.000000e+00> : vector<16x16xf32>
    %416 = tpu.matmul %415, %397, %cst_189 {dimension_numbers = #tpu.dot_dimension_numbers<[1], [0], [0], [1], [0, 0, 1, 1], [], []>} : vector<16x48xf32>, vector<48x16xf32>, vector<16x16xf32> -> vector<16x16xf32>
    %417 = vector.broadcast %398 : vector<1x16xf32> to vector<16x16xf32>
    %418 = arith.addf %416, %417 : vector<16x16xf32>
    %cst_190 = arith.constant 0.000000e+00 : f32
    %419 = vector.broadcast %cst_190 : f32 to vector<16x16xf32>
    %420 = arith.maximumf %418, %419 : vector<16x16xf32>
    %c960 = arith.constant 960 : index
    %c0_191 = arith.constant 0 : index
    %421 = vector.load %arg2[%c960, %c0_191] : memref<1208x128xf32, #tpu.memory_space<vmem>>, vector<16x16xf32>
    %c976 = arith.constant 976 : index
    %c0_192 = arith.constant 0 : index
    %422 = vector.load %arg2[%c976, %c0_192] : memref<1208x128xf32, #tpu.memory_space<vmem>>, vector<1x16xf32>
    %cst_193 = arith.constant dense<0.000000e+00> : vector<16x16xf32>
    %423 = tpu.matmul %420, %421, %cst_193 {dimension_numbers = #tpu.dot_dimension_numbers<[1], [0], [0], [1], [0, 0, 1, 1], [], []>} : vector<16x16xf32>, vector<16x16xf32>, vector<16x16xf32> -> vector<16x16xf32>
    %424 = vector.broadcast %422 : vector<1x16xf32> to vector<16x16xf32>
    %425 = arith.addf %423, %424 : vector<16x16xf32>
    %426 = arith.addf %394, %425 : vector<16x16xf32>
    %c0_194 = arith.constant 0 : index
    %c0_195 = arith.constant 0 : index
    %427 = vector.load %arg3[%c0_194, %c0_195] : memref<32x16xf32, #tpu.memory_space<vmem>>, vector<32x16xf32>
    %cst_196 = arith.constant dense<0.000000e+00> : vector<32x16xf32>
    %428 = tpu.matmul %427, %426, %cst_196 {dimension_numbers = #tpu.dot_dimension_numbers<[1], [0], [0], [1], [0, 0, 1, 1], [], []>} : vector<32x16xf32>, vector<16x16xf32>, vector<32x16xf32> -> vector<32x16xf32>
    %c984 = arith.constant 984 : index
    %c0_197 = arith.constant 0 : index
    %429 = vector.load %arg2[%c984, %c0_197] : memref<1208x128xf32, #tpu.memory_space<vmem>>, vector<48x16xf32>
    %c1032 = arith.constant 1032 : index
    %c0_198 = arith.constant 0 : index
    %430 = vector.load %arg2[%c1032, %c0_198] : memref<1208x128xf32, #tpu.memory_space<vmem>>, vector<1x16xf32>
    %431 = vector.extract_strided_slice %428 {offsets = [0, 0], sizes = [16, 16], strides = [1, 1]} : vector<32x16xf32> to vector<16x16xf32>
    %cst_199 = arith.constant 0.000000e+00 : f32
    %432 = vector.broadcast %cst_199 : f32 to vector<1x16xf32>
    %433 = vector.extract_strided_slice %431 {offsets = [0, 0], sizes = [15, 16], strides = [1, 1]} : vector<16x16xf32> to vector<15x16xf32>
    %434 = tpu.concatenate %432, %433 in 0 : vector<1x16xf32>, vector<15x16xf32> -> vector<16x16xf32>
    %435 = vector.extract_strided_slice %431 {offsets = [1, 0], sizes = [15, 16], strides = [1, 1]} : vector<16x16xf32> to vector<15x16xf32>
    %cst_200 = arith.constant 0.000000e+00 : f32
    %436 = vector.broadcast %cst_200 : f32 to vector<1x16xf32>
    %437 = tpu.concatenate %435, %436 in 0 : vector<15x16xf32>, vector<1x16xf32> -> vector<16x16xf32>
    %438 = tpu.concatenate %434, %431, %437 in 1 : vector<16x16xf32>, vector<16x16xf32>, vector<16x16xf32> -> vector<16x48xf32>
    %439 = vector.extract_strided_slice %428 {offsets = [16, 0], sizes = [16, 16], strides = [1, 1]} : vector<32x16xf32> to vector<16x16xf32>
    %cst_201 = arith.constant 0.000000e+00 : f32
    %440 = vector.broadcast %cst_201 : f32 to vector<1x16xf32>
    %441 = vector.extract_strided_slice %439 {offsets = [0, 0], sizes = [15, 16], strides = [1, 1]} : vector<16x16xf32> to vector<15x16xf32>
    %442 = tpu.concatenate %440, %441 in 0 : vector<1x16xf32>, vector<15x16xf32> -> vector<16x16xf32>
    %443 = vector.extract_strided_slice %439 {offsets = [1, 0], sizes = [15, 16], strides = [1, 1]} : vector<16x16xf32> to vector<15x16xf32>
    %cst_202 = arith.constant 0.000000e+00 : f32
    %444 = vector.broadcast %cst_202 : f32 to vector<1x16xf32>
    %445 = tpu.concatenate %443, %444 in 0 : vector<15x16xf32>, vector<1x16xf32> -> vector<16x16xf32>
    %446 = tpu.concatenate %442, %439, %445 in 1 : vector<16x16xf32>, vector<16x16xf32>, vector<16x16xf32> -> vector<16x48xf32>
    %447 = tpu.concatenate %438, %446 in 0 : vector<16x48xf32>, vector<16x48xf32> -> vector<32x48xf32>
    %cst_203 = arith.constant dense<0.000000e+00> : vector<32x16xf32>
    %448 = tpu.matmul %447, %429, %cst_203 {dimension_numbers = #tpu.dot_dimension_numbers<[1], [0], [0], [1], [0, 0, 1, 1], [], []>} : vector<32x48xf32>, vector<48x16xf32>, vector<32x16xf32> -> vector<32x16xf32>
    %449 = vector.broadcast %430 : vector<1x16xf32> to vector<32x16xf32>
    %450 = arith.addf %448, %449 : vector<32x16xf32>
    %c1040 = arith.constant 1040 : index
    %c0_204 = arith.constant 0 : index
    %451 = vector.load %arg2[%c1040, %c0_204] : memref<1208x128xf32, #tpu.memory_space<vmem>>, vector<48x16xf32>
    %c1088 = arith.constant 1088 : index
    %c0_205 = arith.constant 0 : index
    %452 = vector.load %arg2[%c1088, %c0_205] : memref<1208x128xf32, #tpu.memory_space<vmem>>, vector<1x16xf32>
    %453 = vector.extract_strided_slice %450 {offsets = [0, 0], sizes = [16, 16], strides = [1, 1]} : vector<32x16xf32> to vector<16x16xf32>
    %cst_206 = arith.constant 0.000000e+00 : f32
    %454 = vector.broadcast %cst_206 : f32 to vector<1x16xf32>
    %455 = vector.extract_strided_slice %453 {offsets = [0, 0], sizes = [15, 16], strides = [1, 1]} : vector<16x16xf32> to vector<15x16xf32>
    %456 = tpu.concatenate %454, %455 in 0 : vector<1x16xf32>, vector<15x16xf32> -> vector<16x16xf32>
    %457 = vector.extract_strided_slice %453 {offsets = [1, 0], sizes = [15, 16], strides = [1, 1]} : vector<16x16xf32> to vector<15x16xf32>
    %cst_207 = arith.constant 0.000000e+00 : f32
    %458 = vector.broadcast %cst_207 : f32 to vector<1x16xf32>
    %459 = tpu.concatenate %457, %458 in 0 : vector<15x16xf32>, vector<1x16xf32> -> vector<16x16xf32>
    %460 = tpu.concatenate %456, %453, %459 in 1 : vector<16x16xf32>, vector<16x16xf32>, vector<16x16xf32> -> vector<16x48xf32>
    %461 = vector.extract_strided_slice %450 {offsets = [16, 0], sizes = [16, 16], strides = [1, 1]} : vector<32x16xf32> to vector<16x16xf32>
    %cst_208 = arith.constant 0.000000e+00 : f32
    %462 = vector.broadcast %cst_208 : f32 to vector<1x16xf32>
    %463 = vector.extract_strided_slice %461 {offsets = [0, 0], sizes = [15, 16], strides = [1, 1]} : vector<16x16xf32> to vector<15x16xf32>
    %464 = tpu.concatenate %462, %463 in 0 : vector<1x16xf32>, vector<15x16xf32> -> vector<16x16xf32>
    %465 = vector.extract_strided_slice %461 {offsets = [1, 0], sizes = [15, 16], strides = [1, 1]} : vector<16x16xf32> to vector<15x16xf32>
    %cst_209 = arith.constant 0.000000e+00 : f32
    %466 = vector.broadcast %cst_209 : f32 to vector<1x16xf32>
    %467 = tpu.concatenate %465, %466 in 0 : vector<15x16xf32>, vector<1x16xf32> -> vector<16x16xf32>
    %468 = tpu.concatenate %464, %461, %467 in 1 : vector<16x16xf32>, vector<16x16xf32>, vector<16x16xf32> -> vector<16x48xf32>
    %469 = tpu.concatenate %460, %468 in 0 : vector<16x48xf32>, vector<16x48xf32> -> vector<32x48xf32>
    %cst_210 = arith.constant dense<0.000000e+00> : vector<32x16xf32>
    %470 = tpu.matmul %469, %451, %cst_210 {dimension_numbers = #tpu.dot_dimension_numbers<[1], [0], [0], [1], [0, 0, 1, 1], [], []>} : vector<32x48xf32>, vector<48x16xf32>, vector<32x16xf32> -> vector<32x16xf32>
    %471 = vector.broadcast %452 : vector<1x16xf32> to vector<32x16xf32>
    %472 = arith.addf %470, %471 : vector<32x16xf32>
    %cst_211 = arith.constant 0.000000e+00 : f32
    %473 = vector.broadcast %cst_211 : f32 to vector<32x16xf32>
    %474 = arith.maximumf %472, %473 : vector<32x16xf32>
    %c1096 = arith.constant 1096 : index
    %c0_212 = arith.constant 0 : index
    %475 = vector.load %arg2[%c1096, %c0_212] : memref<1208x128xf32, #tpu.memory_space<vmem>>, vector<48x8xf32>
    %c1144 = arith.constant 1144 : index
    %c0_213 = arith.constant 0 : index
    %476 = vector.load %arg2[%c1144, %c0_213] : memref<1208x128xf32, #tpu.memory_space<vmem>>, vector<1x8xf32>
    %477 = vector.extract_strided_slice %474 {offsets = [0, 0], sizes = [16, 16], strides = [1, 1]} : vector<32x16xf32> to vector<16x16xf32>
    %cst_214 = arith.constant 0.000000e+00 : f32
    %478 = vector.broadcast %cst_214 : f32 to vector<1x16xf32>
    %479 = vector.extract_strided_slice %477 {offsets = [0, 0], sizes = [15, 16], strides = [1, 1]} : vector<16x16xf32> to vector<15x16xf32>
    %480 = tpu.concatenate %478, %479 in 0 : vector<1x16xf32>, vector<15x16xf32> -> vector<16x16xf32>
    %481 = vector.extract_strided_slice %477 {offsets = [1, 0], sizes = [15, 16], strides = [1, 1]} : vector<16x16xf32> to vector<15x16xf32>
    %cst_215 = arith.constant 0.000000e+00 : f32
    %482 = vector.broadcast %cst_215 : f32 to vector<1x16xf32>
    %483 = tpu.concatenate %481, %482 in 0 : vector<15x16xf32>, vector<1x16xf32> -> vector<16x16xf32>
    %484 = tpu.concatenate %480, %477, %483 in 1 : vector<16x16xf32>, vector<16x16xf32>, vector<16x16xf32> -> vector<16x48xf32>
    %485 = vector.extract_strided_slice %474 {offsets = [16, 0], sizes = [16, 16], strides = [1, 1]} : vector<32x16xf32> to vector<16x16xf32>
    %cst_216 = arith.constant 0.000000e+00 : f32
    %486 = vector.broadcast %cst_216 : f32 to vector<1x16xf32>
    %487 = vector.extract_strided_slice %485 {offsets = [0, 0], sizes = [15, 16], strides = [1, 1]} : vector<16x16xf32> to vector<15x16xf32>
    %488 = tpu.concatenate %486, %487 in 0 : vector<1x16xf32>, vector<15x16xf32> -> vector<16x16xf32>
    %489 = vector.extract_strided_slice %485 {offsets = [1, 0], sizes = [15, 16], strides = [1, 1]} : vector<16x16xf32> to vector<15x16xf32>
    %cst_217 = arith.constant 0.000000e+00 : f32
    %490 = vector.broadcast %cst_217 : f32 to vector<1x16xf32>
    %491 = tpu.concatenate %489, %490 in 0 : vector<15x16xf32>, vector<1x16xf32> -> vector<16x16xf32>
    %492 = tpu.concatenate %488, %485, %491 in 1 : vector<16x16xf32>, vector<16x16xf32>, vector<16x16xf32> -> vector<16x48xf32>
    %493 = tpu.concatenate %484, %492 in 0 : vector<16x48xf32>, vector<16x48xf32> -> vector<32x48xf32>
    %cst_218 = arith.constant dense<0.000000e+00> : vector<32x8xf32>
    %494 = tpu.matmul %493, %475, %cst_218 {dimension_numbers = #tpu.dot_dimension_numbers<[1], [0], [0], [1], [0, 0, 1, 1], [], []>} : vector<32x48xf32>, vector<48x8xf32>, vector<32x8xf32> -> vector<32x8xf32>
    %495 = vector.broadcast %476 : vector<1x8xf32> to vector<32x8xf32>
    %496 = arith.addf %494, %495 : vector<32x8xf32>
    %c0_219 = arith.constant 0 : index
    %c0_220 = arith.constant 0 : index
    %497 = vector.load %arg4[%c0_219, %c0_220] : memref<32x8xf32, #tpu.memory_space<vmem>>, vector<32x8xf32>
    tpu.vector_store %arg4[%c0_219, %c0_220], %496 {strides = array<i32>} : memref<32x8xf32, #tpu.memory_space<vmem>>, vector<32x8xf32>,
    return
  }
  func.func @transform_0(%arg0: i32) -> (i32, i32) {
    %c0_i32 = arith.constant 0 : i32
    %c0_i32_0 = arith.constant 0 : i32
    return %arg0, %c0_i32 : i32, i32
  }
  func.func @transform_1(%arg0: i32) -> (i32, i32) {
    %c0_i32 = arith.constant 0 : i32
    %c0_i32_0 = arith.constant 0 : i32
    %c0_i32_1 = arith.constant 0 : i32
    return %c0_i32, %c0_i32_0 : i32, i32
  }
  func.func @transform_2(%arg0: i32) -> (i32, i32) {
    %c0_i32 = arith.constant 0 : i32
    %c0_i32_0 = arith.constant 0 : i32
    %c0_i32_1 = arith.constant 0 : i32
    return %c0_i32, %c0_i32_0 : i32, i32
  }
  func.func @transform_3(%arg0: i32) -> (i32, i32) {
    %c0_i32 = arith.constant 0 : i32
    %c0_i32_0 = arith.constant 0 : i32
    return %arg0, %c0_i32 : i32, i32
  }
  func.func @transform_4(%arg0: i32) -> (i32, i32) {
    %c0_i32 = arith.constant 0 : i32
    %c0_i32_0 = arith.constant 0 : i32
    return %arg0, %c0_i32 : i32, i32
  }
  func.func @transform_5(%arg0: i32) -> (i32, i32) {
    %c0_i32 = arith.constant 0 : i32
    %c0_i32_0 = arith.constant 0 : i32
    return %arg0, %c0_i32 : i32, i32
  }
}

</mosaic_0001>

<bundles_post_ra>
// kernel: tpu_custom_call.1
= control target key start
LH: loop header
LB: loop body
LE: loop exit
PB: predicated region body
PF: predicated region fallthrough
CT: control target
= control target key end

     0   :  { %11 = vsyncpa [#allocation4], 0  ;;  %s3011_s0 = inlined_call_operand.vmem [shape: f32[64,8], index: 0, kind: input, shape index: {}]   ;;  %s3012_s1 = inlined_call_operand.hbm [shape: f32[1208,128], index: 1, kind: input, shape index: {}]   ;;  %s3013_s2 = inlined_call_operand.vmem [shape: f32[32,16], index: 2, kind: input, shape index: {}]   ;;  %s3014_s3 = inlined_call_operand.vmem [shape: f32[64,8], index: 3, kind: output, shape index: {0}]   ;;  %s3015_s4 = inlined_call_operand.vmem [shape: s32[16,1], index: 4, kind: output, shape index: {1}]   ;;  %s3016_s5 = inlined_call_operand.hbm [shape: f32[16,16], index: 5, kind: output, shape index: {2}]  }
   0x1   :  { %12 = vsyncpa [#allocation5], 0 }
   0x2   :  { %14 = vsyncpa [#allocation5 + $0x1], 0  ;;  %s2531_s18 = smov 0   ;;  %s2533_s19 = smov 0  }
   0x3   :  { %s2535_s20 = smov 0   ;;  %s2537_s21 = smov 0  }
   0x4 LB: > { %s2552_s22 = sadd.s32 4294967295, %s2491_s21   ;;  %s2240_s23 = sadd.s32 4294967294, %s2491_s21   ;;  %s2491_s21 = sphi %s2537_s21, %s3022_s21   ;;  %s2487_s20 = sphi %s2535_s20, %s3021_s20   ;;  %s2483_s19 = sphi %s2533_s19, %s3020_s19   ;;  %s2479_s18 = sphi %s2531_s18, %s3019_s18  }
   0x5   : > { %s2556_s24 = sadd.s32 1, %s2491_s21   ;;  %s147_s25 = sadd.s32 1, %s2487_s20 }
   0x6   : > { %s144_s26 = ssub.s32 %s2491_s21, %s2556_s24  ;;  %p157_p0 = scmp.ne.s32.totalorder %s2487_s20, %s2483_s19 }
   0x7   : > { %p145_p1 = scmp.eq.s32.totalorder %s144_s26, 0  ;;  %p158_p2 = scmp.eq.s32.totalorder %s2552_s22, 1 }
   0x8   : > { %p163_p3 = scmp.ne.s32.totalorder %s2483_s19, %s2479_s18  ;;  %p164_p4 = scmp.eq.s32.totalorder %s2240_s23, 1 }
   0x9   : > { %s2567_s27 = scalar_select %p145_p1, %s2487_s20, %s147_s25  }
   0xa   : > { %p2569_p5 = por %p158_p2, %p157_p0  ;;  %p2573_p6 = por %p164_p4, %p163_p3 }
   0xb   : > { %p2241_p7 = scmp.ge.s32.totalorder %s2491_s21, 1  ;;  %p171_p8 = scmp.lt.s32.totalorder %s2491_s21, 3 }
   0xc   : > { %p2326_p9 = scmp.eq.s32.totalorder %s2552_s22, 0  ;;  %s182_s7 = sshll.u32 %s3012_s1, 4  ;;  %s183_s7 = int_to_ptr.hbm [resolvable:$true] %s182_s7 }
   0xd   : > { %p172_p10 = pnand %p2241_p7, %p171_p8  ;;  %s2493_s8 = smov [#allocation3]  }
   0xe   : > { %s184_s9 = sshll.u32 %s2493_s8, 4  ;;  %s2494_s10 = smov 128   ;;  %s185_s9 = int_to_ptr.vmem [resolvable:$true] %s184_s9 }
   0xf   : > { %p2318_p11 = pneg %p172_p10  ;;  %s2495_s11 = smov 8  }
  0x10   : > { %212 = sbr.rel (%p172_p10) target bundleno = 6414 (0x190e), region = 32 }
  0x11   : > { %p2319_p12 = pnand %p2326_p9, %p2318_p11 }
  0x13   : > { %2321 = dma.hbm_to_vmem [thread:$0]  (!%p2319_p12), %s183_s7, 19328, %s185_s9, [#allocation4], %s2494_s10, %s2494_s10, %s2495_s11  }
  0x15   : > { %2470 = dma.done.wait (%p2326_p9), [#allocation4], 19328  }
  0x16   : > { %2472 = vsyncadd (%p2326_p9), [#allocation4], 4294947968  ;;  %s2247_s12 = sshll.u32 %s2552_s22, 2  ;;  %s2496_s17 = smov 8   ;;  %vm283_vm0 = vcmask 1046528   ;;  %vm276_vm1 = vcmask 1040384  }
  0x17   : > { %p251_p13 = scmp.lt.s32.totalorder %s2247_s12, 7  ;;  %s2497_s23 = smov 16   ;;  %v272_v15 = vld [vmem:[#allocation3 + $0x10] sm:$0xff]  ;;  %v271_v16 = vld [vmem:[#allocation3 + $0x8] sm:$0xff]  ;;  %v270_v17 = vld [vmem:[#allocation3] sm:$0xff]  ;;  %vm302_vm2 = vcmask 64512  }
  0x18   : > { %365 = vmatpush.msra.mxu0 %v272_v15  ;;  %vm305_vm3 = vcmask 130048   ;;  %vm339_vm4 = vcmask 195584   ;;  %vm394_vm5 = vcmask 122880   ;;  %v2498_v39 = vmov 0.0   ;;  %v2369_v40 = vld [vmem:[#allocation3 + $0x18] ss:$0 sm:$0xff] }
  0x19   : > { %s3024_s12 = smov (!%p251_p13, %s2247_s12), 7  ;;  %396 = vst.msk [vmem:[#allocation2 + $0x11] sm:$0x1] %vm394_vm5, %v2498_v39  ;;  %s2499_s25 = smov 48   ;;  %v392_v60 = vld [vmem:[#allocation3 + $0x58] sm:$0xff]  ;;  %v391_v61 = vld [vmem:[#allocation3 + $0x50] sm:$0xff] }
  0x1a   : > { %s2248_s13 = sshll.u32 %s3024_s12, 3  ;;  %366 = vmatpush.msra.mxu0 %v271_v16  ;;  %395 = vst.msk [vmem:[#allocation2] sm:$0x1] %vm394_vm5, %v2498_v39  ;;  %s2500_s26 = smov 32   ;;  %466 = vmatpush.msra.mxu1 %v392_v60  ;;  %v390_v62 = vld [vmem:[#allocation3 + $0x48] sm:$0xff]  ;;  %v389_v63 = vld [vmem:[#allocation3 + $0x40] sm:$0xff] }
  0x1b   : > { %s254_s16 = scalar_lea.vmem %s3011_s0, %s2248_s13  ;;  %399 = vst.msk [vmem:[#allocation2 + $0x12] sm:$0x1] %vm394_vm5, %v2498_v39  ;;  %vm423_vm6 = vcmask 261120   ;;  %vm425_vm7 = vcmask 392192   ;;  %vm451_vm8 = vcmask 523264   ;;  %vm605_vm9 = vcmask 1044480  }
  0x1c   : > { %v266_v0 = vld [vmem:[%s254_s16] sm:$0xff]  ;;  %v267_v1 = vld [vmem:[%s254_s16 + $0x8] sm:$0xff]  ;;  %v269_v3 = vld [vmem:[%s254_s16 + $0x18] sm:$0xff]  ;;  %367 = vmatpush.msra.mxu0 %v270_v17  ;;  %400 = vst.msk [vmem:[#allocation2 + $0x23] sm:$0x1] %vm394_vm5, %v2498_v39  ;;  %467 = vmatpush.msra.mxu1 %v391_v61  ;;  %vm601_vm10 = vcmask 1042432  }
  0x1d   : > { %289 = vrot.lane.b32.xlu0 %v266_v0, %s2496_s17  ;;  %291 = vrot.lane.b32.xlu1 %v267_v1, %s2496_s17  ;;  %v285_v2 = vrot.slane %v267_v1, 1  ;;  %v268_v4 = vld [vmem:[%s254_s16 + $0x10] sm:$0xff]  ;;  %v284_v5 = vrot.slane %v266_v0, 1  ;;  %v317_v8 = vrot.slane %v269_v3, 1  ;;  %v278_v12 = vrot.slane %v267_v1, 7  ;;  %v387_v1 = vld [vmem:[#allocation3 + $0x30] sm:$0xff] }
  0x1e   : > { %321 = vrot.lane.b32.xlu2 %v268_v4, %s2496_s17  ;;  %v316_v6 = vrot.slane %v268_v4, 1  ;;  %v277_v13 = vrot.slane %v266_v0, 7  ;;  %v311_v18 = vrot.slane %v269_v3, 7  ;;  %v310_v19 = vrot.slane %v268_v4, 7  ;;  %468 = vmatpush.msra.mxu1 %v390_v62  ;;  %v388_v0 = vld [vmem:[#allocation3 + $0x38] sm:$0xff]  ;;  %p262_p0 = scmp.lt.s32.totalorder %s2552_s22, 1 }
  0x1f   : > { %v288_v7 = vsel %vm283_vm0, %v285_v2, 0.0  ;;  %v286_v9 = vsel %vm283_vm0, %v284_v5, %v285_v2  ;;  %v320_v11 = vsel %vm283_vm0, %v317_v8, 0.0  ;;  %v386_v2 = vld [vmem:[#allocation3 + $0x28] sm:$0xff]  ;;  %v2370_v17 = vld [vmem:[#allocation3 + $0x60] ss:$0 sm:$0xff]  ;;  %vm759_vm11 = vcmask 1043456  }
  0x20   : > { %v318_v10 = vsel %vm283_vm0, %v316_v6, %v317_v8  ;;  %v279_v14 = vsel %vm276_vm1, %v277_v13, %v278_v12  ;;  %v312_v20 = vsel %vm276_vm1, %v310_v19, %v311_v18  ;;  %v282_v23 = vsel %vm276_vm1, 0.0, %v277_v13  ;;  %469 = vmatpush.msra.mxu1 %v389_v63  ;;  %s263_s30 = scalar_select %p262_p0, %s2552_s22, 1 }
  0x21   : > { %v315_v31 = vsel %vm276_vm1, 0.0, %v310_v19  ;;  %vm1128_vm14 = vcmask 7168   ;;  %s247_s10 = sand.u32 1, %s2483_s19   ;;  %s2445_s8 = scalar_lea.hbm %s3016_s5, 16 }
  0x22   : > { %470 = vmatpush.msra.mxu1 %v388_v0  ;;  %s2251_s6 = sshll.u32 %s263_s30, 3  ;;  %s2761_s11 = sshll.u32 %s247_s10, 3 }
  0x23   : > { %s265_s9 = scalar_lea.vmem %s3015_s4, %s2251_s6  ;;  %s249_s14 = scalar_lea.vmem [#allocation6], %s2761_s11 }
  0x24   : > { %471 = vmatpush.msra.mxu1 %v387_v1  ;;  %s2117_s16 = sshll.u32 %s249_s14, 4  ;;  %s2118_s16 = int_to_ptr.vmem [resolvable:$true] %s2117_s16 }
  0x25   : > { %296 = vrot.lane.b32.xlu0 %v286_v9, %s2497_s23  ;;  %298 = vrot.lane.b32.xlu1 %v288_v7, %s2497_s23 }
  0x26   : > { %328 = vrot.lane.b32.xlu2 %v318_v10, %s2497_s23  ;;  %472 = vmatpush.msra.mxu1 %v386_v2 }
  0x2d   : > { %323 = vrot.lane.b32.xlu0 %v269_v3, %s2496_s17  ;;  %330 = vrot.lane.b32.xlu1 %v320_v11, %s2497_s23  ;;  %v385_v3 = vld [vmem:[#allocation3 + $0x20] sm:$0xff] }
  0x2e   : > { %473 = vmatpush.msra.mxu1 %v385_v3 }
  0x78   : > { %v322_v27 = vpop.permute.xlu2 %321 }
  0x79   : > { %v334_v32 = vsel %vm302_vm2, %v315_v31, %v322_v27  ;;  %v485_v31 = vld [vmem:[#allocation3 + $0x78] sm:$0xff] }
  0x80   : > { %v329_v33 = vpop.permute.xlu2 %328 }
  0x81   : > { %v336_v34 = vsel %vm305_vm3, %v334_v32, %v329_v33  ;;  %v484_v32 = vld [vmem:[#allocation3 + $0x70] sm:$0xff]  ;;  %v483_v33 = vld [vmem:[#allocation3 + $0x68] sm:$0xff] }
  0x8f   : > { %v290_v21 = vpop.permute.xlu0 %289  ;;  %v292_v22 = vpop.permute.xlu1 %291 }
  0x90   : > { %v303_v24 = vsel %vm302_vm2, %v282_v23, %v290_v21  ;;  %v304_v28 = vsel %vm302_vm2, %v279_v14, %v292_v22 }
  0x97   : > { %v297_v25 = vpop.permute.xlu0 %296  ;;  %v299_v29 = vpop.permute.xlu1 %298 }
  0x98   : > { %v306_v26 = vsel %vm305_vm3, %v303_v24, %v297_v25  ;;  %v307_v30 = vsel %vm305_vm3, %v304_v28, %v299_v29  ;;  %v488_v28 = vld [vmem:[#allocation3 + $0x90] sm:$0xff]  ;;  %v487_v29 = vld [vmem:[#allocation3 + $0x88] sm:$0xff] }
  0x99   : > { %2252 = vmatmul.msk.f32.vlgmr.msra.gmra.mxu0 %vm339_vm4, %v306_v26  ;;  %539 = vmatpush.msra.mxu2 %v488_v28 }
  0x9b   : > { %540 = vmatpush.msra.mxu2 %v487_v29 }
  0x9f   : > { %v324_v35 = vpop.permute.xlu0 %323  ;;  %v331_v37 = vpop.permute.xlu1 %330 }
  0xa0   : > { %v335_v36 = vsel %vm302_vm2, %v312_v20, %v324_v35 }
  0xa1   : > { %2253 = vmatmul.msk.f32.gmra.mxu0 %vm339_vm4, %v307_v30  ;;  %v337_v38 = vsel %vm305_vm3, %v335_v36, %v331_v37  ;;  %v486_v30 = vld [vmem:[#allocation3 + $0x80] sm:$0xff] }
  0xa2   : > { %541 = vmatpush.msra.mxu2 %v486_v30 }
  0xa4   : > { %542 = vmatpush.msra.mxu2 %v485_v31 }
  0xa6   : > { %543 = vmatpush.msra.mxu2 %v484_v32  ;;  %v2374_v32 = vld [vmem:[#allocation3 + $0x100] ss:$0 sm:$0xff] }
  0xa8   : > { %544 = vmatpush.msra.mxu2 %v483_v33 }
  0xa9   : > { %2254 = vmatmul.msk.f32.gmra.mxu0 %vm339_vm4, %v336_v34 }
  0xb1   : > { %2255 = vmatmul.msk.f32.gmra.mxu0 %vm339_vm4, %v337_v38 }
 0x116   : > { %v369_v41 = vpop.f32.mrf.mxu0 }
 0x117   : > { %v370_v42 = vadd.f32 %v2369_v40, %v369_v41 }
 0x119   : > { %v381_v43 = vmax.f32 %v370_v42, 0.0 }
 0x11b   : > { %397 = vst.msk [vmem:[#allocation2 + $0x1] sm:$0xff] %vm305_vm3, %v381_v43 }
 0x11e   : > { %v372_v44 = vpop.f32.mrf.mxu0 }
 0x11f   : > { %v373_v45 = vadd.f32 %v2369_v40, %v372_v44 }
 0x121   : > { %v382_v46 = vmax.f32 %v373_v45, 0.0 }
 0x123   : > { %398 = vst.msk [vmem:[#allocation2 + $0x9] sm:$0xff] %vm305_vm3, %v382_v46 }
 0x126   : > { %v375_v47 = vpop.f32.mrf.mxu0 }
 0x127   : > { %v376_v48 = vadd.f32 %v2369_v40, %v375_v47  ;;  %v555_v47 = vld [vmem:[#allocation3 + $0xa8] sm:$0xff] }
 0x128   : > { %578 = vmatpush.msra.mxu3 %v555_v47  ;;  %v705_v47 = vld [vmem:[#allocation3 + $0x138] sm:$0xff] }
 0x129   : > { %v383_v49 = vmax.f32 %v376_v48, 0.0  ;;  %v554_v48 = vld [vmem:[#allocation3 + $0xa0] sm:$0xff] }
 0x12a   : > { %v409_v50 = vld [vmem:[#allocation2 + $0x3] ss:$2 sm:$0xff]  ;;  %v407_v51 = vld [vmem:[#allocation2 + $0x2] ss:$2 sm:$0xff]  ;;  %579 = vmatpush.msra.mxu3 %v554_v48  ;;  %v704_v48 = vld [vmem:[#allocation3 + $0x130] sm:$0xff] }
 0x12b   : > { %v405_v52 = vld [vmem:[#allocation2 + $0x1] ss:$2 sm:$0xff]  ;;  %401 = vst.msk [vmem:[#allocation2 + $0x13] sm:$0xff] %vm305_vm3, %v383_v49  ;;  %419 = vrot.lane.b32.xlu1 %v409_v50, %s2499_s25  ;;  %415 = vrot.lane.b32.xlu0 %v407_v51, %s2500_s26  ;;  %v403_v53 = vld [vmem:[#allocation2] ss:$2 sm:$0xff] }
 0x12c   : > { %411 = vrot.lane.b32.xlu2 %v405_v52, %s2497_s23  ;;  %709 = vst.msk [vmem:[#allocation2 + $0x9] sm:$0x1] %vm394_vm5, %v2498_v39  ;;  %v2371_v49 = vld [vmem:[#allocation3 + $0x98] ss:$0 sm:$0xff] }
 0x12d   : > { %708 = vst.msk [vmem:[#allocation2] sm:$0x1] %vm394_vm5, %v2498_v39 }
 0x12e   : > { %v378_v54 = vpop.f32.mrf.mxu0  ;;  %711 = vst.msk [vmem:[#allocation2 + $0xa] sm:$0x1] %vm394_vm5, %v2498_v39 }
 0x12f   : > { %v379_v55 = vadd.f32 %v2369_v40, %v378_v54 }
 0x131   : > { %v384_v56 = vmax.f32 %v379_v55, 0.0 }
 0x133   : > { %402 = vst.msk [vmem:[#allocation2 + $0x1b] sm:$0xff] %vm305_vm3, %v384_v56  ;;  %v2372_v56 = vld [vmem:[#allocation3 + $0xb0] ss:$0 sm:$0xff] }
 0x13a   : > { %v434_v57 = vld [vmem:[#allocation2 + $0x15] ss:$2 sm:$0xff]  ;;  %v432_v58 = vld [vmem:[#allocation2 + $0x14] ss:$2 sm:$0xff] }
 0x13b   : > { %v430_v59 = vld [vmem:[#allocation2 + $0x13] ss:$2 sm:$0xff]  ;;  %444 = vrot.lane.b32.xlu1 %v434_v57, %s2499_s25  ;;  %440 = vrot.lane.b32.xlu0 %v432_v58, %s2500_s26  ;;  %v428_v11 = vld [vmem:[#allocation2 + $0x12] ss:$2 sm:$0xff] }
 0x13c   : > { %712 = vst.msk [vmem:[#allocation2 + $0x13] sm:$0x1] %vm394_vm5, %v2498_v39  ;;  %436 = vrot.lane.b32.xlu2 %v430_v59, %s2497_s23 }
 0x186   : > { %v412_v4 = vpop.permute.xlu2 %411 }
 0x187   : > { %v422_v5 = vsel %vm305_vm3, %v403_v53, %v412_v4 }
 0x196   : > { %v437_v10 = vpop.permute.xlu2 %436 }
 0x197   : > { %v447_v12 = vsel %vm305_vm3, %v428_v11, %v437_v10  ;;  %v591_v10 = vld [vmem:[#allocation3 + $0xb8] sm:$0xff] }
 0x19d   : > { %v420_v6 = vpop.permute.xlu1 %419  ;;  %v416_v7 = vpop.permute.xlu0 %415 }
 0x19e   : > { %v424_v8 = vsel %vm423_vm6, %v422_v5, %v416_v7  ;;  %v596_v5 = vld [vmem:[#allocation3 + $0xe0] sm:$0xff]  ;;  %v594_v7 = vld [vmem:[#allocation3 + $0xd0] sm:$0xff] }
 0x19f   : > { %v426_v9 = vsel %vm425_vm7, %v424_v8, %v420_v6  ;;  %v595_v6 = vld [vmem:[#allocation3 + $0xd8] sm:$0xff]  ;;  %649 = vmatpush.msrb.mxu3 %v596_v5  ;;  %v593_v8 = vld [vmem:[#allocation3 + $0xc8] sm:$0xff] }
 0x1a0   : > { %2256 = vmatmul.msk.f32.vlgmr.msra.gmra.mxu1 %vm451_vm8, %v426_v9  ;;  %v592_v9 = vld [vmem:[#allocation3 + $0xc0] sm:$0xff] }
 0x1a1   : > { %650 = vmatpush.msrb.mxu3 %v595_v6  ;;  %v2375_v6 = vld [vmem:[#allocation3 + $0x148] ss:$0 sm:$0xff] }
 0x1a3   : > { %651 = vmatpush.msrb.mxu3 %v594_v7 }
 0x1a5   : > { %652 = vmatpush.msrb.mxu3 %v593_v8 }
 0x1a7   : > { %653 = vmatpush.msrb.mxu3 %v592_v9 }
 0x1a9   : > { %654 = vmatpush.msrb.mxu3 %v591_v10 }
 0x1ad   : > { %v445_v13 = vpop.permute.xlu1 %444  ;;  %v441_v14 = vpop.permute.xlu0 %440 }
 0x1ae   : > { %v448_v15 = vsel %vm423_vm6, %v447_v12, %v441_v14 }
 0x1af   : > { %v449_v16 = vsel %vm425_vm7, %v448_v15, %v445_v13 }
 0x1b0   : > { %2257 = vmatmul.msk.f32.gmra.mxu1 %vm451_vm8, %v449_v16 }
 0x21d   : > { %v475_v18 = vpop.f32.mrf.mxu1 }
 0x21e   : > { %v476_v19 = vadd.f32 %v2370_v17, %v475_v18 }
 0x220   : > { %v481_v20 = vmax.f32 %v476_v19, 0.0 }
 0x222   : > { %497 = vrot.lane.b32.xlu2 %v481_v20, %s2497_s23  ;;  %v494_v21 = vrot.slane %v481_v20, 1  ;;  %v491_v34 = vrot.slane %v481_v20, 7 }
 0x224   : > { %v496_v22 = vsel %vm283_vm0, %v494_v21, 0.0  ;;  %v493_v36 = vsel %vm276_vm1, 0.0, %v491_v34 }
 0x225   : > { %501 = vrot.lane.b32.xlu0 %v496_v22, %s2500_s26 }
 0x22d   : > { %v478_v23 = vpop.f32.mrf.mxu1 }
 0x22e   : > { %v479_v24 = vadd.f32 %v2370_v17, %v478_v23  ;;  %v665_v23 = vld [vmem:[#allocation3 + $0xf8] sm:$0xff] }
 0x22f   : > { %688 = vmatpush.msrb.mxu2 %v665_v23 }
 0x230   : > { %v482_v25 = vmax.f32 %v479_v24, 0.0 }
 0x232   : > { %513 = vrot.lane.b32.xlu1 %v482_v25, %s2497_s23  ;;  %v510_v26 = vrot.slane %v482_v25, 1  ;;  %v507_v41 = vrot.slane %v482_v25, 7  ;;  %v2373_v25 = vld [vmem:[#allocation3 + $0xe8] ss:$0 sm:$0xff] }
 0x234   : > { %v512_v27 = vsel %vm283_vm0, %v510_v26, 0.0  ;;  %v509_v43 = vsel %vm276_vm1, 0.0, %v507_v41 }
 0x235   : > { %517 = vrot.lane.b32.xlu2 %v512_v27, %s2500_s26 }
 0x27c   : > { %v498_v35 = vpop.permute.xlu2 %497 }
 0x27d   : > { %v504_v37 = vsel %vm305_vm3, %v493_v36, %v498_v35 }
 0x28f   : > { %v518_v44 = vpop.permute.xlu2 %517 }
 0x297   : > { %v502_v38 = vpop.permute.xlu0 %501 }
 0x298   : > { %v505_v40 = vsel %vm423_vm6, %v504_v37, %v502_v38 }
 0x299   : > { %2258 = vmatmul.msk.f32.vlgmr.msra.gmra.mxu2 %vm425_vm7, %v505_v40 }
 0x2a4   : > { %v514_v42 = vpop.permute.xlu1 %513 }
 0x2a5   : > { %v520_v45 = vsel %vm305_vm3, %v509_v43, %v514_v42 }
 0x2a6   : > { %v521_v46 = vsel %vm423_vm6, %v520_v45, %v518_v44 }
 0x2a7   : > { %2259 = vmatmul.msk.f32.gmra.mxu2 %vm425_vm7, %v521_v46  ;;  %v706_v46 = vld [vmem:[#allocation3 + $0x140] sm:$0xff] }
 0x2a8   : > { %773 = vmatpush.msrb.mxu1 %v706_v46 }
 0x2aa   : > { %774 = vmatpush.msrb.mxu1 %v705_v47 }
 0x2ac   : > { %775 = vmatpush.msrb.mxu1 %v704_v48 }
 0x31c   : > { %v546_v50 = vpop.f32.mrf.mxu2 }
 0x31d   : > { %v547_v51 = vadd.f32 %v2371_v49, %v546_v50  ;;  %v702_v50 = vld [vmem:[#allocation3 + $0x120] sm:$0xff] }
 0x31f   : > { %v552_v52 = vmax.f32 %v547_v51, 0.0  ;;  %v701_v51 = vld [vmem:[#allocation3 + $0x118] sm:$0xff] }
 0x321   : > { %2260 = vmatmul.msk.f32.vlgmr.msra.gmra.mxu3 %vm305_vm3, %v552_v52  ;;  %v700_v52 = vld [vmem:[#allocation3 + $0x110] sm:$0xff] }
 0x32a   : > { %v549_v53 = vpop.f32.mrf.mxu2 }
 0x32b   : > { %v550_v54 = vadd.f32 %v2371_v49, %v549_v53  ;;  %v703_v49 = vld [vmem:[#allocation3 + $0x128] sm:$0xff] }
 0x32c   : > { %776 = vmatpush.msrb.mxu1 %v703_v49  ;;  %v699_v53 = vld [vmem:[#allocation3 + $0x108] sm:$0xff] }
 0x32d   : > { %v553_v55 = vmax.f32 %v550_v54, 0.0 }
 0x32e   : > { %777 = vmatpush.msrb.mxu1 %v702_v50 }
 0x32f   : > { %2261 = vmatmul.msk.f32.gmra.mxu3 %vm305_vm3, %v553_v55 }
 0x330   : > { %778 = vmatpush.msrb.mxu1 %v701_v51 }
 0x332   : > { %779 = vmatpush.msrb.mxu1 %v700_v52  ;;  %v888_v52 = vld [vmem:[#allocation3 + $0x1c8] sm:$0xff] }
 0x334   : > { %780 = vmatpush.msrb.mxu1 %v699_v53  ;;  %v887_v53 = vld [vmem:[#allocation3 + $0x1c0] sm:$0xff] }
 0x336   : > { %940 = vmatpush.msra.mxu1 %v888_v52 }
 0x338   : > { %941 = vmatpush.msra.mxu1 %v887_v53 }
 0x3a4   : > { %v581_v57 = vpop.f32.mrf.mxu3 }
 0x3a5   : > { %v582_v58 = vadd.f32 %v2372_v56, %v581_v57 }
 0x3a7   : > { %v587_v59 = vadd.f32 %v582_v58, %v476_v19 }
 0x3a9   : > { %v589_v60 = vmax.f32 %v587_v59, 0.0 }
 0x3ab   : > { %607 = vrot.lane.b32.xlu0 %v589_v60, %s2497_s23  ;;  %v603_v61 = vrot.slane %v589_v60, 3  ;;  %v599_v11 = vrot.slane %v589_v60, 5 }
 0x3ad   : > { %v606_v62 = vsel %vm605_vm9, %v603_v61, 0.0  ;;  %v602_v13 = vsel %vm601_vm10, 0.0, %v599_v11 }
 0x3ae   : > { %611 = vrot.lane.b32.xlu1 %v606_v62, %s2500_s26 }
 0x3b2   : > { %v584_v63 = vpop.f32.mrf.mxu3 }
 0x3b3   : > { %v585_v0 = vadd.f32 %v2372_v56, %v584_v63 }
 0x3b5   : > { %v588_v1 = vadd.f32 %v585_v0, %v479_v24  ;;  %v664_v24 = vld [vmem:[#allocation3 + $0xf0] sm:$0xff] }
 0x3b6   : > { %689 = vmatpush.msrb.mxu2 %v664_v24 }
 0x3b7   : > { %v590_v2 = vmax.f32 %v588_v1, 0.0 }
 0x3b9   : > { %623 = vrot.lane.b32.xlu2 %v590_v2, %s2497_s23  ;;  %v620_v3 = vrot.slane %v590_v2, 3  ;;  %v617_v17 = vrot.slane %v590_v2, 5 }
 0x3bb   : > { %v622_v4 = vsel %vm605_vm9, %v620_v3, 0.0  ;;  %v619_v19 = vsel %vm601_vm10, 0.0, %v617_v17  ;;  %v789_v17 = vld [vmem:[#allocation3 + $0x168] sm:$0xff] }
 0x3bc   : > { %627 = vrot.lane.b32.xlu0 %v622_v4, %s2500_s26 }
 0x413   : > { %v624_v18 = vpop.permute.xlu2 %623 }
 0x414   : > { %v630_v20 = vsel %vm305_vm3, %v619_v19, %v624_v18  ;;  %v788_v18 = vld [vmem:[#allocation3 + $0x160] sm:$0xff]  ;;  %v787_v19 = vld [vmem:[#allocation3 + $0x158] sm:$0xff] }
 0x41d   : > { %v608_v12 = vpop.permute.xlu0 %607 }
 0x41e   : > { %v614_v14 = vsel %vm305_vm3, %v602_v13, %v608_v12 }
 0x420   : > { %v612_v15 = vpop.permute.xlu1 %611 }
 0x421   : > { %v615_v16 = vsel %vm423_vm6, %v614_v14, %v612_v15  ;;  %v791_v15 = vld [vmem:[#allocation3 + $0x178] sm:$0xff] }
 0x422   : > { %2262 = vmatmul.msk.f32.vlgmr.msrb.gmra.mxu3 %vm425_vm7, %v615_v16  ;;  %v790_v16 = vld [vmem:[#allocation3 + $0x170] sm:$0xff] }
 0x423   : > { %843 = vmatpush.msra.mxu3 %v791_v15 }
 0x425   : > { %844 = vmatpush.msra.mxu3 %v790_v16 }
 0x427   : > { %845 = vmatpush.msra.mxu3 %v789_v17 }
 0x429   : > { %846 = vmatpush.msra.mxu3 %v788_v18 }
 0x42b   : > { %847 = vmatpush.msra.mxu3 %v787_v19 }
 0x42e   : > { %v628_v21 = vpop.permute.xlu0 %627 }
 0x42f   : > { %v631_v22 = vsel %vm423_vm6, %v630_v20, %v628_v21  ;;  %v786_v20 = vld [vmem:[#allocation3 + $0x150] sm:$0xff] }
 0x430   : > { %2263 = vmatmul.msk.f32.gmra.mxu3 %vm425_vm7, %v631_v22 }
 0x431   : > { %848 = vmatpush.msra.mxu3 %v786_v20 }
 0x4a5   : > { %v656_v26 = vpop.f32.mrf.mxu3 }
 0x4a6   : > { %v657_v27 = vadd.f32 %v2373_v25, %v656_v26 }
 0x4a8   : > { %v662_v28 = vmax.f32 %v657_v27, 0.0 }
 0x4aa   : > { %2264 = vmatmul.msk.f32.vlgmr.msrb.gmra.mxu2 %vm305_vm3, %v662_v28 }
 0x4b3   : > { %v659_v29 = vpop.f32.mrf.mxu3 }
 0x4b4   : > { %v660_v30 = vadd.f32 %v2373_v25, %v659_v29 }
 0x4b6   : > { %v663_v31 = vmax.f32 %v660_v30, 0.0 }
 0x4b8   : > { %2265 = vmatmul.msk.f32.gmra.mxu2 %vm305_vm3, %v663_v31 }
 0x52d   : > { %v691_v33 = vpop.f32.mrf.mxu2 }
 0x52e   : > { %v692_v34 = vadd.f32 %v2374_v32, %v691_v33 }
 0x530   : > { %v697_v35 = vadd.f32 %v692_v34, %v587_v59 }
 0x532   : > { %710 = vst.msk [vmem:[#allocation2 + $0x1] sm:$0xff] %vm305_vm3, %v697_v35  ;;  %v855_v35 = vld [vmem:[#allocation3 + $0x190] sm:$0xff] }
 0x533   : > { %875 = vmatpush.msra.mxu2 %v855_v35 }
 0x539   : > { %v715_v36 = vld [vmem:[#allocation2 + $0x1] ss:$2 sm:$0xf]  ;;  %v716_v45 = vld [vmem:[#allocation2 + $0x2] ss:$2 sm:$0xf] }
 0x53a   : > { %719 = vrot.lane.b32.xlu0 %v715_v36, %s2497_s23  ;;  %v717_v41 = vld [vmem:[#allocation2 + $0x3] ss:$2 sm:$0xf]  ;;  %v714_v59 = vld [vmem:[#allocation2] ss:$2 sm:$0xf] }
 0x53b   : > { %v694_v37 = vpop.f32.mrf.mxu2  ;;  %v854_v36 = vld [vmem:[#allocation3 + $0x188] sm:$0xff] }
 0x53c   : > { %v695_v38 = vadd.f32 %v2374_v32, %v694_v37  ;;  %876 = vmatpush.msra.mxu2 %v854_v36  ;;  %v2376_v37 = vld [vmem:[#allocation3 + $0x180] ss:$0 sm:$0xff] }
 0x53e   : > { %v698_v40 = vadd.f32 %v695_v38, %v588_v1 }
 0x540   : > { %713 = vst.msk [vmem:[#allocation2 + $0xb] sm:$0xff] %vm305_vm3, %v698_v40 }
 0x542   : > { %727 = vrot.lane.b32.xlu0 %v717_v41, %s2499_s25 }
 0x547   : > { %v738_v42 = vld [vmem:[#allocation2 + $0xc] ss:$2 sm:$0xf]  ;;  %v736_v43 = vld [vmem:[#allocation2 + $0xb] ss:$2 sm:$0xf] }
 0x548   : > { %746 = vrot.lane.b32.xlu2 %v738_v42, %s2500_s26  ;;  %742 = vrot.lane.b32.xlu1 %v736_v43, %s2497_s23  ;;  %v740_v44 = vld [vmem:[#allocation2 + $0xd] ss:$2 sm:$0xf]  ;;  %v734_v57 = vld [vmem:[#allocation2 + $0xa] ss:$2 sm:$0xf] }
 0x549   : > { %v2377_v42 = vld [vmem:[#allocation3 + $0x198] ss:$0 sm:$0xff] }
 0x550   : > { %750 = vrot.lane.b32.xlu1 %v740_v44, %s2499_s25  ;;  %723 = vrot.lane.b32.xlu2 %v716_v45, %s2500_s26  ;;  %s2098_s25 = scalar_lea.sflag [#allocation5], %s247_s10 }
 0x5a2   : > { %v747_v55 = vpop.permute.xlu2 %746 }
 0x5aa   : > { %v724_v0 = vpop.permute.xlu2 %723 }
 0x5ac   : > { %v720_v54 = vpop.permute.xlu0 %719 }
 0x5ad   : > { %v730_v60 = vsel %vm305_vm3, %v714_v59, %v720_v54  ;;  %v886_v54 = vld [vmem:[#allocation3 + $0x1b8] sm:$0xff] }
 0x5ae   : > { %v731_v2 = vsel %vm423_vm6, %v730_v60, %v724_v0  ;;  %942 = vmatpush.msra.mxu1 %v886_v54  ;;  %v1079_v54 = vlaneseq }
 0x5b4   : > { %v728_v61 = vpop.permute.xlu0 %727 }
 0x5b5   : > { %v732_v4 = vsel %vm425_vm7, %v731_v2, %v728_v61 }
 0x5ba   : > { %v743_v56 = vpop.permute.xlu1 %742 }
 0x5bb   : > { %v753_v58 = vsel %vm305_vm3, %v734_v57, %v743_v56  ;;  %v884_v56 = vld [vmem:[#allocation3 + $0x1a8] sm:$0xff]  ;;  %v883_v57 = vld [vmem:[#allocation3 + $0x1a0] sm:$0xff] }
 0x5bc   : > { %v754_v63 = vsel %vm423_vm6, %v753_v58, %v747_v55  ;;  %v885_v55 = vld [vmem:[#allocation3 + $0x1b0] sm:$0xff] }
 0x5bd   : > { %943 = vmatpush.msra.mxu1 %v885_v55  ;;  %v1080_v55 = vand.u32 127, %v1079_v54 }
 0x5bf   : > { %944 = vmatpush.msra.mxu1 %v884_v56 }
 0x5c1   : > { %945 = vmatpush.msra.mxu1 %v883_v57 }
 0x5c2   : > { %v751_v62 = vpop.permute.xlu1 %750 }
 0x5c3   : > { %v755_v1 = vsel %vm425_vm7, %v754_v63, %v751_v62 }
 0x5c4   : > { %v757_v3 = vrot.slane %v755_v1, 4 }
 0x5c6   : > { %v760_v5 = vsel %vm759_vm11, %v732_v4, %v757_v3 }
 0x5c7   : > { %2266 = vmatmul.msk.f32.vlgmr.msrb.gmra.mxu1 %vm451_vm8, %v760_v5 }
 0x644   : > { %v782_v7 = vpop.f32.mrf.mxu1 }
 0x645   : > { %v783_v8 = vadd.f32 %v2375_v6, %v782_v7 }
 0x647   : > { %v785_v9 = vmax.f32 %v783_v8, 0.0 }
 0x649   : > { %800 = vrot.lane.b32.xlu0 %v785_v9, %s2497_s23  ;;  %v815_v10 = vrot.slane %v785_v9, 4  ;;  %v812_v11 = vrot.slane %v785_v9, 5  ;;  %v797_v13 = vrot.slane %v785_v9, 1  ;;  %v809_v21 = vrot.slane %v785_v9, 3 }
 0x64a   : > { %v794_v25 = vrot.slane %v785_v9, 7  ;;  %v951_v9 = vld [vmem:[#allocation3 + $0x1d8] sm:$0xff] }
 0x64b   : > { %816 = vrot.lane.b32.xlu1 %v815_v10, %s2497_s23  ;;  %v814_v12 = vsel %vm601_vm10, %v812_v11, 0.0  ;;  %v799_v14 = vsel %vm601_vm10, %v797_v13, 0.0  ;;  %v811_v23 = vsel %vm276_vm1, 0.0, %v809_v21  ;;  %v2378_v10 = vld [vmem:[#allocation3 + $0x1d0] ss:$0 sm:$0xff] }
 0x64c   : > { %820 = vrot.lane.b32.xlu2 %v814_v12, %s2500_s26  ;;  %v796_v29 = vsel %vm276_vm1, 0.0, %v794_v25  ;;  %v982_v25 = vld [vmem:[#allocation3 + $0x208] sm:$0xff] }
 0x653   : > { %804 = vrot.lane.b32.xlu1 %v799_v14, %s2500_s26  ;;  %v2379_v14 = vld [vmem:[#allocation3 + $0x1e8] ss:$0 sm:$0xff] }
 0x6a6   : > { %v821_v26 = vpop.permute.xlu2 %820 }
 0x6bb   : > { %v801_v27 = vpop.permute.xlu0 %800 }
 0x6bc   : > { %v807_v30 = vsel %vm305_vm3, %v796_v29, %v801_v27  ;;  %v980_v27 = vld [vmem:[#allocation3 + $0x1f8] sm:$0xff]  ;;  %v1047_v29 = vld [vmem:[#allocation3 + $0x4a8] sm:$0xff] }
 0x6bd   : > { %v817_v22 = vpop.permute.xlu1 %816  ;;  %1070 = vmatpush.msrb.mxu0 %v1047_v29 }
 0x6be   : > { %v823_v24 = vsel %vm305_vm3, %v811_v23, %v817_v22  ;;  %v984_v23 = vld [vmem:[#allocation3 + $0x218] sm:$0xff] }
 0x6bf   : > { %v824_v28 = vsel %vm423_vm6, %v823_v24, %v821_v26  ;;  %1036 = vmatpush.msrb.mxu3 %v984_v23  ;;  %v983_v24 = vld [vmem:[#allocation3 + $0x210] sm:$0xff]  ;;  %v981_v26 = vld [vmem:[#allocation3 + $0x200] sm:$0xff] }
 0x6c0   : > { %v826_v31 = vrot.slane %v824_v28, 4  ;;  %v979_v28 = vld [vmem:[#allocation3 + $0x1f0] sm:$0xff] }
 0x6c1   : > { %1037 = vmatpush.msrb.mxu3 %v983_v24 }
 0x6c3   : > { %1038 = vmatpush.msrb.mxu3 %v982_v25 }
 0x6c5   : > { %v805_v32 = vpop.permute.xlu1 %804  ;;  %1039 = vmatpush.msrb.mxu3 %v981_v26 }
 0x6c6   : > { %v808_v33 = vsel %vm423_vm6, %v807_v30, %v805_v32 }
 0x6c7   : > { %v828_v34 = vsel %vm759_vm11, %v808_v33, %v826_v31  ;;  %1040 = vmatpush.msrb.mxu3 %v980_v27 }
 0x6c8   : > { %2267 = vmatmul.msk.f32.vlgmr.msra.gmra.mxu3 %vm425_vm7, %v828_v34 }
 0x6c9   : > { %1041 = vmatpush.msrb.mxu3 %v979_v28 }
 0x74b   : > { %v850_v38 = vpop.f32.mrf.mxu3 }
 0x74c   : > { %v851_v40 = vadd.f32 %v2376_v37, %v850_v38 }
 0x74e   : > { %v853_v41 = vmax.f32 %v851_v40, 0.0 }
 0x750   : > { %2268 = vmatmul.msk.f32.vlgmr.msra.gmra.mxu2 %vm305_vm3, %v853_v41 }
 0x7d3   : > { %v878_v43 = vpop.f32.mrf.mxu2 }
 0x7d4   : > { %v879_v44 = vadd.f32 %v2377_v42, %v878_v43 }
 0x7d6   : > { %v881_v45 = vadd.f32 %v879_v44, %v783_v8  ;;  %v952_v8 = vld [vmem:[#allocation3 + $0x1e0] sm:$0xff] }
 0x7d7   : > { %972 = vmatpush.msrb.mxu2 %v952_v8 }
 0x7d8   : > { %v882_v46 = vmax.f32 %v881_v45, 0.0 }
 0x7d9   : > { %973 = vmatpush.msrb.mxu2 %v951_v9 }
 0x7da   : > { %897 = vrot.lane.b32.xlu1 %v882_v46, %s2497_s23  ;;  %v912_v47 = vrot.slane %v882_v46, 4  ;;  %v909_v48 = vrot.slane %v882_v46, 7  ;;  %v894_v50 = vrot.slane %v882_v46, 3  ;;  %v906_v59 = vrot.slane %v882_v46, 1 }
 0x7db   : > { %v891_v60 = vrot.slane %v882_v46, 5  ;;  %v2380_v46 = vld [vmem:[#allocation3 + $0x220] ss:$0 sm:$0xff] }
 0x7dc   : > { %913 = vrot.lane.b32.xlu2 %v912_v47, %s2497_s23  ;;  %v911_v49 = vsel %vm276_vm1, %v909_v48, 0.0  ;;  %v896_v51 = vsel %vm276_vm1, %v894_v50, 0.0  ;;  %v908_v62 = vsel %vm601_vm10, 0.0, %v906_v59 }
 0x7dd   : > { %917 = vrot.lane.b32.xlu0 %v911_v49, %s2500_s26  ;;  %v893_v63 = vsel %vm601_vm10, 0.0, %v891_v60  ;;  %v2381_v49 = vld [vmem:[#allocation3 + $0x4b0] ss:$0 sm:$0xff] }
 0x7e4   : > { %901 = vrot.lane.b32.xlu2 %v896_v51, %s2500_s26 }
 0x836   : > { %v914_v58 = vpop.permute.xlu2 %913 }
 0x837   : > { %v920_v0 = vsel %vm305_vm3, %v908_v62, %v914_v58 }
 0x83e   : > { %v902_v4 = vpop.permute.xlu2 %901 }
 0x84c   : > { %v898_v61 = vpop.permute.xlu1 %897 }
 0x84d   : > { %v904_v1 = vsel %vm305_vm3, %v893_v63, %v898_v61  ;;  %v1052_v61 = vld [vmem:[#allocation3 + $0x498] sm:$0xff] }
 0x84e   : > { %v905_v6 = vsel %vm423_vm6, %v904_v1, %v902_v4  ;;  %1119 = vmatpush.msrb.mxu1 %v1052_v61  ;;  %v1049_v4 = vld [vmem:[#allocation3 + $0x480] sm:$0xff] }
 0x84f   : > { %v918_v2 = vpop.permute.xlu0 %917 }
 0x850   : > { %v921_v3 = vsel %vm423_vm6, %v920_v0, %v918_v2  ;;  %v1051_v2 = vld [vmem:[#allocation3 + $0x490] sm:$0xff] }
 0x851   : > { %v923_v5 = vrot.slane %v921_v3, 4  ;;  %1120 = vmatpush.msrb.mxu1 %v1051_v2  ;;  %v1050_v3 = vld [vmem:[#allocation3 + $0x488] sm:$0xff] }
 0x853   : > { %v925_v7 = vsel %vm759_vm11, %v905_v6, %v923_v5  ;;  %1121 = vmatpush.msrb.mxu1 %v1050_v3  ;;  %v1268_v3 = vld [vmem:[#allocation3 + $0x2a0] sm:$0xff] }
 0x854   : > { %2269 = vmatmul.msk.f32.vlgmr.msra.gmra.mxu1 %vm425_vm7, %v925_v7  ;;  %1288 = vmatpush.msra.mxu3 %v1268_v3 }
 0x855   : > { %1122 = vmatpush.msrb.mxu1 %v1049_v4  ;;  %v1267_v4 = vld [vmem:[#allocation3 + $0x298] sm:$0xff] }
 0x856   : > { %1289 = vmatpush.msra.mxu3 %v1267_v4 }
 0x8d1   : > { %v947_v11 = vpop.f32.mrf.mxu1 }
 0x8d2   : > { %v948_v12 = vadd.f32 %v2378_v10, %v947_v11 }
 0x8d4   : > { %v950_v13 = vmax.f32 %v948_v12, 0.0 }
 0x8d6   : > { %2270 = vmatmul.msk.f32.vlgmr.msrb.gmra.mxu2 %vm305_vm3, %v950_v13 }
 0x959   : > { %v975_v15 = vpop.f32.mrf.mxu2 }
 0x95a   : > { %v976_v16 = vadd.f32 %v2379_v14, %v975_v15 }
 0x95c   : > { %v978_v17 = vadd.f32 %v976_v16, %v881_v45  ;;  %v1046_v45 = vld [vmem:[#allocation3 + $0x4a0] sm:$0xff]  ;;  %v1135_v16 = vld [vmem:[#allocation3 + $0x250] sm:$0xff] }
 0x95d   : > { %1071 = vmatpush.msrb.mxu0 %v1046_v45  ;;  %1187 = vmatpush.msra.mxu2 %v1135_v16 }
 0x95e   : > { %993 = vrot.lane.b32.xlu2 %v978_v17, %s2497_s23  ;;  %v1008_v18 = vrot.slane %v978_v17, 4  ;;  %v1005_v19 = vrot.slane %v978_v17, 5  ;;  %v990_v21 = vrot.slane %v978_v17, 1  ;;  %v1002_v30 = vrot.slane %v978_v17, 3 }
 0x95f   : > { %v987_v35 = vrot.slane %v978_v17, 7  ;;  %v1134_v17 = vld [vmem:[#allocation3 + $0x248] sm:$0xff] }
 0x960   : > { %1009 = vrot.lane.b32.xlu0 %v1008_v18, %s2497_s23  ;;  %v1007_v20 = vsel %vm601_vm10, %v1005_v19, 0.0  ;;  %v992_v22 = vsel %vm601_vm10, %v990_v21, 0.0  ;;  %v1004_v32 = vsel %vm276_vm1, 0.0, %v1002_v30  ;;  %1188 = vmatpush.msra.mxu2 %v1134_v17  ;;  %v1133_v18 = vld [vmem:[#allocation3 + $0x240] sm:$0xff]  ;;  %v1132_v19 = vld [vmem:[#allocation3 + $0x238] sm:$0xff]  ;;  %v1130_v21 = vld [vmem:[#allocation3 + $0x228] sm:$0xff] }
 0x961   : > { %1013 = vrot.lane.b32.xlu1 %v1007_v20, %s2500_s26  ;;  %v989_v38 = vsel %vm276_vm1, 0.0, %v987_v35  ;;  %v1131_v20 = vld [vmem:[#allocation3 + $0x230] sm:$0xff] }
 0x962   : > { %1189 = vmatpush.msra.mxu2 %v1133_v18  ;;  %v1301_v18 = vld [vmem:[#allocation3 + $0x2d8] sm:$0xff] }
 0x963   : > { %1353 = vmatpush.msra.mxu1 %v1301_v18 }
 0x964   : > { %1190 = vmatpush.msra.mxu2 %v1132_v19  ;;  %v1300_v19 = vld [vmem:[#allocation3 + $0x2d0] sm:$0xff] }
 0x965   : > { %1354 = vmatpush.msra.mxu1 %v1300_v19 }
 0x966   : > { %1191 = vmatpush.msra.mxu2 %v1131_v20  ;;  %v1299_v20 = vld [vmem:[#allocation3 + $0x2c8] sm:$0xff] }
 0x967   : > { %1355 = vmatpush.msra.mxu1 %v1299_v20 }
 0x968   : > { %997 = vrot.lane.b32.xlu0 %v992_v22, %s2500_s26  ;;  %1192 = vmatpush.msra.mxu2 %v1130_v21  ;;  %v1298_v21 = vld [vmem:[#allocation3 + $0x2c0] sm:$0xff] }
 0x969   : > { %1356 = vmatpush.msra.mxu1 %v1298_v21  ;;  %v1499_v21 = vld [vmem:[#allocation3 + $0x360] sm:$0xff] }
 0x9b8   : > { %v994_v36 = vpop.permute.xlu2 %993 }
 0x9b9   : > { %v1000_v40 = vsel %vm305_vm3, %v989_v38, %v994_v36  ;;  %v2382_v36 = vld [vmem:[#allocation3 + $0x258] ss:$0 sm:$0xff] }
 0x9d2   : > { %v1010_v31 = vpop.permute.xlu0 %1009 }
 0x9d3   : > { %v1016_v33 = vsel %vm305_vm3, %v1004_v32, %v1010_v31  ;;  %v1014_v34 = vpop.permute.xlu1 %1013 }
 0x9d4   : > { %v1017_v37 = vsel %vm423_vm6, %v1016_v33, %v1014_v34 }
 0x9d5   : > { %v1019_v41 = vrot.slane %v1017_v37, 4 }
 0x9da   : > { %v998_v42 = vpop.permute.xlu0 %997 }
 0x9db   : > { %v1001_v43 = vsel %vm423_vm6, %v1000_v40, %v998_v42 }
 0x9dc   : > { %v1021_v44 = vsel %vm759_vm11, %v1001_v43, %v1019_v41 }
 0x9dd   : > { %2271 = vmatmul.msk.f32.vlgmr.msrb.gmra.mxu3 %vm425_vm7, %v1021_v44 }
 0xa60   : > { %v1043_v47 = vpop.f32.mrf.mxu3 }
 0xa61   : > { %v1044_v48 = vadd.f32 %v2380_v46, %v1043_v47  ;;  %v1204_v47 = vld [vmem:[#allocation3 + $0x288] sm:$0xff] }
 0xa62   : > { %1256 = vmatpush.msra.mxu0 %v1204_v47 }
 0xa63   : > { %2272 = vmatmul.msk.f32.vlgmr.msrb.gmra.mxu0 %vm305_vm3, %v1044_v48  ;;  %v1203_v48 = vld [vmem:[#allocation3 + $0x280] sm:$0xff] }
 0xa64   : > { %1257 = vmatpush.msra.mxu0 %v1203_v48 }
 0xae0   : > { %v1073_v50 = vpop.f32.mrf.mxu0 }
 0xae1   : > { %v1076_v51 = vmul.f32 2.0, %v1073_v50  ;;  %v1201_v50 = vld [vmem:[#allocation3 + $0x270] sm:$0xff] }
 0xae3   : > { %v1078_v52 = vsub.f32 %v2381_v49, %v1076_v51  ;;  %v1202_v49 = vld [vmem:[#allocation3 + $0x278] sm:$0xff]  ;;  %v1200_v51 = vld [vmem:[#allocation3 + $0x268] sm:$0xff] }
 0xae4   : > { %1258 = vmatpush.msra.mxu0 %v1202_v49  ;;  %v2814_v49 = vld [vmem:[%s3013_s2] sm:$0xff] }
 0xae5   : > { %v1081_v53 = vsel %vm423_vm6, %v1078_v52, inf }
 0xae6   : > { %1082 = vmin.xlane.f32.xlu1 %v1081_v53  ;;  %1259 = vmatpush.msra.mxu0 %v1201_v50  ;;  %v2821_v50 = vld [vmem:[%s3013_s2 + $0x8] sm:$0xff] }
 0xae8   : > { %1260 = vmatpush.msra.mxu0 %v1200_v51 }
 0xb59   : > { %v1083_v56 = vpop.xlane.xlu1 %1082 }
 0xb5a   : > { %vm1084_vm12 = vcmp.eq.f32.partialorder %v1078_v52, %v1083_v56  ;;  %v1199_v52 = vld [vmem:[#allocation3 + $0x260] sm:$0xff] }
 0xb5b   : > { %v1085_v57 = vsel %vm1084_vm12, %v1080_v55, 32  ;;  %1261 = vmatpush.msra.mxu0 %v1199_v52 }
 0xb5c   : > { %v1086_v58 = vsel %vm423_vm6, %v1085_v57, 2147483647 }
 0xb5d   : > { %v1088_v59 = vshra.s32 %v1086_v58, 16  ;;  %v1087_v62 = vand.u32 65535, %v1086_v58 }
 0xb5f   : > { %v1090_v60 = vcvt.s32.f32 %v1088_v59  ;;  %v1089_v0 = vcvt.s32.f32 %v1087_v62 }
 0xb61   : > { %1091 = vmin.xlane.f32.xlu2 %v1090_v60 }
 0xbd4   : > { %v1092_v63 = vpop.xlane.xlu2 %1091 }
 0xbd5   : > { %vm1093_vm13 = vcmp.eq.f32.partialorder %v1090_v60, %v1092_v63  ;;  %v1098_v5 = vcvt.f32.s32 %v1092_v63 }
 0xbd6   : > { %v1094_v1 = vsel %vm1093_vm13, %v1089_v0, inf }
 0xbd7   : > { %1095 = vmin.xlane.f32.xlu0 %v1094_v1  ;;  %v1099_v7 = vshll.u32 %v1098_v5, 16  ;;  %v2383_v5 = vld [vmem:[#allocation3 + $0x290] ss:$0 sm:$0xff] }
 0xc4a   : > { %v1096_v6 = vpop.xlane.xlu0 %1095 }
 0xc4b   : > { %v1097_v8 = vcvt.f32.s32 %v1096_v6 }
 0xc4d   : > { %v1100_v9 = vadd.s32 %v1099_v7, %v1097_v8 }
 0xc4f   : > { %vm1101_vm15 = vcmp.eq.s32.totalorder %v1080_v55, %v1100_v9  ;;  %1129 = vst.msk [vmem:[%s265_s9] sm:$0xff] %vm1128_vm14, %v1100_v9  ;;  %v2384_v9 = vld [vmem:[#allocation3 + $0x2a8] ss:$0 sm:$0xff] }
 0xc50   : > { %v2273_v10 = vsel %vm1101_vm15, 1.0, %v2498_v39 }
 0xc51   : > { %2274 = vmatmul.msk.f32.vlgmr.msrb.gmra.mxu1 %vm423_vm6, %v2273_v10 }
 0xcce   : > { %v1124_v11 = vpop.f32.mrf.mxu1 }
 0xccf   : > { %1144 = vrot.lane.b32.xlu0 %v1124_v11, %s2497_s23  ;;  %v1159_v12 = vrot.slane %v1124_v11, 4  ;;  %v1156_v13 = vrot.slane %v1124_v11, 5  ;;  %1127 = vst.msk [vmem:[%s249_s14] sm:$0xff] %vm305_vm3, %v1124_v11  ;;  %v1141_v14 = vrot.slane %v1124_v11, 1  ;;  %v1153_v23 = vrot.slane %v1124_v11, 3 }
 0xcd0   : > { %v1138_v24 = vrot.slane %v1124_v11, 7 }
 0xcd1   : > { %1160 = vrot.lane.b32.xlu2 %v1159_v12, %s2497_s23  ;;  %v1158_v39 = vsel %vm601_vm10, %v1156_v13, 0.0  ;;  %v1143_v15 = vsel %vm601_vm10, %v1141_v14, 0.0  ;;  %v1155_v26 = vsel %vm276_vm1, 0.0, %v1153_v23  ;;  %v1296_v23 = vld [vmem:[#allocation3 + $0x2b0] sm:$0xff] }
 0xcd2   : > { %1164 = vrot.lane.b32.xlu1 %v1158_v39, %s2500_s26  ;;  %v1140_v27 = vsel %vm276_vm1, 0.0, %v1138_v24 }
 0xcd9   : > { %1148 = vrot.lane.b32.xlu2 %v1143_v15, %s2500_s26 }
 0xd2b   : > { %v1161_v22 = vpop.permute.xlu2 %1160 }
 0xd2c   : > { %v1167_v28 = vsel %vm305_vm3, %v1155_v26, %v1161_v22  ;;  %v1297_v22 = vld [vmem:[#allocation3 + $0x2b8] sm:$0xff] }
 0xd2d   : > { %1357 = vmatpush.msra.mxu1 %v1297_v22  ;;  %v1498_v22 = vld [vmem:[#allocation3 + $0x358] sm:$0xff] }
 0xd2f   : > { %1358 = vmatpush.msra.mxu1 %v1296_v23  ;;  %v1497_v23 = vld [vmem:[#allocation3 + $0x350] sm:$0xff] }
 0xd31   : > { %1550 = vmatpush.msrb.mxu1 %v1499_v21 }
 0xd33   : > { %v1149_v32 = vpop.permute.xlu2 %1148  ;;  %1551 = vmatpush.msrb.mxu1 %v1498_v22 }
 0xd35   : > { %1552 = vmatpush.msrb.mxu1 %v1497_v23 }
 0xd41   : > { %v1145_v25 = vpop.permute.xlu0 %1144 }
 0xd42   : > { %v1151_v29 = vsel %vm305_vm3, %v1140_v27, %v1145_v25 }
 0xd43   : > { %v1152_v34 = vsel %vm423_vm6, %v1151_v29, %v1149_v32 }
 0xd44   : > { %v1165_v30 = vpop.permute.xlu1 %1164 }
 0xd45   : > { %v1168_v31 = vsel %vm423_vm6, %v1167_v28, %v1165_v30 }
 0xd46   : > { %v1170_v33 = vrot.slane %v1168_v31, 4 }
 0xd48   : > { %v1172_v35 = vsel %vm759_vm11, %v1152_v34, %v1170_v33 }
 0xd49   : > { %2275 = vmatmul.msk.f32.vlgmr.msra.gmra.mxu2 %vm425_vm7, %v1172_v35 }
 0xdcc   : > { %v1194_v37 = vpop.f32.mrf.mxu2 }
 0xdcd   : > { %v1195_v38 = vadd.f32 %v2382_v36, %v1194_v37 }
 0xdcf   : > { %v1197_v40 = vmax.f32 %v1195_v38, 0.0  ;;  %v1365_v38 = vld [vmem:[#allocation3 + $0x2f0] sm:$0xff] }
 0xdd0   : > { %1385 = vmatpush.msrb.mxu2 %v1365_v38 }
 0xdd1   : > { %v1198_v41 = vmax.f32 %v1197_v40, 0.0 }
 0xdd3   : > { %1213 = vrot.lane.b32.xlu2 %v1198_v41, %s2497_s23  ;;  %v1228_v42 = vrot.slane %v1198_v41, 4  ;;  %v1225_v43 = vrot.slane %v1198_v41, 7  ;;  %v1210_v45 = vrot.slane %v1198_v41, 3  ;;  %v1222_v53 = vrot.slane %v1198_v41, 1 }
 0xdd4   : > { %v1207_v58 = vrot.slane %v1198_v41, 5  ;;  %v2385_v41 = vld [vmem:[#allocation3 + $0x2e0] ss:$0 sm:$0xff] }
 0xdd5   : > { %1229 = vrot.lane.b32.xlu1 %v1228_v42, %s2497_s23  ;;  %v1227_v44 = vsel %vm276_vm1, %v1225_v43, 0.0  ;;  %v1212_v46 = vsel %vm276_vm1, %v1210_v45, 0.0  ;;  %v1224_v55 = vsel %vm601_vm10, 0.0, %v1222_v53  ;;  %v2386_v45 = vld [vmem:[#allocation3 + $0x2f8] ss:$0 sm:$0xff] }
 0xdd6   : > { %1233 = vrot.lane.b32.xlu0 %v1227_v44, %s2500_s26  ;;  %v1209_v61 = vsel %vm601_vm10, 0.0, %v1207_v58  ;;  %v1427_v58 = vld [vmem:[#allocation3 + $0x320] sm:$0xff] }
 0xddd   : > { %1217 = vrot.lane.b32.xlu1 %v1212_v46, %s2500_s26 }
 0xe2d   : > { %v1214_v59 = vpop.permute.xlu2 %1213 }
 0xe2e   : > { %v1220_v62 = vsel %vm305_vm3, %v1209_v61, %v1214_v59  ;;  %v1426_v59 = vld [vmem:[#allocation3 + $0x318] sm:$0xff]  ;;  %v1424_v61 = vld [vmem:[#allocation3 + $0x308] sm:$0xff] }
 0xe47   : > { %v1230_v54 = vpop.permute.xlu1 %1229 }
 0xe48   : > { %v1236_v56 = vsel %vm305_vm3, %v1224_v55, %v1230_v54  ;;  %v1234_v57 = vpop.permute.xlu0 %1233 }
 0xe49   : > { %v1237_v60 = vsel %vm423_vm6, %v1236_v56, %v1234_v57  ;;  %v1428_v57 = vld [vmem:[#allocation3 + $0x328] sm:$0xff] }
 0xe4a   : > { %v1239_v63 = vrot.slane %v1237_v60, 4  ;;  %1479 = vmatpush.msrb.mxu0 %v1428_v57  ;;  %v1425_v60 = vld [vmem:[#allocation3 + $0x310] sm:$0xff] }
 0xe4c   : > { %1480 = vmatpush.msrb.mxu0 %v1427_v58 }
 0xe4e   : > { %1481 = vmatpush.msrb.mxu0 %v1426_v59 }
 0xe4f   : > { %v1218_v0 = vpop.permute.xlu1 %1217 }
 0xe50   : > { %v1221_v1 = vsel %vm423_vm6, %v1220_v62, %v1218_v0  ;;  %1482 = vmatpush.msrb.mxu0 %v1425_v60  ;;  %v1423_v62 = vld [vmem:[#allocation3 + $0x300] sm:$0xff] }
 0xe51   : > { %v1241_v2 = vsel %vm759_vm11, %v1221_v1, %v1239_v63 }
 0xe52   : > { %2276 = vmatmul.msk.f32.vlgmr.msra.gmra.mxu0 %vm425_vm7, %v1241_v2 }
 0xe53   : > { %1483 = vmatpush.msrb.mxu0 %v1424_v61 }
 0xe55   : > { %1484 = vmatpush.msrb.mxu0 %v1423_v62 }
 0xecf   : > { %v1263_v6 = vpop.f32.mrf.mxu0 }
 0xed0   : > { %v1264_v7 = vadd.f32 %v2383_v5, %v1263_v6 }
 0xed2   : > { %v1266_v8 = vmax.f32 %v1264_v7, 0.0 }
 0xed4   : > { %2277 = vmatmul.msk.f32.vlgmr.msra.gmra.mxu3 %vm305_vm3, %v1266_v8 }
 0xf57   : > { %v1291_v10 = vpop.f32.mrf.mxu3 }
 0xf58   : > { %v1292_v11 = vadd.f32 %v2384_v9, %v1291_v10 }
 0xf5a   : > { %v1294_v12 = vadd.f32 %v1292_v11, %v1197_v40  ;;  %v1364_v40 = vld [vmem:[#allocation3 + $0x2e8] sm:$0xff]  ;;  %v2387_v11 = vld [vmem:[#allocation3 + $0x330] ss:$0 sm:$0xff] }
 0xf5b   : > { %1386 = vmatpush.msrb.mxu2 %v1364_v40  ;;  %v1566_v40 = vld [vmem:[#allocation3 + $0x378] sm:$0xff] }
 0xf5c   : > { %v1295_v13 = vmax.f32 %v1294_v12, 0.0 }
 0xf5d   : > { %1589 = vmatpush.msra.mxu2 %v1566_v40 }
 0xf5e   : > { %1310 = vrot.lane.b32.xlu1 %v1295_v13, %s2497_s23  ;;  %v1325_v39 = vrot.slane %v1295_v13, 4  ;;  %v1322_v14 = vrot.slane %v1295_v13, 5  ;;  %v1307_v16 = vrot.slane %v1295_v13, 1  ;;  %v1319_v24 = vrot.slane %v1295_v13, 3 }
 0xf5f   : > { %v1304_v28 = vrot.slane %v1295_v13, 7 }
 0xf60   : > { %1326 = vrot.lane.b32.xlu0 %v1325_v39, %s2497_s23  ;;  %v1324_v15 = vsel %vm601_vm10, %v1322_v14, 0.0  ;;  %v1309_v17 = vsel %vm601_vm10, %v1307_v16, 0.0  ;;  %v1321_v26 = vsel %vm276_vm1, 0.0, %v1319_v24  ;;  %v1496_v24 = vld [vmem:[#allocation3 + $0x348] sm:$0xff] }
 0xf61   : > { %1330 = vrot.lane.b32.xlu2 %v1324_v15, %s2500_s26  ;;  %v1306_v32 = vsel %vm276_vm1, 0.0, %v1304_v28  ;;  %1553 = vmatpush.msrb.mxu1 %v1496_v24 }
 0xf68   : > { %1314 = vrot.lane.b32.xlu0 %v1309_v17, %s2500_s26 }
 0xfbb   : > { %v1331_v29 = vpop.permute.xlu2 %1330 }
 0xfd0   : > { %v1311_v30 = vpop.permute.xlu1 %1310 }
 0xfd1   : > { %v1317_v33 = vsel %vm305_vm3, %v1306_v32, %v1311_v30 }
 0xfd2   : > { %v1327_v25 = vpop.permute.xlu0 %1326 }
 0xfd3   : > { %v1333_v27 = vsel %vm305_vm3, %v1321_v26, %v1327_v25  ;;  %v1495_v25 = vld [vmem:[#allocation3 + $0x340] sm:$0xff]  ;;  %v1494_v26 = vld [vmem:[#allocation3 + $0x338] sm:$0xff] }
 0xfd4   : > { %v1334_v31 = vsel %vm423_vm6, %v1333_v27, %v1331_v29  ;;  %1554 = vmatpush.msrb.mxu1 %v1495_v25 }
 0xfd5   : > { %v1336_v34 = vrot.slane %v1334_v31, 4 }
 0xfd6   : > { %1555 = vmatpush.msrb.mxu1 %v1494_v26 }
 0xfda   : > { %v1315_v35 = vpop.permute.xlu0 %1314 }
 0xfdb   : > { %v1318_v36 = vsel %vm423_vm6, %v1317_v33, %v1315_v35 }
 0xfdc   : > { %v1338_v37 = vsel %vm759_vm11, %v1318_v36, %v1336_v34 }
 0xfdd   : > { %2278 = vmatmul.msk.f32.vlgmr.msra.gmra.mxu1 %vm425_vm7, %v1338_v37 }
0x105a   : > { %v1360_v42 = vpop.f32.mrf.mxu1 }
0x105b   : > { %v1361_v43 = vadd.f32 %v2385_v41, %v1360_v42  ;;  %v1565_v41 = vld [vmem:[#allocation3 + $0x370] sm:$0xff]  ;;  %v2388_v42 = vld [vmem:[#allocation3 + $0x368] ss:$0 sm:$0xff] }
0x105c   : > { %1590 = vmatpush.msra.mxu2 %v1565_v41 }
0x105d   : > { %v1363_v44 = vmax.f32 %v1361_v43, 0.0 }
0x105f   : > { %2279 = vmatmul.msk.f32.vlgmr.msrb.gmra.mxu2 %vm305_vm3, %v1363_v44 }
0x10e2   : > { %v1388_v46 = vpop.f32.mrf.mxu2 }
0x10e3   : > { %v1389_v47 = vadd.f32 %v2386_v45, %v1388_v46 }
0x10e5   : > { %v1391_v48 = vadd.f32 %v1389_v47, %v1294_v12 }
0x10e7   : > { %1415 = vmatpush.msrb.mxu3 %v1391_v48 }
0x10e8   : > { %2280 = vmatmul.msk.f32.vlgmr.msrb.gmra.mxu3 %vm302_vm2, %v2814_v49 }
0x10f0   : > { %2281 = vmatmul.msk.f32.gmra.mxu3 %vm302_vm2, %v2821_v50 }
0x116b   : > { %v1417_v51 = vpop.f32.mrf.mxu3 }
0x116c   : > { %v1434_v52 = vrot.slane %v1417_v51, 1  ;;  %1437 = vrot.lane.b32.xlu2 %v1417_v51, %s2497_s23  ;;  %v1431_v63 = vrot.slane %v1417_v51, 7  ;;  %v2389_v51 = vld [vmem:[#allocation3 + $0x380] ss:$0 sm:$0xff] }
0x116e   : > { %v1436_v53 = vsel %vm283_vm0, %v1434_v52, 0.0  ;;  %v1433_v1 = vsel %vm276_vm1, 0.0, %v1431_v63 }
0x116f   : > { %1441 = vrot.lane.b32.xlu1 %v1436_v53, %s2500_s26 }
0x1173   : > { %v1420_v54 = vpop.f32.mrf.mxu3 }
0x1174   : > { %v1450_v55 = vrot.slane %v1420_v54, 1  ;;  %1453 = vrot.lane.b32.xlu0 %v1420_v54, %s2497_s23  ;;  %v1447_v4 = vrot.slane %v1420_v54, 7 }
0x1176   : > { %v1452_v56 = vsel %vm283_vm0, %v1450_v55, 0.0  ;;  %v1449_v7 = vsel %vm276_vm1, 0.0, %v1447_v4  ;;  %v1603_v4 = vld [vmem:[#allocation3 + $0x390] sm:$0xff] }
0x1177   : > { %1457 = vrot.lane.b32.xlu2 %v1452_v56, %s2500_s26 }
0x11c6   : > { %v1438_v0 = vpop.permute.xlu2 %1437 }
0x11c7   : > { %v1444_v2 = vsel %vm305_vm3, %v1433_v1, %v1438_v0  ;;  %v1607_v0 = vld [vmem:[#allocation3 + $0x3b0] sm:$0xff]  ;;  %v1606_v1 = vld [vmem:[#allocation3 + $0x3a8] sm:$0xff] }
0x11c8   : > { %1658 = vmatpush.msra.mxu3 %v1607_v0 }
0x11ca   : > { %1659 = vmatpush.msra.mxu3 %v1606_v1 }
0x11d1   : > { %v1458_v9 = vpop.permute.xlu2 %1457 }
0x11e1   : > { %v1442_v3 = vpop.permute.xlu1 %1441 }
0x11e2   : > { %v1445_v5 = vsel %vm423_vm6, %v1444_v2, %v1442_v3  ;;  %v1605_v2 = vld [vmem:[#allocation3 + $0x3a0] sm:$0xff]  ;;  %v1604_v3 = vld [vmem:[#allocation3 + $0x398] sm:$0xff] }
0x11e3   : > { %2282 = vmatmul.msk.f32.vlgmr.msrb.gmra.mxu0 %vm425_vm7, %v1445_v5  ;;  %1660 = vmatpush.msra.mxu3 %v1605_v2  ;;  %v1602_v5 = vld [vmem:[#allocation3 + $0x388] sm:$0xff] }
0x11e5   : > { %1661 = vmatpush.msra.mxu3 %v1604_v3 }
0x11e6   : > { %v1454_v6 = vpop.permute.xlu0 %1453 }
0x11e7   : > { %v1460_v8 = vsel %vm305_vm3, %v1449_v7, %v1454_v6  ;;  %1662 = vmatpush.msra.mxu3 %v1603_v4 }
0x11e8   : > { %v1461_v10 = vsel %vm423_vm6, %v1460_v8, %v1458_v9 }
0x11e9   : > { %1663 = vmatpush.msra.mxu3 %v1602_v5 }
0x11eb   : > { %2283 = vmatmul.msk.f32.gmra.mxu0 %vm425_vm7, %v1461_v10 }
0x1260   : > { %v1486_v12 = vpop.f32.mrf.mxu0 }
0x1261   : > { %v1487_v13 = vadd.f32 %v2387_v11, %v1486_v12 }
0x1263   : > { %v1492_v39 = vmax.f32 %v1487_v13, 0.0 }
0x1265   : > { %1508 = vrot.lane.b32.xlu1 %v1492_v39, %s2497_s23  ;;  %v1505_v14 = vrot.slane %v1492_v39, 3  ;;  %v1502_v27 = vrot.slane %v1492_v39, 5 }
0x1267   : > { %v1507_v15 = vsel %vm605_vm9, %v1505_v14, 0.0  ;;  %v1504_v29 = vsel %vm601_vm10, 0.0, %v1502_v27  ;;  %v2391_v27 = vld [vmem:[#allocation3 + $0x3d0] ss:$0 sm:$0xff] }
0x1268   : > { %1512 = vrot.lane.b32.xlu0 %v1507_v15, %s2500_s26  ;;  %v1489_v16 = vpop.f32.mrf.mxu0 }
0x1269   : > { %v1490_v17 = vadd.f32 %v2387_v11, %v1489_v16 }
0x126b   : > { %v1493_v18 = vmax.f32 %v1490_v17, 0.0 }
0x126d   : > { %1524 = vrot.lane.b32.xlu2 %v1493_v18, %s2497_s23  ;;  %v1521_v19 = vrot.slane %v1493_v18, 3  ;;  %v1518_v33 = vrot.slane %v1493_v18, 5  ;;  %v1673_v18 = vld [vmem:[#allocation3 + $0x3c0] sm:$0xff] }
0x126f   : > { %v1523_v20 = vsel %vm605_vm9, %v1521_v19, 0.0  ;;  %v1520_v35 = vsel %vm601_vm10, 0.0, %v1518_v33  ;;  %v2390_v19 = vld [vmem:[#allocation3 + $0x3b8] ss:$0 sm:$0xff]  ;;  %v1710_v33 = vld [vmem:[%s3013_s2 + $0x10] sm:$0xff] }
0x1270   : > { %1528 = vrot.lane.b32.xlu1 %v1523_v20, %s2500_s26 }
0x12c7   : > { %v1525_v34 = vpop.permute.xlu2 %1524 }
0x12c8   : > { %v1531_v36 = vsel %vm305_vm3, %v1520_v35, %v1525_v34  ;;  %v1711_v34 = vld [vmem:[%s3013_s2 + $0x18] sm:$0xff] }
0x12d7   : > { %v1509_v28 = vpop.permute.xlu1 %1508 }
0x12d8   : > { %v1515_v30 = vsel %vm305_vm3, %v1504_v29, %v1509_v28 }
0x12da   : > { %v1513_v31 = vpop.permute.xlu0 %1512 }
0x12db   : > { %v1516_v32 = vsel %vm423_vm6, %v1515_v30, %v1513_v31 }
0x12dc   : > { %2284 = vmatmul.msk.f32.vlgmr.msrb.gmra.mxu1 %vm425_vm7, %v1516_v32 }
0x12e2   : > { %v1529_v37 = vpop.permute.xlu1 %1528 }
0x12e3   : > { %v1532_v38 = vsel %vm423_vm6, %v1531_v36, %v1529_v37 }
0x12e4   : > { %2285 = vmatmul.msk.f32.gmra.mxu1 %vm425_vm7, %v1532_v38 }
0x1359   : > { %v1557_v43 = vpop.f32.mrf.mxu1 }
0x135a   : > { %v1558_v44 = vadd.f32 %v2388_v42, %v1557_v43 }
0x135c   : > { %v1563_v45 = vmax.f32 %v1558_v44, 0.0 }
0x135e   : > { %2286 = vmatmul.msk.f32.vlgmr.msra.gmra.mxu2 %vm305_vm3, %v1563_v45 }
0x1361   : > { %v1560_v46 = vpop.f32.mrf.mxu1 }
0x1362   : > { %v1561_v47 = vadd.f32 %v2388_v42, %v1560_v46 }
0x1364   : > { %v1564_v48 = vmax.f32 %v1561_v47, 0.0 }
0x1366   : > { %2287 = vmatmul.msk.f32.gmra.mxu2 %vm305_vm3, %v1564_v48 }
0x13e1   : > { %v1592_v52 = vpop.f32.mrf.mxu2 }
0x13e2   : > { %v1593_v53 = vadd.f32 %v2389_v51, %v1592_v52 }
0x13e4   : > { %v1598_v54 = vadd.f32 %v1593_v53, %v1487_v13 }
0x13e6   : > { %v1600_v55 = vmax.f32 %v1598_v54, 0.0 }
0x13e8   : > { %1616 = vrot.lane.b32.xlu0 %v1600_v55, %s2497_s23  ;;  %v1613_v56 = vrot.slane %v1600_v55, 1  ;;  %v1610_v6 = vrot.slane %v1600_v55, 7  ;;  %v1757_v55 = vld [vmem:[#allocation3 + $0x3f8] sm:$0xff] }
0x13e9   : > { %v1595_v57 = vpop.f32.mrf.mxu2 }
0x13ea   : > { %v1596_v58 = vadd.f32 %v2389_v51, %v1595_v57  ;;  %v1615_v59 = vsel %vm283_vm0, %v1613_v56, 0.0  ;;  %v1612_v8 = vsel %vm276_vm1, 0.0, %v1610_v6  ;;  %v1756_v56 = vld [vmem:[#allocation3 + $0x3f0] sm:$0xff]  ;;  %v1755_v57 = vld [vmem:[#allocation3 + $0x3e8] sm:$0xff] }
0x13eb   : > { %1620 = vrot.lane.b32.xlu2 %v1615_v59, %s2500_s26  ;;  %v1753_v59 = vld [vmem:[#allocation3 + $0x3d8] sm:$0xff] }
0x13ec   : > { %v1599_v60 = vadd.f32 %v1596_v58, %v1490_v17  ;;  %v1674_v17 = vld [vmem:[#allocation3 + $0x3c8] sm:$0xff]  ;;  %v1754_v58 = vld [vmem:[#allocation3 + $0x3e0] sm:$0xff] }
0x13ed   : > { %1697 = vmatpush.msra.mxu0 %v1674_v17 }
0x13ee   : > { %v1601_v61 = vmax.f32 %v1599_v60, 0.0 }
0x13ef   : > { %1698 = vmatpush.msra.mxu0 %v1673_v18 }
0x13f0   : > { %1632 = vrot.lane.b32.xlu1 %v1601_v61, %s2497_s23  ;;  %v1629_v62 = vrot.slane %v1601_v61, 1  ;;  %v1626_v12 = vrot.slane %v1601_v61, 7 }
0x13f2   : > { %v1631_v63 = vsel %vm283_vm0, %v1629_v62, 0.0  ;;  %v1628_v39 = vsel %vm276_vm1, 0.0, %v1626_v12 }
0x13f3   : > { %1636 = vrot.lane.b32.xlu0 %v1631_v63, %s2500_s26 }
0x1445   : > { %v1621_v9 = vpop.permute.xlu2 %1620 }
0x145a   : > { %v1617_v7 = vpop.permute.xlu0 %1616 }
0x145b   : > { %v1623_v10 = vsel %vm305_vm3, %v1612_v8, %v1617_v7 }
0x145c   : > { %v1624_v11 = vsel %vm423_vm6, %v1623_v10, %v1621_v9 }
0x145d   : > { %2288 = vmatmul.msk.f32.vlgmr.msra.gmra.mxu3 %vm425_vm7, %v1624_v11 }
0x1462   : > { %v1633_v13 = vpop.permute.xlu1 %1632 }
0x1463   : > { %v1639_v14 = vsel %vm305_vm3, %v1628_v39, %v1633_v13  ;;  %v2392_v39 = vld [vmem:[#allocation3 + $0x408] ss:$0 sm:$0xff] }
0x1465   : > { %v1637_v15 = vpop.permute.xlu0 %1636 }
0x1466   : > { %v1640_v16 = vsel %vm423_vm6, %v1639_v14, %v1637_v15 }
0x1467   : > { %2289 = vmatmul.msk.f32.gmra.mxu3 %vm425_vm7, %v1640_v16 }
0x14e0   : > { %v1665_v20 = vpop.f32.mrf.mxu3 }
0x14e1   : > { %v1666_v21 = vadd.f32 %v2390_v19, %v1665_v20 }
0x14e3   : > { %v1671_v22 = vmax.f32 %v1666_v21, 0.0 }
0x14e5   : > { %2290 = vmatmul.msk.f32.vlgmr.msra.gmra.mxu0 %vm305_vm3, %v1671_v22 }
0x14ea   : > { %v1668_v23 = vpop.f32.mrf.mxu3 }
0x14eb   : > { %v1669_v24 = vadd.f32 %v2390_v19, %v1668_v23 }
0x14ed   : > { %v1672_v25 = vmax.f32 %v1669_v24, 0.0 }
0x14ef   : > { %2291 = vmatmul.msk.f32.gmra.mxu0 %vm305_vm3, %v1672_v25 }
0x1562   : > { %v1700_v26 = vpop.f32.mrf.mxu0 }
0x1563   : > { %v1701_v29 = vadd.f32 %v2391_v27, %v1700_v26 }
0x1565   : > { %v1706_v32 = vadd.f32 %v1701_v29, %v1598_v54  ;;  %v1758_v54 = vld [vmem:[#allocation3 + $0x400] sm:$0xff] }
0x1566   : > { %1843 = vmatpush.msra.mxu1 %v1758_v54 }
0x1568   : > { %1844 = vmatpush.msra.mxu1 %v1757_v55 }
0x156a   : > { %1845 = vmatpush.msra.mxu1 %v1756_v56 }
0x156c   : > { %v1703_v28 = vpop.f32.mrf.mxu0  ;;  %1846 = vmatpush.msra.mxu1 %v1755_v57 }
0x156d   : > { %v1704_v30 = vadd.f32 %v2391_v27, %v1703_v28 }
0x156e   : > { %1847 = vmatpush.msra.mxu1 %v1754_v58 }
0x156f   : > { %v1707_v31 = vadd.f32 %v1704_v30, %v1599_v60 }
0x1570   : > { %1848 = vmatpush.msra.mxu1 %v1753_v59 }
0x1571   : > { %1738 = vmatpush.msrb.mxu2 %v1707_v31 }
0x1573   : > { %1739 = vmatpush.msrb.mxu2 %v1706_v32 }
0x1574   : > { %2292 = vmatmul.msk.f32.vlgmr.msrb.gmra.mxu2 %vm305_vm3, %v2814_v49 }
0x157c   : > { %2293 = vmatmul.msk.f32.gmra.mxu2 %vm305_vm3, %v2821_v50 }
0x1584   : > { %2294 = vmatmul.msk.f32.gmra.mxu2 %vm305_vm3, %v1710_v33 }
0x158c   : > { %2295 = vmatmul.msk.f32.gmra.mxu2 %vm305_vm3, %v1711_v34 }
0x15f7   : > { %v1741_v35 = vpop.f32.mrf.mxu2 }
0x15f8   : > { %1773 = vrot.lane.b32.xlu2 %v1741_v35, %s2497_s23  ;;  %v1762_v49 = vrot.slane %v1741_v35, 7  ;;  %v1768_v37 = vrot.slane %v1741_v35, 1 }
0x15fa   : > { %v1767_v61 = vsel %vm276_vm1, 0.0, %v1762_v49 }
0x15ff   : > { %v1744_v36 = vpop.f32.mrf.mxu2 }
0x1600   : > { %v1763_v38 = vrot.slane %v1744_v36, 7  ;;  %v1769_v50 = vrot.slane %v1744_v36, 1  ;;  %1775 = vrot.lane.b32.xlu0 %v1744_v36, %s2497_s23  ;;  %v1867_v36 = vld [vmem:[#allocation3 + $0x438] sm:$0xff] }
0x1601   : > { %1952 = vmatpush.msrb.mxu3 %v1867_v36 }
0x1602   : > { %v1770_v40 = vsel %vm283_vm0, %v1768_v37, %v1769_v50  ;;  %v1772_v41 = vsel %vm283_vm0, %v1769_v50, 0.0  ;;  %v1764_v42 = vsel %vm276_vm1, %v1762_v49, %v1763_v38  ;;  %v1866_v49 = vld [vmem:[#allocation3 + $0x430] sm:$0xff]  ;;  %v1865_v37 = vld [vmem:[#allocation3 + $0x428] sm:$0xff]  ;;  %v1864_v38 = vld [vmem:[#allocation3 + $0x420] sm:$0xff] }
0x1603   : > { %1780 = vrot.lane.b32.xlu1 %v1770_v40, %s2500_s26  ;;  %1782 = vrot.lane.b32.xlu2 %v1772_v41, %s2500_s26  ;;  %v1863_v50 = vld [vmem:[#allocation3 + $0x418] sm:$0xff]  ;;  %v1862_v40 = vld [vmem:[#allocation3 + $0x410] sm:$0xff] }
0x1604   : > { %1953 = vmatpush.msrb.mxu3 %v1866_v49 }
0x1606   : > { %1954 = vmatpush.msrb.mxu3 %v1865_v37 }
0x1607   : > { %v1747_v43 = vpop.f32.mrf.mxu2 }
0x1608   : > { %v1792_v45 = vrot.slane %v1747_v43, 7  ;;  %v1798_v46 = vrot.slane %v1747_v43, 1  ;;  %1955 = vmatpush.msrb.mxu3 %v1864_v38 }
0x160a   : > { %v1797_v6 = vsel %vm276_vm1, 0.0, %v1792_v45  ;;  %1956 = vmatpush.msrb.mxu3 %v1863_v50 }
0x160b   : > { %1803 = vrot.lane.b32.xlu1 %v1747_v43, %s2497_s23 }
0x160c   : > { %1957 = vmatpush.msrb.mxu3 %v1862_v40 }
0x160f   : > { %v1750_v44 = vpop.f32.mrf.mxu2 }
0x1610   : > { %v1793_v47 = vrot.slane %v1750_v44, 7  ;;  %v1799_v48 = vrot.slane %v1750_v44, 1  ;;  %1805 = vrot.lane.b32.xlu2 %v1750_v44, %s2497_s23 }
0x1612   : > { %v1802_v51 = vsel %vm283_vm0, %v1799_v48, 0.0  ;;  %v1800_v52 = vsel %vm283_vm0, %v1798_v46, %v1799_v48  ;;  %v1794_v53 = vsel %vm276_vm1, %v1792_v45, %v1793_v47 }
0x1613   : > { %1812 = vrot.lane.b32.xlu1 %v1802_v51, %s2500_s26  ;;  %1810 = vrot.lane.b32.xlu0 %v1800_v52, %s2500_s26 }
0x1652   : > { %v1774_v60 = vpop.permute.xlu2 %1773 }
0x1653   : > { %v1786_v62 = vsel %vm305_vm3, %v1767_v61, %v1774_v60  ;;  %v2393_v61 = vld [vmem:[#allocation3 + $0x440] ss:$0 sm:$0xff] }
0x165d   : > { %v1783_v3 = vpop.permute.xlu2 %1782 }
0x166a   : > { %v1806_v10 = vpop.permute.xlu2 %1805 }
0x166b   : > { %v1817_v12 = vsel %vm305_vm3, %v1794_v53, %v1806_v10 }
0x1672   : > { %v1776_v1 = vpop.permute.xlu0 %1775 }
0x1673   : > { %v1787_v2 = vsel %vm305_vm3, %v1764_v42, %v1776_v1 }
0x1674   : > { %v1789_v4 = vsel %vm423_vm6, %v1787_v2, %v1783_v3 }
0x1675   : > { %v1781_v63 = vpop.permute.xlu1 %1780 }
0x1676   : > { %v1788_v0 = vsel %vm423_vm6, %v1786_v62, %v1781_v63 }
0x1677   : > { %2296 = vmatmul.msk.f32.vlgmr.msra.gmra.mxu1 %vm425_vm7, %v1788_v0 }
0x167d   : > { %v1804_v5 = vpop.permute.xlu1 %1803 }
0x167e   : > { %v1816_v7 = vsel %vm305_vm3, %v1797_v6, %v1804_v5 }
0x167f   : > { %2297 = vmatmul.msk.f32.gmra.mxu1 %vm425_vm7, %v1789_v4 }
0x1685   : > { %v1811_v8 = vpop.permute.xlu0 %1810  ;;  %v1813_v11 = vpop.permute.xlu1 %1812 }
0x1686   : > { %v1818_v9 = vsel %vm423_vm6, %v1816_v7, %v1811_v8  ;;  %v1819_v13 = vsel %vm423_vm6, %v1817_v12, %v1813_v11 }
0x1687   : > { %2298 = vmatmul.msk.f32.gmra.mxu1 %vm425_vm7, %v1818_v9 }
0x168f   : > { %2299 = vmatmul.msk.f32.gmra.mxu1 %vm425_vm7, %v1819_v13 }
0x16f4   : > { %v1850_v14 = vpop.f32.mrf.mxu1 }
0x16f5   : > { %v1851_v15 = vadd.f32 %v2392_v39, %v1850_v14 }
0x16f7   : > { %1882 = vrot.lane.b32.xlu0 %v1851_v15, %s2497_s23  ;;  %v1871_v18 = vrot.slane %v1851_v15, 7  ;;  %v1877_v19 = vrot.slane %v1851_v15, 1 }
0x16f9   : > { %v1876_v41 = vsel %vm276_vm1, 0.0, %v1871_v18 }
0x16fc   : > { %v1853_v16 = vpop.f32.mrf.mxu1 }
0x16fd   : > { %v1854_v17 = vadd.f32 %v2392_v39, %v1853_v16 }
0x16ff   : > { %v1872_v20 = vrot.slane %v1854_v17, 7  ;;  %v1878_v21 = vrot.slane %v1854_v17, 1  ;;  %1884 = vrot.lane.b32.xlu1 %v1854_v17, %s2497_s23 }
0x1701   : > { %v1879_v22 = vsel %vm283_vm0, %v1877_v19, %v1878_v21  ;;  %v1881_v23 = vsel %vm283_vm0, %v1878_v21, 0.0  ;;  %v1873_v24 = vsel %vm276_vm1, %v1871_v18, %v1872_v20 }
0x1702   : > { %1889 = vrot.lane.b32.xlu2 %v1879_v22, %s2500_s26  ;;  %1891 = vrot.lane.b32.xlu0 %v1881_v23, %s2500_s26  ;;  %v1980_v23 = vld [vmem:[#allocation3 + $0x470] sm:$0xff] }
0x1703   : > { %2065 = vmatpush.msrb.mxu0 %v1980_v23 }
0x1704   : > { %v1856_v25 = vpop.f32.mrf.mxu1 }
0x1705   : > { %v1857_v26 = vadd.f32 %v2392_v39, %v1856_v25  ;;  %v1978_v25 = vld [vmem:[#allocation3 + $0x460] sm:$0xff] }
0x1707   : > { %v1901_v29 = vrot.slane %v1857_v26, 7  ;;  %v1907_v30 = vrot.slane %v1857_v26, 1 }
0x1709   : > { %v1906_v53 = vsel %vm276_vm1, 0.0, %v1901_v29 }
0x170a   : > { %1912 = vrot.lane.b32.xlu2 %v1857_v26, %s2497_s23  ;;  %v1977_v26 = vld [vmem:[#allocation3 + $0x458] sm:$0xff] }
0x170c   : > { %v1859_v27 = vpop.f32.mrf.mxu1 }
0x170d   : > { %v1860_v28 = vadd.f32 %v2392_v39, %v1859_v27  ;;  %v1976_v27 = vld [vmem:[#allocation3 + $0x450] sm:$0xff] }
0x170f   : > { %v1902_v31 = vrot.slane %v1860_v28, 7  ;;  %1914 = vrot.lane.b32.xlu0 %v1860_v28, %s2497_s23  ;;  %v1908_v32 = vrot.slane %v1860_v28, 1  ;;  %v1975_v28 = vld [vmem:[#allocation3 + $0x448] sm:$0xff] }
0x1711   : > { %v1911_v33 = vsel %vm283_vm0, %v1908_v32, 0.0  ;;  %v1909_v34 = vsel %vm283_vm0, %v1907_v30, %v1908_v32  ;;  %v1903_v35 = vsel %vm276_vm1, %v1901_v29, %v1902_v31 }
0x1712   : > { %1921 = vrot.lane.b32.xlu2 %v1911_v33, %s2500_s26  ;;  %1919 = vrot.lane.b32.xlu1 %v1909_v34, %s2500_s26 }
0x175c   : > { %v1890_v43 = vpop.permute.xlu2 %1889 }
0x1764   : > { %v1913_v52 = vpop.permute.xlu2 %1912 }
0x1765   : > { %v1925_v54 = vsel %vm305_vm3, %v1906_v53, %v1913_v52 }
0x1769   : > { %v1883_v42 = vpop.permute.xlu0 %1882 }
0x176a   : > { %v1895_v44 = vsel %vm305_vm3, %v1876_v41, %v1883_v42 }
0x176b   : > { %v1897_v45 = vsel %vm423_vm6, %v1895_v44, %v1890_v43 }
0x176c   : > { %2300 = vmatmul.msk.f32.vlgmr.msrb.gmra.mxu3 %vm425_vm7, %v1897_v45  ;;  %v1922_v59 = vpop.permute.xlu2 %1921 }
0x1771   : > { %v1885_v46 = vpop.permute.xlu1 %1884 }
0x1772   : > { %v1896_v47 = vsel %vm305_vm3, %v1873_v24, %v1885_v46  ;;  %v1979_v24 = vld [vmem:[#allocation3 + $0x468] sm:$0xff] }
0x1773   : > { %2066 = vmatpush.msrb.mxu0 %v1979_v24 }
0x1774   : > { %v1892_v48 = vpop.permute.xlu0 %1891 }
0x1775   : > { %v1898_v51 = vsel %vm423_vm6, %v1896_v47, %v1892_v48  ;;  %2067 = vmatpush.msrb.mxu0 %v1978_v25 }
0x1776   : > { %2301 = vmatmul.msk.f32.gmra.mxu3 %vm425_vm7, %v1898_v51 }
0x1777   : > { %2068 = vmatpush.msrb.mxu0 %v1977_v26 }
0x1779   : > { %2069 = vmatpush.msrb.mxu0 %v1976_v27 }
0x177b   : > { %2070 = vmatpush.msrb.mxu0 %v1975_v28 }
0x1781   : > { %v1915_v57 = vpop.permute.xlu0 %1914 }
0x1782   : > { %v1926_v58 = vsel %vm305_vm3, %v1903_v35, %v1915_v57 }
0x1783   : > { %v1928_v60 = vsel %vm423_vm6, %v1926_v58, %v1922_v59 }
0x1784   : > { %v1920_v55 = vpop.permute.xlu1 %1919 }
0x1785   : > { %v1927_v56 = vsel %vm423_vm6, %v1925_v54, %v1920_v55 }
0x1786   : > { %2302 = vmatmul.msk.f32.gmra.mxu3 %vm425_vm7, %v1927_v56 }
0x178e   : > { %2303 = vmatmul.msk.f32.gmra.mxu3 %vm425_vm7, %v1928_v60 }
0x17ef   : > { %v1959_v62 = vpop.f32.mrf.mxu3 }
0x17f0   : > { %v1960_v63 = vadd.f32 %v2393_v61, %v1959_v62 }
0x17f2   : > { %v1971_v0 = vmax.f32 %v1960_v63, 0.0 }
0x17f4   : > { %1995 = vrot.lane.b32.xlu1 %v1971_v0, %s2497_s23  ;;  %v1984_v4 = vrot.slane %v1971_v0, 7  ;;  %v1990_v5 = vrot.slane %v1971_v0, 1 }
0x17f6   : > { %v1989_v30 = vsel %vm276_vm1, 0.0, %v1984_v4 }
0x17f9   : > { %v1962_v1 = vpop.f32.mrf.mxu3 }
0x17fa   : > { %v1963_v2 = vadd.f32 %v2393_v61, %v1962_v1 }
0x17fc   : > { %v1972_v3 = vmax.f32 %v1963_v2, 0.0 }
0x17fe   : > { %v1985_v6 = vrot.slane %v1972_v3, 7  ;;  %v1991_v7 = vrot.slane %v1972_v3, 1  ;;  %1997 = vrot.lane.b32.xlu2 %v1972_v3, %s2497_s23 }
0x1800   : > { %v1992_v8 = vsel %vm283_vm0, %v1990_v5, %v1991_v7  ;;  %v1994_v9 = vsel %vm283_vm0, %v1991_v7, 0.0  ;;  %v1986_v10 = vsel %vm276_vm1, %v1984_v4, %v1985_v6 }
0x1801   : > { %2002 = vrot.lane.b32.xlu0 %v1992_v8, %s2500_s26  ;;  %2004 = vrot.lane.b32.xlu1 %v1994_v9, %s2500_s26 }
0x1809   : > { %v1965_v11 = vpop.f32.mrf.mxu3 }
0x180a   : > { %v1966_v12 = vadd.f32 %v2393_v61, %v1965_v11 }
0x180c   : > { %v1973_v13 = vmax.f32 %v1966_v12, 0.0 }
0x180e   : > { %2025 = vrot.lane.b32.xlu0 %v1973_v13, %s2497_s23  ;;  %v2014_v16 = vrot.slane %v1973_v13, 7  ;;  %v2020_v17 = vrot.slane %v1973_v13, 1 }
0x1810   : > { %v2019_v38 = vsel %vm276_vm1, 0.0, %v2014_v16 }
0x1811   : > { %v1968_v39 = vpop.f32.mrf.mxu3 }
0x1812   : > { %v1969_v14 = vadd.f32 %v2393_v61, %v1968_v39 }
0x1814   : > { %v1974_v15 = vmax.f32 %v1969_v14, 0.0 }
0x1816   : > { %v2015_v18 = vrot.slane %v1974_v15, 7  ;;  %2027 = vrot.lane.b32.xlu1 %v1974_v15, %s2497_s23  ;;  %v2021_v19 = vrot.slane %v1974_v15, 1  ;;  %s2309_s23 = sshll.u32 %s2552_s22, 3 }
0x1817   : > { %s2115_s15 = scalar_lea.hbm %s3016_s5, %s2309_s23 }
0x1818   : > { %v2024_v20 = vsel %vm283_vm0, %v2021_v19, 0.0  ;;  %v2022_v21 = vsel %vm283_vm0, %v2020_v17, %v2021_v19  ;;  %v2016_v22 = vsel %vm276_vm1, %v2014_v16, %v2015_v18  ;;  %s2119_s17 = sshll.u32 %s2115_s15, 4  ;;  %s2120_s17 = int_to_ptr.hbm [resolvable:$true] %s2119_s17 }
0x1819   : > { %2034 = vrot.lane.b32.xlu0 %v2024_v20, %s2500_s26  ;;  %2032 = vrot.lane.b32.xlu2 %v2022_v21, %s2500_s26  ;;  %s2439_s30 = sshra.s32 %s2120_s17, 4  ;;  %s2440_s30 = int_to_ptr.hbm [resolvable:$true] %s2439_s30 }
0x181a   : > { %s2441_s22 = scalar_lea.hbm %s2440_s30, 8  ;;  %p2446_p4 = scmp.lt.s32.totalorder %s2440_s30, %s3016_s5 }
0x181b   : > { %p2442_p1 = scmp.ne.s32.totalorder %s2440_s30, %s2441_s22  ;;  %p2447_p7 = scmp.lt.s32.totalorder %s2445_s8, %s2441_s22 }
0x181d   : > { %p2443_p2 = pnand %p2442_p1, %p2569_p5  ;;  %p2448_p8 = por %p2447_p7, %p2446_p4 }
0x181f   : > { %p2444_p3 = pneg %p2443_p2 }
0x1821   : > { %p2449_p9 = pnand %p2448_p8, %p2444_p3 }
0x1858   : > { %v1998_v34 = vpop.permute.xlu2 %1997 }
0x1859   : > { %v2009_v36 = vsel %vm305_vm3, %v1986_v10, %v1998_v34 }
0x1866   : > { %v1996_v29 = vpop.permute.xlu1 %1995 }
0x1867   : > { %v2008_v31 = vsel %vm305_vm3, %v1989_v30, %v1996_v29 }
0x1873   : > { %v2003_v32 = vpop.permute.xlu0 %2002  ;;  %v2005_v35 = vpop.permute.xlu1 %2004 }
0x1874   : > { %v2010_v33 = vsel %vm423_vm6, %v2008_v31, %v2003_v32  ;;  %v2011_v49 = vsel %vm423_vm6, %v2009_v36, %v2005_v35  ;;  %v2033_v40 = vpop.permute.xlu2 %2032 }
0x1875   : > { %2304 = vmatmul.msk.f32.vlgmr.msrb.gmra.mxu0 %vm425_vm7, %v2010_v33 }
0x187d   : > { %2305 = vmatmul.msk.f32.gmra.mxu0 %vm425_vm7, %v2011_v49 }
0x1880   : > { %v2026_v37 = vpop.permute.xlu0 %2025 }
0x1881   : > { %v2038_v50 = vsel %vm305_vm3, %v2019_v38, %v2026_v37 }
0x1882   : > { %v2040_v41 = vsel %vm423_vm6, %v2038_v50, %v2033_v40 }
0x1885   : > { %2306 = vmatmul.msk.f32.gmra.mxu0 %vm425_vm7, %v2040_v41 }
0x1888   : > { %v2028_v42 = vpop.permute.xlu1 %2027 }
0x1889   : > { %v2039_v43 = vsel %vm305_vm3, %v2016_v22, %v2028_v42 }
0x188b   : > { %v2035_v44 = vpop.permute.xlu0 %2034 }
0x188c   : > { %v2041_v45 = vsel %vm423_vm6, %v2039_v43, %v2035_v44 }
0x188d   : > { %2307 = vmatmul.msk.f32.gmra.mxu0 %vm425_vm7, %v2041_v45 }
0x188e   : > { %2452 = shalt.err (!%p2449_p9)
}
0x188f   : > { %2316 = dma.vmem_to_hbm [thread:$0]  (%p2569_p5), %s2118_s16, 128, %s2120_s17, %s2098_s25   ;;  %v2394_v46 = vld [vmem:[#allocation3 + $0x478] ss:$0 sm:$0xff] }
0x1890   : > { %s260_s26 = scalar_lea.vmem %s3014_s3, %s2248_s13 }
0x18f2   : > { %v2072_v47 = vpop.f32.mrf.mxu0 }
0x18f3   : > { %v2073_v48 = vadd.f32 %v2394_v46, %v2072_v47 }
0x18f5   : > { %2084 = vst.msk [vmem:[%s260_s26] sm:$0xff] %vm302_vm2, %v2073_v48 }
0x18fa   : > { %v2075_v51 = vpop.f32.mrf.mxu0 }
0x18fb   : > { %v2076_v52 = vadd.f32 %v2394_v46, %v2075_v51 }
0x18fd   : > { %2085 = vst.msk [vmem:[%s260_s26 + $0x8] sm:$0xff] %vm302_vm2, %v2076_v52 }
0x1902   : > { %v2078_v53 = vpop.f32.mrf.mxu0 }
0x1903   : > { %v2079_v54 = vadd.f32 %v2394_v46, %v2078_v53 }
0x1905   : > { %2086 = vst.msk [vmem:[%s260_s26 + $0x10] sm:$0xff] %vm302_vm2, %v2079_v54 }
0x190a   : > { %v2081_v55 = vpop.f32.mrf.mxu0 }
0x190b   : > { %v2082_v56 = vadd.f32 %v2394_v46, %v2081_v55 }
0x190d   : > { %2087 = vst.msk [vmem:[%s260_s26 + $0x18] sm:$0xff] %vm302_vm2, %v2082_v56 }
0x190e PF: > { %p2328_p5 = scmp.ge.s32.totalorder %s2491_s21, 2  ;;  %s2146_s28 = sand.u32 1, %s2479_s18  }
0x190f   : > { %s2147_s12 = scalar_lea.sflag [#allocation5], %s2146_s28 }
0x1910   : > { %p2323_p10 = pnand %p2328_p5, %p2573_p6 }
0x1912   : > { %p2324_p11 = pneg %p2323_p10 }
0x1914   : > { %2474 = dma.done.wait (%p2324_p11), %s2147_s12, 128  }
0x1915   : > { %2476 = vsyncadd (%p2324_p11), %s2147_s12, 4294967168  ;;  %p17_p12 = scmp.ge.s32.totalorder %s2556_s24, 4   ;;  %s3019_s18 = smov %s2483_s19 }
0x1916   : > { %s3020_s19 = smov %s2487_s20  ;;  %s3021_s20 = smov %s2567_s27 }
0x1917   : > { %s3022_s21 = smov %s2556_s24  ;;  %19 = sbr.rel (!%p17_p12) target bundleno = 4 (0x4), region = 107 }
0x191c   :  { %2153 = vsyncpa [#allocation4], 1 }
0x191d   :  { %2155 = vsyncpa [#allocation4 + $0x1], 1 }
0x191e   :  { %2156 = vsyncpa [#allocation5], 1 }
0x191f   :  { %2158 = vsyncpa [#allocation5 + $0x1], 1 }

</bundles_post_ra>
